<compile_context>
chip_gen: v5e
topology: v5e:2x2
jax: 0.10.0
libtpu: 0.0.40
codegen_flags: <defaults>
</compile_context>

<pallas_src>
import functools

import jax
import jax.numpy as jnp
import numpy as np
from jax import lax
from jax.experimental import pallas as pl
from jax.experimental.pallas import tpu as pltpu


_KSZ = 5  # all convs in the imageSize<=32 branch are 5x5, stride 1, VALID


# ----------------------------------------------------------------------------
# In-kernel building blocks (trace into the single fused Pallas kernel).
# ----------------------------------------------------------------------------
def _rotate_lanes(a, d):
    """result[:, j] = a[:, (j + d) % N]  (lane-left rotate by d).

    Wrap-around lanes only ever land on positions that are never read as
    valid conv outputs, so the rotate is exact where it matters."""
    if d == 0:
        return a
    return jnp.concatenate([a[:, d:], a[:, :d]], axis=1)


def _conv_flat(act, w_big, b_rows, row_stride, col_stride):
    """5x5 VALID conv + bias + ReLU on a lane-flattened activation slab.

    act      : (rows, HW) value; row r = b*Cin + ci, lane j = y*W + x on the
               full-width spatial grid.  The layer reads its input grid with
               (row_stride, col_stride) lanes between neighbouring taps.
    w_big    : (Bb*Cout, 25*rpt) block weight matrix (see pack_params).
    b_rows   : (Bb*Cout, 1) per-output-row bias.
    Returns (Bb*Cout, HW); only lanes corresponding to valid output positions
    hold correct values (garbage elsewhere, never read downstream)."""
    rows, hw = act.shape
    rpt = w_big.shape[1] // (_KSZ * _KSZ)      # padded rows per tap (8)
    if rows < rpt:                             # pad to a full sublane tile
        act = jnp.concatenate(
            [act, jnp.zeros((rpt - rows, hw), act.dtype)], axis=0)
    pieces = [_rotate_lanes(act, ky * row_stride + kx * col_stride)
              for ky in range(_KSZ) for kx in range(_KSZ)]
    patches = jnp.concatenate(pieces, axis=0)  # in-VMEM im2col, (25*rpt, HW)
    y = jnp.dot(w_big, patches, preferred_element_type=jnp.float32) + b_rows
    return jnp.maximum(y, 0.0)


def _maxpool_flat(act, row_stride, col_stride):
    """nn.MaxPool2d(2, 2): max of 4 shifted slabs.  The stride-2 subsampling
    is free - pooled values stay at every other grid position and downstream
    layers simply double their lane strides."""
    m = jnp.maximum(act, _rotate_lanes(act, col_stride))
    n = jnp.maximum(_rotate_lanes(act, row_stride),
                    _rotate_lanes(act, row_stride + col_stride))
    return jnp.maximum(m, n)


def _head_flat(act, w_big, b_rows, row_stride, col_stride):
    """Last conv: 5x5 VALID over a 5x5 valid map (== dense 100 -> 2*ndf).

    Only output lane 0 of each batch block matters, so the 25 tap slabs are
    narrow direct slices (<=128 lanes) instead of full-width rotates."""
    rows, hw = act.shape
    rpt = w_big.shape[1] // (_KSZ * _KSZ)
    if rows < rpt:
        act = jnp.concatenate(
            [act, jnp.zeros((rpt - rows, hw), act.dtype)], axis=0)
    d_max = (_KSZ - 1) * (row_stride + col_stride)
    ws = min(128, hw - d_max)                  # 128 for the 32x32 case
    pieces = [act[:, d:d + ws]
              for d in (ky * row_stride + kx * col_stride
                        for ky in range(_KSZ) for kx in range(_KSZ))]
    patches = jnp.concatenate(pieces, axis=0)  # (25*rpt, ws)
    y = jnp.dot(w_big, patches, preferred_element_type=jnp.float32) + b_rows
    y = jnp.maximum(y, 0.0)
    return y[:, 0:1]                           # (Bb*Cout3, 1), row = b*C3+co


# ----------------------------------------------------------------------------
# The single fused kernel.
# ----------------------------------------------------------------------------
def _netf_kernel(x_ref, w1_ref, b1_ref, w2_ref, b2_ref, w3_ref, b3_ref,
                 out_ref, *, width):
    bb = x_ref.shape[0]
    # (Bb, Cin, H*W) -> (Bb*Cin, H*W) slab: rows = (b, ci), lanes = y*W + x.
    x = jnp.concatenate([x_ref[b] for b in range(bb)], axis=0)
    w = width
    a1 = _conv_flat(x, w1_ref[...], b1_ref[...], w, 1)        # 28x28 valid
    m1 = _maxpool_flat(a1, w, 1)                              # 14x14 @ stride 2
    a2 = _conv_flat(m1, w2_ref[...], b2_ref[...], 2 * w, 2)   # 10x10 valid
    m2 = _maxpool_flat(a2, 2 * w, 2)                          # 5x5  @ stride 4
    out_ref[...] = _head_flat(m2, w3_ref[...], b3_ref[...], 4 * w, 4)


# ----------------------------------------------------------------------------
# Host-side wrapper.
# ----------------------------------------------------------------------------
@functools.partial(jax.jit, static_argnames=("batch_block",))
def netf_forward(x, packed, *, batch_block):
    """x: (B, 3, H, W) NCHW float32.  Returns (B, 2*ndf)."""
    b, cin, h, w = x.shape
    bb = batch_block
    assert b % bb == 0, (b, bb)
    hw = h * w
    x_flat = x.reshape(b, cin, hw)             # free row-major reshape

    cout3 = packed["b3"].shape[0] // bb        # 2*ndf
    ndf = cout3 // 2

    h1 = h - 4
    h2 = h1 // 2 - 4
    macs = (b * ndf * h1 * h1 * cin * 25
            + b * ndf * h2 * h2 * ndf * 25
            + b * cout3 * ndf * 25)
    bytes_accessed = 4 * (int(x.size)
                          + sum(int(v.size) for v in packed.values())
                          + b * cout3)

    def full(arr):                             # whole-array block, every step
        return pl.BlockSpec(arr.shape, lambda i: (0,) * arr.ndim)

    out = pl.pallas_call(
        functools.partial(_netf_kernel, width=w),
        out_shape=jax.ShapeDtypeStruct((b * cout3, 1), jnp.float32),
        grid=(b // bb,),
        in_specs=[
            pl.BlockSpec((bb, cin, hw), lambda i: (i, 0, 0)),
            full(packed["w1"]), full(packed["b1"]),
            full(packed["w2"]), full(packed["b2"]),
            full(packed["w3"]), full(packed["b3"]),
        ],
        out_specs=pl.BlockSpec((bb * cout3, 1), lambda i: (i, 0)),
        compiler_params=pltpu.CompilerParams(
            dimension_semantics=("parallel",)),
        cost_estimate=pl.CostEstimate(flops=2 * macs, transcendentals=0,
                                      bytes_accessed=bytes_accessed),
    )(x_flat, packed["w1"], packed["b1"], packed["w2"], packed["b2"],
      packed["w3"], packed["b3"])
    return out.reshape(b, cout3)               # rows were b*cout3 + co


# ----------------------------------------------------------------------------
# Parameters (PyTorch OIHW layout) + one-time packing for the kernel.
# ----------------------------------------------------------------------------
def init_params(key, ndf):
    ks = jax.random.split(key, 6)

    def conv_w(k, cout, cin, ksz):
        fan_in = cin * ksz * ksz
        return (jax.random.normal(k, (cout, cin, ksz, ksz), jnp.float32)
                / jnp.sqrt(jnp.float32(fan_in)))

    return {
        "w1": conv_w(ks[0], ndf, 3, 5),
        "b1": 0.01 * jax.random.normal(ks[1], (ndf,), jnp.float32),
        "w2": conv_w(ks[2], ndf, ndf, 5),
        "b2": 0.01 * jax.random.normal(ks[3], (ndf,), jnp.float32),
        "w3": conv_w(ks[4], 2 * ndf, ndf, 5),
        "b3": 0.01 * jax.random.normal(ks[5], (2 * ndf,), jnp.float32),
    }


def pack_params(params, batch_block):
    """One-time packing of OIHW conv weights into the block matrices the
    fused kernel multiplies against its in-VMEM tap/patch slabs.

    For every tap t = ky*5+kx the patch slab holds `rpt` rows (the per-block
    activation rows b*Cin+ci padded to a sublane tile), so:
        big[b*Cout + co, t*rpt + b*Cin + ci] = w[co, ci, ky, kx]
    (zeros elsewhere -> per-batch block-diagonal, padding columns inert)."""
    bb = batch_block

    def pack_conv(w):
        w = np.asarray(w, np.float32)
        cout, cin, kh, kw = w.shape
        rpt = -(-(bb * cin) // 8) * 8          # pad rows/tap to a sublane tile
        big = np.zeros((bb * cout, kh * kw * rpt), np.float32)
        for b in range(bb):
            for ky in range(kh):
                for kx in range(kw):
                    t = ky * kw + kx
                    c0 = t * rpt + b * cin
                    big[b * cout:(b + 1) * cout, c0:c0 + cin] = w[:, :, ky, kx]
        return jnp.asarray(big)

    def pack_bias(bias):
        return jnp.asarray(np.tile(np.asarray(bias, np.float32), bb)[:, None])

    return {
        "w1": pack_conv(params["w1"]), "b1": pack_bias(params["b1"]),
        "w2": pack_conv(params["w2"]), "b2": pack_bias(params["b2"]),
        "w3": pack_conv(params["w3"]), "b3": pack_bias(params["b3"]),
    }


# ----------------------------------------------------------------------------
# Pure-JAX reference (correctness check only).
# ----------------------------------------------------------------------------
def netf_reference(x, params):
    def conv(x, w, b):
        y = lax.conv_general_dilated(
            x, w, window_strides=(1, 1), padding="VALID",
            dimension_numbers=("NCHW", "OIHW", "NCHW"))
        return jax.nn.relu(y + b[None, :, None, None])

    def pool(x):
        return lax.reduce_window(x, -jnp.inf, lax.max,
                                 (1, 1, 2, 2), (1, 1, 2, 2), "VALID")

    x = pool(conv(x, params["w1"], params["b1"]))
    x = pool(conv(x, params["w2"], params["b2"]))
    x = conv(x, params["w3"], params["b3"])
    return x.reshape(x.shape[0], -1)


if __name__ == "__main__":
    ndf = 4          # opt.ndf
    image_size = 32  # opt.imageSize (<= 32 -> only the base conv stack)
    batch = 2

    key = jax.random.PRNGKey(0)
    k_x, k_p = jax.random.split(key)
    x = jax.random.normal(k_x, (batch, 3, image_size, image_size), jnp.float32)
    params = init_params(k_p, ndf)
    packed = pack_params(params, batch_block=batch)

    out = jax.block_until_ready(netf_forward(x, packed, batch_block=batch))
    assert out.shape == (batch, 2 * ndf), out.shape

    ref = jax.block_until_ready(netf_reference(x, params))
    max_err = float(jnp.max(jnp.abs(out - ref)))
    # f32 MXU path typically agrees to ~1e-5; tolerance leaves margin for
    # multi-pass matmul rounding while still catching any real layout bug.
    assert max_err < 2e-2, f"mismatch vs reference: {max_err}"

    print("KERNEL_OK")
</pallas_src>

<mosaic_0001>
module attributes {stable_mosaic.version = 11 : i64} {
  func.func @_netf_kernel(%arg0: i32, %arg1: memref<2x3x1024xf32, #tpu.memory_space<vmem>>, %arg2: memref<8x200xf32, #tpu.memory_space<vmem>>, %arg3: memref<8x1xf32, #tpu.memory_space<vmem>>, %arg4: memref<8x200xf32, #tpu.memory_space<vmem>>, %arg5: memref<8x1xf32, #tpu.memory_space<vmem>>, %arg6: memref<16x200xf32, #tpu.memory_space<vmem>>, %arg7: memref<16x1xf32, #tpu.memory_space<vmem>>, %arg8: memref<16x1xf32, #tpu.memory_space<vmem>>) attributes {dimension_semantics = [#tpu.dimension_semantics<parallel>], iteration_bounds = array<i64: 1>, scalar_prefetch = 0 : i64, scratch_operands = 0 : i64, tpu.core_type = #tpu.core_type<tc>, window_params = [{transform_indices = @transform_0, window_bounds = array<i64: 2, 3, 1024>}, {pipeline_mode = #tpu.pipeline_mode<synchronous>, transform_indices = @transform_1, window_bounds = array<i64: 8, 200>}, {pipeline_mode = #tpu.pipeline_mode<synchronous>, transform_indices = @transform_2, window_bounds = array<i64: 8, 1>}, {pipeline_mode = #tpu.pipeline_mode<synchronous>, transform_indices = @transform_3, window_bounds = array<i64: 8, 200>}, {pipeline_mode = #tpu.pipeline_mode<synchronous>, transform_indices = @transform_4, window_bounds = array<i64: 8, 1>}, {pipeline_mode = #tpu.pipeline_mode<synchronous>, transform_indices = @transform_5, window_bounds = array<i64: 16, 200>}, {pipeline_mode = #tpu.pipeline_mode<synchronous>, transform_indices = @transform_6, window_bounds = array<i64: 16, 1>}, {transform_indices = @transform_7, window_bounds = array<i64: 16, 1>}]} {
    %c0 = arith.constant 0 : index
    %c0_0 = arith.constant 0 : index
    %c0_1 = arith.constant 0 : index
    %0 = vector.load %arg1[%c0, %c0_0, %c0_1] : memref<2x3x1024xf32, #tpu.memory_space<vmem>>, vector<1x3x1024xf32>
    %1 = vector.shape_cast %0 : vector<1x3x1024xf32> to vector<3x1024xf32>
    %c1 = arith.constant 1 : index
    %c0_2 = arith.constant 0 : index
    %c0_3 = arith.constant 0 : index
    %2 = vector.load %arg1[%c1, %c0_2, %c0_3] : memref<2x3x1024xf32, #tpu.memory_space<vmem>>, vector<1x3x1024xf32>
    %3 = vector.shape_cast %2 : vector<1x3x1024xf32> to vector<3x1024xf32>
    %4 = tpu.concatenate %1, %3 in 0 : vector<3x1024xf32>, vector<3x1024xf32> -> vector<6x1024xf32>
    %c0_4 = arith.constant 0 : index
    %c0_5 = arith.constant 0 : index
    %5 = vector.load %arg2[%c0_4, %c0_5] : memref<8x200xf32, #tpu.memory_space<vmem>>, vector<8x200xf32>
    %c0_6 = arith.constant 0 : index
    %c0_7 = arith.constant 0 : index
    %6 = vector.load %arg3[%c0_6, %c0_7] : memref<8x1xf32, #tpu.memory_space<vmem>>, vector<8x1xf32>
    %cst = arith.constant 0.000000e+00 : f32
    %7 = vector.broadcast %cst : f32 to vector<2x1024xf32>
    %8 = tpu.concatenate %4, %7 in 0 : vector<6x1024xf32>, vector<2x1024xf32> -> vector<8x1024xf32>
    %9 = vector.extract_strided_slice %8 {offsets = [0, 1], sizes = [8, 1023], strides = [1, 1]} : vector<8x1024xf32> to vector<8x1023xf32>
    %10 = vector.extract_strided_slice %8 {offsets = [0, 0], sizes = [8, 1], strides = [1, 1]} : vector<8x1024xf32> to vector<8x1xf32>
    %11 = tpu.concatenate %9, %10 in 1 : vector<8x1023xf32>, vector<8x1xf32> -> vector<8x1024xf32>
    %12 = vector.extract_strided_slice %8 {offsets = [0, 2], sizes = [8, 1022], strides = [1, 1]} : vector<8x1024xf32> to vector<8x1022xf32>
    %13 = vector.extract_strided_slice %8 {offsets = [0, 0], sizes = [8, 2], strides = [1, 1]} : vector<8x1024xf32> to vector<8x2xf32>
    %14 = tpu.concatenate %12, %13 in 1 : vector<8x1022xf32>, vector<8x2xf32> -> vector<8x1024xf32>
    %15 = vector.extract_strided_slice %8 {offsets = [0, 3], sizes = [8, 1021], strides = [1, 1]} : vector<8x1024xf32> to vector<8x1021xf32>
    %16 = vector.extract_strided_slice %8 {offsets = [0, 0], sizes = [8, 3], strides = [1, 1]} : vector<8x1024xf32> to vector<8x3xf32>
    %17 = tpu.concatenate %15, %16 in 1 : vector<8x1021xf32>, vector<8x3xf32> -> vector<8x1024xf32>
    %18 = vector.extract_strided_slice %8 {offsets = [0, 4], sizes = [8, 1020], strides = [1, 1]} : vector<8x1024xf32> to vector<8x1020xf32>
    %19 = vector.extract_strided_slice %8 {offsets = [0, 0], sizes = [8, 4], strides = [1, 1]} : vector<8x1024xf32> to vector<8x4xf32>
    %20 = tpu.concatenate %18, %19 in 1 : vector<8x1020xf32>, vector<8x4xf32> -> vector<8x1024xf32>
    %21 = vector.extract_strided_slice %8 {offsets = [0, 32], sizes = [8, 992], strides = [1, 1]} : vector<8x1024xf32> to vector<8x992xf32>
    %22 = vector.extract_strided_slice %8 {offsets = [0, 0], sizes = [8, 32], strides = [1, 1]} : vector<8x1024xf32> to vector<8x32xf32>
    %23 = tpu.concatenate %21, %22 in 1 : vector<8x992xf32>, vector<8x32xf32> -> vector<8x1024xf32>
    %24 = vector.extract_strided_slice %8 {offsets = [0, 33], sizes = [8, 991], strides = [1, 1]} : vector<8x1024xf32> to vector<8x991xf32>
    %25 = vector.extract_strided_slice %8 {offsets = [0, 0], sizes = [8, 33], strides = [1, 1]} : vector<8x1024xf32> to vector<8x33xf32>
    %26 = tpu.concatenate %24, %25 in 1 : vector<8x991xf32>, vector<8x33xf32> -> vector<8x1024xf32>
    %27 = vector.extract_strided_slice %8 {offsets = [0, 34], sizes = [8, 990], strides = [1, 1]} : vector<8x1024xf32> to vector<8x990xf32>
    %28 = vector.extract_strided_slice %8 {offsets = [0, 0], sizes = [8, 34], strides = [1, 1]} : vector<8x1024xf32> to vector<8x34xf32>
    %29 = tpu.concatenate %27, %28 in 1 : vector<8x990xf32>, vector<8x34xf32> -> vector<8x1024xf32>
    %30 = vector.extract_strided_slice %8 {offsets = [0, 35], sizes = [8, 989], strides = [1, 1]} : vector<8x1024xf32> to vector<8x989xf32>
    %31 = vector.extract_strided_slice %8 {offsets = [0, 0], sizes = [8, 35], strides = [1, 1]} : vector<8x1024xf32> to vector<8x35xf32>
    %32 = tpu.concatenate %30, %31 in 1 : vector<8x989xf32>, vector<8x35xf32> -> vector<8x1024xf32>
    %33 = vector.extract_strided_slice %8 {offsets = [0, 36], sizes = [8, 988], strides = [1, 1]} : vector<8x1024xf32> to vector<8x988xf32>
    %34 = vector.extract_strided_slice %8 {offsets = [0, 0], sizes = [8, 36], strides = [1, 1]} : vector<8x1024xf32> to vector<8x36xf32>
    %35 = tpu.concatenate %33, %34 in 1 : vector<8x988xf32>, vector<8x36xf32> -> vector<8x1024xf32>
    %36 = vector.extract_strided_slice %8 {offsets = [0, 64], sizes = [8, 960], strides = [1, 1]} : vector<8x1024xf32> to vector<8x960xf32>
    %37 = vector.extract_strided_slice %8 {offsets = [0, 0], sizes = [8, 64], strides = [1, 1]} : vector<8x1024xf32> to vector<8x64xf32>
    %38 = tpu.concatenate %36, %37 in 1 : vector<8x960xf32>, vector<8x64xf32> -> vector<8x1024xf32>
    %39 = vector.extract_strided_slice %8 {offsets = [0, 65], sizes = [8, 959], strides = [1, 1]} : vector<8x1024xf32> to vector<8x959xf32>
    %40 = vector.extract_strided_slice %8 {offsets = [0, 0], sizes = [8, 65], strides = [1, 1]} : vector<8x1024xf32> to vector<8x65xf32>
    %41 = tpu.concatenate %39, %40 in 1 : vector<8x959xf32>, vector<8x65xf32> -> vector<8x1024xf32>
    %42 = vector.extract_strided_slice %8 {offsets = [0, 66], sizes = [8, 958], strides = [1, 1]} : vector<8x1024xf32> to vector<8x958xf32>
    %43 = vector.extract_strided_slice %8 {offsets = [0, 0], sizes = [8, 66], strides = [1, 1]} : vector<8x1024xf32> to vector<8x66xf32>
    %44 = tpu.concatenate %42, %43 in 1 : vector<8x958xf32>, vector<8x66xf32> -> vector<8x1024xf32>
    %45 = vector.extract_strided_slice %8 {offsets = [0, 67], sizes = [8, 957], strides = [1, 1]} : vector<8x1024xf32> to vector<8x957xf32>
    %46 = vector.extract_strided_slice %8 {offsets = [0, 0], sizes = [8, 67], strides = [1, 1]} : vector<8x1024xf32> to vector<8x67xf32>
    %47 = tpu.concatenate %45, %46 in 1 : vector<8x957xf32>, vector<8x67xf32> -> vector<8x1024xf32>
    %48 = vector.extract_strided_slice %8 {offsets = [0, 68], sizes = [8, 956], strides = [1, 1]} : vector<8x1024xf32> to vector<8x956xf32>
    %49 = vector.extract_strided_slice %8 {offsets = [0, 0], sizes = [8, 68], strides = [1, 1]} : vector<8x1024xf32> to vector<8x68xf32>
    %50 = tpu.concatenate %48, %49 in 1 : vector<8x956xf32>, vector<8x68xf32> -> vector<8x1024xf32>
    %51 = vector.extract_strided_slice %8 {offsets = [0, 96], sizes = [8, 928], strides = [1, 1]} : vector<8x1024xf32> to vector<8x928xf32>
    %52 = vector.extract_strided_slice %8 {offsets = [0, 0], sizes = [8, 96], strides = [1, 1]} : vector<8x1024xf32> to vector<8x96xf32>
    %53 = tpu.concatenate %51, %52 in 1 : vector<8x928xf32>, vector<8x96xf32> -> vector<8x1024xf32>
    %54 = vector.extract_strided_slice %8 {offsets = [0, 97], sizes = [8, 927], strides = [1, 1]} : vector<8x1024xf32> to vector<8x927xf32>
    %55 = vector.extract_strided_slice %8 {offsets = [0, 0], sizes = [8, 97], strides = [1, 1]} : vector<8x1024xf32> to vector<8x97xf32>
    %56 = tpu.concatenate %54, %55 in 1 : vector<8x927xf32>, vector<8x97xf32> -> vector<8x1024xf32>
    %57 = vector.extract_strided_slice %8 {offsets = [0, 98], sizes = [8, 926], strides = [1, 1]} : vector<8x1024xf32> to vector<8x926xf32>
    %58 = vector.extract_strided_slice %8 {offsets = [0, 0], sizes = [8, 98], strides = [1, 1]} : vector<8x1024xf32> to vector<8x98xf32>
    %59 = tpu.concatenate %57, %58 in 1 : vector<8x926xf32>, vector<8x98xf32> -> vector<8x1024xf32>
    %60 = vector.extract_strided_slice %8 {offsets = [0, 99], sizes = [8, 925], strides = [1, 1]} : vector<8x1024xf32> to vector<8x925xf32>
    %61 = vector.extract_strided_slice %8 {offsets = [0, 0], sizes = [8, 99], strides = [1, 1]} : vector<8x1024xf32> to vector<8x99xf32>
    %62 = tpu.concatenate %60, %61 in 1 : vector<8x925xf32>, vector<8x99xf32> -> vector<8x1024xf32>
    %63 = vector.extract_strided_slice %8 {offsets = [0, 100], sizes = [8, 924], strides = [1, 1]} : vector<8x1024xf32> to vector<8x924xf32>
    %64 = vector.extract_strided_slice %8 {offsets = [0, 0], sizes = [8, 100], strides = [1, 1]} : vector<8x1024xf32> to vector<8x100xf32>
    %65 = tpu.concatenate %63, %64 in 1 : vector<8x924xf32>, vector<8x100xf32> -> vector<8x1024xf32>
    %66 = vector.extract_strided_slice %8 {offsets = [0, 128], sizes = [8, 896], strides = [1, 1]} : vector<8x1024xf32> to vector<8x896xf32>
    %67 = vector.extract_strided_slice %8 {offsets = [0, 0], sizes = [8, 128], strides = [1, 1]} : vector<8x1024xf32> to vector<8x128xf32>
    %68 = tpu.concatenate %66, %67 in 1 : vector<8x896xf32>, vector<8x128xf32> -> vector<8x1024xf32>
    %69 = vector.extract_strided_slice %8 {offsets = [0, 129], sizes = [8, 895], strides = [1, 1]} : vector<8x1024xf32> to vector<8x895xf32>
    %70 = vector.extract_strided_slice %8 {offsets = [0, 0], sizes = [8, 129], strides = [1, 1]} : vector<8x1024xf32> to vector<8x129xf32>
    %71 = tpu.concatenate %69, %70 in 1 : vector<8x895xf32>, vector<8x129xf32> -> vector<8x1024xf32>
    %72 = vector.extract_strided_slice %8 {offsets = [0, 130], sizes = [8, 894], strides = [1, 1]} : vector<8x1024xf32> to vector<8x894xf32>
    %73 = vector.extract_strided_slice %8 {offsets = [0, 0], sizes = [8, 130], strides = [1, 1]} : vector<8x1024xf32> to vector<8x130xf32>
    %74 = tpu.concatenate %72, %73 in 1 : vector<8x894xf32>, vector<8x130xf32> -> vector<8x1024xf32>
    %75 = vector.extract_strided_slice %8 {offsets = [0, 131], sizes = [8, 893], strides = [1, 1]} : vector<8x1024xf32> to vector<8x893xf32>
    %76 = vector.extract_strided_slice %8 {offsets = [0, 0], sizes = [8, 131], strides = [1, 1]} : vector<8x1024xf32> to vector<8x131xf32>
    %77 = tpu.concatenate %75, %76 in 1 : vector<8x893xf32>, vector<8x131xf32> -> vector<8x1024xf32>
    %78 = vector.extract_strided_slice %8 {offsets = [0, 132], sizes = [8, 892], strides = [1, 1]} : vector<8x1024xf32> to vector<8x892xf32>
    %79 = vector.extract_strided_slice %8 {offsets = [0, 0], sizes = [8, 132], strides = [1, 1]} : vector<8x1024xf32> to vector<8x132xf32>
    %80 = tpu.concatenate %78, %79 in 1 : vector<8x892xf32>, vector<8x132xf32> -> vector<8x1024xf32>
    %81 = tpu.concatenate %8, %11, %14, %17, %20, %23, %26, %29, %32, %35, %38, %41, %44, %47, %50, %53 in 0 : vector<8x1024xf32>, vector<8x1024xf32>, vector<8x1024xf32>, vector<8x1024xf32>, vector<8x1024xf32>, vector<8x1024xf32>, vector<8x1024xf32>, vector<8x1024xf32>, vector<8x1024xf32>, vector<8x1024xf32>, vector<8x1024xf32>, vector<8x1024xf32>, vector<8x1024xf32>, vector<8x1024xf32>, vector<8x1024xf32>, vector<8x1024xf32> -> vector<128x1024xf32>
    %82 = tpu.concatenate %56, %59, %62, %65, %68, %71, %74, %77, %80 in 0 : vector<8x1024xf32>, vector<8x1024xf32>, vector<8x1024xf32>, vector<8x1024xf32>, vector<8x1024xf32>, vector<8x1024xf32>, vector<8x1024xf32>, vector<8x1024xf32>, vector<8x1024xf32> -> vector<72x1024xf32>
    %83 = tpu.concatenate %81, %82 in 0 : vector<128x1024xf32>, vector<72x1024xf32> -> vector<200x1024xf32>
    %cst_8 = arith.constant dense<0.000000e+00> : vector<8x1024xf32>
    %84 = tpu.matmul %5, %83, %cst_8 {dimension_numbers = #tpu.dot_dimension_numbers<[1], [0], [0], [1], [0, 0, 1, 1], [], []>} : vector<8x200xf32>, vector<200x1024xf32>, vector<8x1024xf32> -> vector<8x1024xf32>
    %85 = vector.broadcast %6 : vector<8x1xf32> to vector<8x1024xf32>
    %86 = arith.addf %84, %85 : vector<8x1024xf32>
    %cst_9 = arith.constant 0.000000e+00 : f32
    %87 = vector.broadcast %cst_9 : f32 to vector<8x1024xf32>
    %88 = arith.maximumf %86, %87 : vector<8x1024xf32>
    %89 = vector.extract_strided_slice %88 {offsets = [0, 1], sizes = [8, 1023], strides = [1, 1]} : vector<8x1024xf32> to vector<8x1023xf32>
    %90 = vector.extract_strided_slice %88 {offsets = [0, 0], sizes = [8, 1], strides = [1, 1]} : vector<8x1024xf32> to vector<8x1xf32>
    %91 = tpu.concatenate %89, %90 in 1 : vector<8x1023xf32>, vector<8x1xf32> -> vector<8x1024xf32>
    %92 = arith.maximumf %88, %91 : vector<8x1024xf32>
    %93 = vector.extract_strided_slice %88 {offsets = [0, 32], sizes = [8, 992], strides = [1, 1]} : vector<8x1024xf32> to vector<8x992xf32>
    %94 = vector.extract_strided_slice %88 {offsets = [0, 0], sizes = [8, 32], strides = [1, 1]} : vector<8x1024xf32> to vector<8x32xf32>
    %95 = tpu.concatenate %93, %94 in 1 : vector<8x992xf32>, vector<8x32xf32> -> vector<8x1024xf32>
    %96 = vector.extract_strided_slice %88 {offsets = [0, 33], sizes = [8, 991], strides = [1, 1]} : vector<8x1024xf32> to vector<8x991xf32>
    %97 = vector.extract_strided_slice %88 {offsets = [0, 0], sizes = [8, 33], strides = [1, 1]} : vector<8x1024xf32> to vector<8x33xf32>
    %98 = tpu.concatenate %96, %97 in 1 : vector<8x991xf32>, vector<8x33xf32> -> vector<8x1024xf32>
    %99 = arith.maximumf %95, %98 : vector<8x1024xf32>
    %100 = arith.maximumf %92, %99 : vector<8x1024xf32>
    %c0_10 = arith.constant 0 : index
    %c0_11 = arith.constant 0 : index
    %101 = vector.load %arg4[%c0_10, %c0_11] : memref<8x200xf32, #tpu.memory_space<vmem>>, vector<8x200xf32>
    %c0_12 = arith.constant 0 : index
    %c0_13 = arith.constant 0 : index
    %102 = vector.load %arg5[%c0_12, %c0_13] : memref<8x1xf32, #tpu.memory_space<vmem>>, vector<8x1xf32>
    %103 = vector.extract_strided_slice %100 {offsets = [0, 2], sizes = [8, 1022], strides = [1, 1]} : vector<8x1024xf32> to vector<8x1022xf32>
    %104 = vector.extract_strided_slice %100 {offsets = [0, 0], sizes = [8, 2], strides = [1, 1]} : vector<8x1024xf32> to vector<8x2xf32>
    %105 = tpu.concatenate %103, %104 in 1 : vector<8x1022xf32>, vector<8x2xf32> -> vector<8x1024xf32>
    %106 = vector.extract_strided_slice %100 {offsets = [0, 4], sizes = [8, 1020], strides = [1, 1]} : vector<8x1024xf32> to vector<8x1020xf32>
    %107 = vector.extract_strided_slice %100 {offsets = [0, 0], sizes = [8, 4], strides = [1, 1]} : vector<8x1024xf32> to vector<8x4xf32>
    %108 = tpu.concatenate %106, %107 in 1 : vector<8x1020xf32>, vector<8x4xf32> -> vector<8x1024xf32>
    %109 = vector.extract_strided_slice %100 {offsets = [0, 6], sizes = [8, 1018], strides = [1, 1]} : vector<8x1024xf32> to vector<8x1018xf32>
    %110 = vector.extract_strided_slice %100 {offsets = [0, 0], sizes = [8, 6], strides = [1, 1]} : vector<8x1024xf32> to vector<8x6xf32>
    %111 = tpu.concatenate %109, %110 in 1 : vector<8x1018xf32>, vector<8x6xf32> -> vector<8x1024xf32>
    %112 = vector.extract_strided_slice %100 {offsets = [0, 8], sizes = [8, 1016], strides = [1, 1]} : vector<8x1024xf32> to vector<8x1016xf32>
    %113 = vector.extract_strided_slice %100 {offsets = [0, 0], sizes = [8, 8], strides = [1, 1]} : vector<8x1024xf32> to vector<8x8xf32>
    %114 = tpu.concatenate %112, %113 in 1 : vector<8x1016xf32>, vector<8x8xf32> -> vector<8x1024xf32>
    %115 = vector.extract_strided_slice %100 {offsets = [0, 64], sizes = [8, 960], strides = [1, 1]} : vector<8x1024xf32> to vector<8x960xf32>
    %116 = vector.extract_strided_slice %100 {offsets = [0, 0], sizes = [8, 64], strides = [1, 1]} : vector<8x1024xf32> to vector<8x64xf32>
    %117 = tpu.concatenate %115, %116 in 1 : vector<8x960xf32>, vector<8x64xf32> -> vector<8x1024xf32>
    %118 = vector.extract_strided_slice %100 {offsets = [0, 66], sizes = [8, 958], strides = [1, 1]} : vector<8x1024xf32> to vector<8x958xf32>
    %119 = vector.extract_strided_slice %100 {offsets = [0, 0], sizes = [8, 66], strides = [1, 1]} : vector<8x1024xf32> to vector<8x66xf32>
    %120 = tpu.concatenate %118, %119 in 1 : vector<8x958xf32>, vector<8x66xf32> -> vector<8x1024xf32>
    %121 = vector.extract_strided_slice %100 {offsets = [0, 68], sizes = [8, 956], strides = [1, 1]} : vector<8x1024xf32> to vector<8x956xf32>
    %122 = vector.extract_strided_slice %100 {offsets = [0, 0], sizes = [8, 68], strides = [1, 1]} : vector<8x1024xf32> to vector<8x68xf32>
    %123 = tpu.concatenate %121, %122 in 1 : vector<8x956xf32>, vector<8x68xf32> -> vector<8x1024xf32>
    %124 = vector.extract_strided_slice %100 {offsets = [0, 70], sizes = [8, 954], strides = [1, 1]} : vector<8x1024xf32> to vector<8x954xf32>
    %125 = vector.extract_strided_slice %100 {offsets = [0, 0], sizes = [8, 70], strides = [1, 1]} : vector<8x1024xf32> to vector<8x70xf32>
    %126 = tpu.concatenate %124, %125 in 1 : vector<8x954xf32>, vector<8x70xf32> -> vector<8x1024xf32>
    %127 = vector.extract_strided_slice %100 {offsets = [0, 72], sizes = [8, 952], strides = [1, 1]} : vector<8x1024xf32> to vector<8x952xf32>
    %128 = vector.extract_strided_slice %100 {offsets = [0, 0], sizes = [8, 72], strides = [1, 1]} : vector<8x1024xf32> to vector<8x72xf32>
    %129 = tpu.concatenate %127, %128 in 1 : vector<8x952xf32>, vector<8x72xf32> -> vector<8x1024xf32>
    %130 = vector.extract_strided_slice %100 {offsets = [0, 128], sizes = [8, 896], strides = [1, 1]} : vector<8x1024xf32> to vector<8x896xf32>
    %131 = vector.extract_strided_slice %100 {offsets = [0, 0], sizes = [8, 128], strides = [1, 1]} : vector<8x1024xf32> to vector<8x128xf32>
    %132 = tpu.concatenate %130, %131 in 1 : vector<8x896xf32>, vector<8x128xf32> -> vector<8x1024xf32>
    %133 = vector.extract_strided_slice %100 {offsets = [0, 130], sizes = [8, 894], strides = [1, 1]} : vector<8x1024xf32> to vector<8x894xf32>
    %134 = vector.extract_strided_slice %100 {offsets = [0, 0], sizes = [8, 130], strides = [1, 1]} : vector<8x1024xf32> to vector<8x130xf32>
    %135 = tpu.concatenate %133, %134 in 1 : vector<8x894xf32>, vector<8x130xf32> -> vector<8x1024xf32>
    %136 = vector.extract_strided_slice %100 {offsets = [0, 132], sizes = [8, 892], strides = [1, 1]} : vector<8x1024xf32> to vector<8x892xf32>
    %137 = vector.extract_strided_slice %100 {offsets = [0, 0], sizes = [8, 132], strides = [1, 1]} : vector<8x1024xf32> to vector<8x132xf32>
    %138 = tpu.concatenate %136, %137 in 1 : vector<8x892xf32>, vector<8x132xf32> -> vector<8x1024xf32>
    %139 = vector.extract_strided_slice %100 {offsets = [0, 134], sizes = [8, 890], strides = [1, 1]} : vector<8x1024xf32> to vector<8x890xf32>
    %140 = vector.extract_strided_slice %100 {offsets = [0, 0], sizes = [8, 134], strides = [1, 1]} : vector<8x1024xf32> to vector<8x134xf32>
    %141 = tpu.concatenate %139, %140 in 1 : vector<8x890xf32>, vector<8x134xf32> -> vector<8x1024xf32>
    %142 = vector.extract_strided_slice %100 {offsets = [0, 136], sizes = [8, 888], strides = [1, 1]} : vector<8x1024xf32> to vector<8x888xf32>
    %143 = vector.extract_strided_slice %100 {offsets = [0, 0], sizes = [8, 136], strides = [1, 1]} : vector<8x1024xf32> to vector<8x136xf32>
    %144 = tpu.concatenate %142, %143 in 1 : vector<8x888xf32>, vector<8x136xf32> -> vector<8x1024xf32>
    %145 = vector.extract_strided_slice %100 {offsets = [0, 192], sizes = [8, 832], strides = [1, 1]} : vector<8x1024xf32> to vector<8x832xf32>
    %146 = vector.extract_strided_slice %100 {offsets = [0, 0], sizes = [8, 192], strides = [1, 1]} : vector<8x1024xf32> to vector<8x192xf32>
    %147 = tpu.concatenate %145, %146 in 1 : vector<8x832xf32>, vector<8x192xf32> -> vector<8x1024xf32>
    %148 = vector.extract_strided_slice %100 {offsets = [0, 194], sizes = [8, 830], strides = [1, 1]} : vector<8x1024xf32> to vector<8x830xf32>
    %149 = vector.extract_strided_slice %100 {offsets = [0, 0], sizes = [8, 194], strides = [1, 1]} : vector<8x1024xf32> to vector<8x194xf32>
    %150 = tpu.concatenate %148, %149 in 1 : vector<8x830xf32>, vector<8x194xf32> -> vector<8x1024xf32>
    %151 = vector.extract_strided_slice %100 {offsets = [0, 196], sizes = [8, 828], strides = [1, 1]} : vector<8x1024xf32> to vector<8x828xf32>
    %152 = vector.extract_strided_slice %100 {offsets = [0, 0], sizes = [8, 196], strides = [1, 1]} : vector<8x1024xf32> to vector<8x196xf32>
    %153 = tpu.concatenate %151, %152 in 1 : vector<8x828xf32>, vector<8x196xf32> -> vector<8x1024xf32>
    %154 = vector.extract_strided_slice %100 {offsets = [0, 198], sizes = [8, 826], strides = [1, 1]} : vector<8x1024xf32> to vector<8x826xf32>
    %155 = vector.extract_strided_slice %100 {offsets = [0, 0], sizes = [8, 198], strides = [1, 1]} : vector<8x1024xf32> to vector<8x198xf32>
    %156 = tpu.concatenate %154, %155 in 1 : vector<8x826xf32>, vector<8x198xf32> -> vector<8x1024xf32>
    %157 = vector.extract_strided_slice %100 {offsets = [0, 200], sizes = [8, 824], strides = [1, 1]} : vector<8x1024xf32> to vector<8x824xf32>
    %158 = vector.extract_strided_slice %100 {offsets = [0, 0], sizes = [8, 200], strides = [1, 1]} : vector<8x1024xf32> to vector<8x200xf32>
    %159 = tpu.concatenate %157, %158 in 1 : vector<8x824xf32>, vector<8x200xf32> -> vector<8x1024xf32>
    %160 = vector.extract_strided_slice %100 {offsets = [0, 256], sizes = [8, 768], strides = [1, 1]} : vector<8x1024xf32> to vector<8x768xf32>
    %161 = vector.extract_strided_slice %100 {offsets = [0, 0], sizes = [8, 256], strides = [1, 1]} : vector<8x1024xf32> to vector<8x256xf32>
    %162 = tpu.concatenate %160, %161 in 1 : vector<8x768xf32>, vector<8x256xf32> -> vector<8x1024xf32>
    %163 = vector.extract_strided_slice %100 {offsets = [0, 258], sizes = [8, 766], strides = [1, 1]} : vector<8x1024xf32> to vector<8x766xf32>
    %164 = vector.extract_strided_slice %100 {offsets = [0, 0], sizes = [8, 258], strides = [1, 1]} : vector<8x1024xf32> to vector<8x258xf32>
    %165 = tpu.concatenate %163, %164 in 1 : vector<8x766xf32>, vector<8x258xf32> -> vector<8x1024xf32>
    %166 = vector.extract_strided_slice %100 {offsets = [0, 260], sizes = [8, 764], strides = [1, 1]} : vector<8x1024xf32> to vector<8x764xf32>
    %167 = vector.extract_strided_slice %100 {offsets = [0, 0], sizes = [8, 260], strides = [1, 1]} : vector<8x1024xf32> to vector<8x260xf32>
    %168 = tpu.concatenate %166, %167 in 1 : vector<8x764xf32>, vector<8x260xf32> -> vector<8x1024xf32>
    %169 = vector.extract_strided_slice %100 {offsets = [0, 262], sizes = [8, 762], strides = [1, 1]} : vector<8x1024xf32> to vector<8x762xf32>
    %170 = vector.extract_strided_slice %100 {offsets = [0, 0], sizes = [8, 262], strides = [1, 1]} : vector<8x1024xf32> to vector<8x262xf32>
    %171 = tpu.concatenate %169, %170 in 1 : vector<8x762xf32>, vector<8x262xf32> -> vector<8x1024xf32>
    %172 = vector.extract_strided_slice %100 {offsets = [0, 264], sizes = [8, 760], strides = [1, 1]} : vector<8x1024xf32> to vector<8x760xf32>
    %173 = vector.extract_strided_slice %100 {offsets = [0, 0], sizes = [8, 264], strides = [1, 1]} : vector<8x1024xf32> to vector<8x264xf32>
    %174 = tpu.concatenate %172, %173 in 1 : vector<8x760xf32>, vector<8x264xf32> -> vector<8x1024xf32>
    %175 = tpu.concatenate %100, %105, %108, %111, %114, %117, %120, %123, %126, %129, %132, %135, %138, %141, %144, %147 in 0 : vector<8x1024xf32>, vector<8x1024xf32>, vector<8x1024xf32>, vector<8x1024xf32>, vector<8x1024xf32>, vector<8x1024xf32>, vector<8x1024xf32>, vector<8x1024xf32>, vector<8x1024xf32>, vector<8x1024xf32>, vector<8x1024xf32>, vector<8x1024xf32>, vector<8x1024xf32>, vector<8x1024xf32>, vector<8x1024xf32>, vector<8x1024xf32> -> vector<128x1024xf32>
    %176 = tpu.concatenate %150, %153, %156, %159, %162, %165, %168, %171, %174 in 0 : vector<8x1024xf32>, vector<8x1024xf32>, vector<8x1024xf32>, vector<8x1024xf32>, vector<8x1024xf32>, vector<8x1024xf32>, vector<8x1024xf32>, vector<8x1024xf32>, vector<8x1024xf32> -> vector<72x1024xf32>
    %177 = tpu.concatenate %175, %176 in 0 : vector<128x1024xf32>, vector<72x1024xf32> -> vector<200x1024xf32>
    %cst_14 = arith.constant dense<0.000000e+00> : vector<8x1024xf32>
    %178 = tpu.matmul %101, %177, %cst_14 {dimension_numbers = #tpu.dot_dimension_numbers<[1], [0], [0], [1], [0, 0, 1, 1], [], []>} : vector<8x200xf32>, vector<200x1024xf32>, vector<8x1024xf32> -> vector<8x1024xf32>
    %179 = vector.broadcast %102 : vector<8x1xf32> to vector<8x1024xf32>
    %180 = arith.addf %178, %179 : vector<8x1024xf32>
    %cst_15 = arith.constant 0.000000e+00 : f32
    %181 = vector.broadcast %cst_15 : f32 to vector<8x1024xf32>
    %182 = arith.maximumf %180, %181 : vector<8x1024xf32>
    %183 = vector.extract_strided_slice %182 {offsets = [0, 2], sizes = [8, 1022], strides = [1, 1]} : vector<8x1024xf32> to vector<8x1022xf32>
    %184 = vector.extract_strided_slice %182 {offsets = [0, 0], sizes = [8, 2], strides = [1, 1]} : vector<8x1024xf32> to vector<8x2xf32>
    %185 = tpu.concatenate %183, %184 in 1 : vector<8x1022xf32>, vector<8x2xf32> -> vector<8x1024xf32>
    %186 = arith.maximumf %182, %185 : vector<8x1024xf32>
    %187 = vector.extract_strided_slice %182 {offsets = [0, 64], sizes = [8, 960], strides = [1, 1]} : vector<8x1024xf32> to vector<8x960xf32>
    %188 = vector.extract_strided_slice %182 {offsets = [0, 0], sizes = [8, 64], strides = [1, 1]} : vector<8x1024xf32> to vector<8x64xf32>
    %189 = tpu.concatenate %187, %188 in 1 : vector<8x960xf32>, vector<8x64xf32> -> vector<8x1024xf32>
    %190 = vector.extract_strided_slice %182 {offsets = [0, 66], sizes = [8, 958], strides = [1, 1]} : vector<8x1024xf32> to vector<8x958xf32>
    %191 = vector.extract_strided_slice %182 {offsets = [0, 0], sizes = [8, 66], strides = [1, 1]} : vector<8x1024xf32> to vector<8x66xf32>
    %192 = tpu.concatenate %190, %191 in 1 : vector<8x958xf32>, vector<8x66xf32> -> vector<8x1024xf32>
    %193 = arith.maximumf %189, %192 : vector<8x1024xf32>
    %194 = arith.maximumf %186, %193 : vector<8x1024xf32>
    %c0_16 = arith.constant 0 : index
    %c0_17 = arith.constant 0 : index
    %195 = vector.load %arg6[%c0_16, %c0_17] : memref<16x200xf32, #tpu.memory_space<vmem>>, vector<16x200xf32>
    %c0_18 = arith.constant 0 : index
    %c0_19 = arith.constant 0 : index
    %196 = vector.load %arg7[%c0_18, %c0_19] : memref<16x1xf32, #tpu.memory_space<vmem>>, vector<16x1xf32>
    %197 = vector.extract_strided_slice %194 {offsets = [0, 0], sizes = [8, 128], strides = [1, 1]} : vector<8x1024xf32> to vector<8x128xf32>
    %198 = vector.extract_strided_slice %194 {offsets = [0, 4], sizes = [8, 128], strides = [1, 1]} : vector<8x1024xf32> to vector<8x128xf32>
    %199 = vector.extract_strided_slice %194 {offsets = [0, 8], sizes = [8, 128], strides = [1, 1]} : vector<8x1024xf32> to vector<8x128xf32>
    %200 = vector.extract_strided_slice %194 {offsets = [0, 12], sizes = [8, 128], strides = [1, 1]} : vector<8x1024xf32> to vector<8x128xf32>
    %201 = vector.extract_strided_slice %194 {offsets = [0, 16], sizes = [8, 128], strides = [1, 1]} : vector<8x1024xf32> to vector<8x128xf32>
    %202 = vector.extract_strided_slice %194 {offsets = [0, 128], sizes = [8, 128], strides = [1, 1]} : vector<8x1024xf32> to vector<8x128xf32>
    %203 = vector.extract_strided_slice %194 {offsets = [0, 132], sizes = [8, 128], strides = [1, 1]} : vector<8x1024xf32> to vector<8x128xf32>
    %204 = vector.extract_strided_slice %194 {offsets = [0, 136], sizes = [8, 128], strides = [1, 1]} : vector<8x1024xf32> to vector<8x128xf32>
    %205 = vector.extract_strided_slice %194 {offsets = [0, 140], sizes = [8, 128], strides = [1, 1]} : vector<8x1024xf32> to vector<8x128xf32>
    %206 = vector.extract_strided_slice %194 {offsets = [0, 144], sizes = [8, 128], strides = [1, 1]} : vector<8x1024xf32> to vector<8x128xf32>
    %207 = vector.extract_strided_slice %194 {offsets = [0, 256], sizes = [8, 128], strides = [1, 1]} : vector<8x1024xf32> to vector<8x128xf32>
    %208 = vector.extract_strided_slice %194 {offsets = [0, 260], sizes = [8, 128], strides = [1, 1]} : vector<8x1024xf32> to vector<8x128xf32>
    %209 = vector.extract_strided_slice %194 {offsets = [0, 264], sizes = [8, 128], strides = [1, 1]} : vector<8x1024xf32> to vector<8x128xf32>
    %210 = vector.extract_strided_slice %194 {offsets = [0, 268], sizes = [8, 128], strides = [1, 1]} : vector<8x1024xf32> to vector<8x128xf32>
    %211 = vector.extract_strided_slice %194 {offsets = [0, 272], sizes = [8, 128], strides = [1, 1]} : vector<8x1024xf32> to vector<8x128xf32>
    %212 = vector.extract_strided_slice %194 {offsets = [0, 384], sizes = [8, 128], strides = [1, 1]} : vector<8x1024xf32> to vector<8x128xf32>
    %213 = vector.extract_strided_slice %194 {offsets = [0, 388], sizes = [8, 128], strides = [1, 1]} : vector<8x1024xf32> to vector<8x128xf32>
    %214 = vector.extract_strided_slice %194 {offsets = [0, 392], sizes = [8, 128], strides = [1, 1]} : vector<8x1024xf32> to vector<8x128xf32>
    %215 = vector.extract_strided_slice %194 {offsets = [0, 396], sizes = [8, 128], strides = [1, 1]} : vector<8x1024xf32> to vector<8x128xf32>
    %216 = vector.extract_strided_slice %194 {offsets = [0, 400], sizes = [8, 128], strides = [1, 1]} : vector<8x1024xf32> to vector<8x128xf32>
    %217 = vector.extract_strided_slice %194 {offsets = [0, 512], sizes = [8, 128], strides = [1, 1]} : vector<8x1024xf32> to vector<8x128xf32>
    %218 = vector.extract_strided_slice %194 {offsets = [0, 516], sizes = [8, 128], strides = [1, 1]} : vector<8x1024xf32> to vector<8x128xf32>
    %219 = vector.extract_strided_slice %194 {offsets = [0, 520], sizes = [8, 128], strides = [1, 1]} : vector<8x1024xf32> to vector<8x128xf32>
    %220 = vector.extract_strided_slice %194 {offsets = [0, 524], sizes = [8, 128], strides = [1, 1]} : vector<8x1024xf32> to vector<8x128xf32>
    %221 = vector.extract_strided_slice %194 {offsets = [0, 528], sizes = [8, 128], strides = [1, 1]} : vector<8x1024xf32> to vector<8x128xf32>
    %222 = tpu.concatenate %197, %198, %199, %200, %201, %202, %203, %204, %205, %206, %207, %208, %209, %210, %211, %212 in 0 : vector<8x128xf32>, vector<8x128xf32>, vector<8x128xf32>, vector<8x128xf32>, vector<8x128xf32>, vector<8x128xf32>, vector<8x128xf32>, vector<8x128xf32>, vector<8x128xf32>, vector<8x128xf32>, vector<8x128xf32>, vector<8x128xf32>, vector<8x128xf32>, vector<8x128xf32>, vector<8x128xf32>, vector<8x128xf32> -> vector<128x128xf32>
    %223 = tpu.concatenate %213, %214, %215, %216, %217, %218, %219, %220, %221 in 0 : vector<8x128xf32>, vector<8x128xf32>, vector<8x128xf32>, vector<8x128xf32>, vector<8x128xf32>, vector<8x128xf32>, vector<8x128xf32>, vector<8x128xf32>, vector<8x128xf32> -> vector<72x128xf32>
    %224 = tpu.concatenate %222, %223 in 0 : vector<128x128xf32>, vector<72x128xf32> -> vector<200x128xf32>
    %cst_20 = arith.constant dense<0.000000e+00> : vector<16x128xf32>
    %225 = tpu.matmul %195, %224, %cst_20 {dimension_numbers = #tpu.dot_dimension_numbers<[1], [0], [0], [1], [0, 0, 1, 1], [], []>} : vector<16x200xf32>, vector<200x128xf32>, vector<16x128xf32> -> vector<16x128xf32>
    %226 = vector.broadcast %196 : vector<16x1xf32> to vector<16x128xf32>
    %227 = arith.addf %225, %226 : vector<16x128xf32>
    %cst_21 = arith.constant 0.000000e+00 : f32
    %228 = vector.broadcast %cst_21 : f32 to vector<16x128xf32>
    %229 = arith.maximumf %227, %228 : vector<16x128xf32>
    %230 = vector.extract_strided_slice %229 {offsets = [0, 0], sizes = [16, 1], strides = [1, 1]} : vector<16x128xf32> to vector<16x1xf32>
    %c0_22 = arith.constant 0 : index
    %c0_23 = arith.constant 0 : index
    %231 = vector.load %arg8[%c0_22, %c0_23] : memref<16x1xf32, #tpu.memory_space<vmem>>, vector<16x1xf32>
    tpu.vector_store %arg8[%c0_22, %c0_23], %230 {strides = array<i32>} : memref<16x1xf32, #tpu.memory_space<vmem>>, vector<16x1xf32>,
    return
  }
  func.func @transform_0(%arg0: i32) -> (i32, i32, i32) {
    %c0_i32 = arith.constant 0 : i32
    %c0_i32_0 = arith.constant 0 : i32
    %c0_i32_1 = arith.constant 0 : i32
    return %arg0, %c0_i32, %c0_i32_0 : i32, i32, i32
  }
  func.func @transform_1(%arg0: i32) -> (i32, i32) {
    %c0_i32 = arith.constant 0 : i32
    %c0_i32_0 = arith.constant 0 : i32
    %c0_i32_1 = arith.constant 0 : i32
    return %c0_i32, %c0_i32_0 : i32, i32
  }
  func.func @transform_2(%arg0: i32) -> (i32, i32) {
    %c0_i32 = arith.constant 0 : i32
    %c0_i32_0 = arith.constant 0 : i32
    %c0_i32_1 = arith.constant 0 : i32
    return %c0_i32, %c0_i32_0 : i32, i32
  }
  func.func @transform_3(%arg0: i32) -> (i32, i32) {
    %c0_i32 = arith.constant 0 : i32
    %c0_i32_0 = arith.constant 0 : i32
    %c0_i32_1 = arith.constant 0 : i32
    return %c0_i32, %c0_i32_0 : i32, i32
  }
  func.func @transform_4(%arg0: i32) -> (i32, i32) {
    %c0_i32 = arith.constant 0 : i32
    %c0_i32_0 = arith.constant 0 : i32
    %c0_i32_1 = arith.constant 0 : i32
    return %c0_i32, %c0_i32_0 : i32, i32
  }
  func.func @transform_5(%arg0: i32) -> (i32, i32) {
    %c0_i32 = arith.constant 0 : i32
    %c0_i32_0 = arith.constant 0 : i32
    %c0_i32_1 = arith.constant 0 : i32
    return %c0_i32, %c0_i32_0 : i32, i32
  }
  func.func @transform_6(%arg0: i32) -> (i32, i32) {
    %c0_i32 = arith.constant 0 : i32
    %c0_i32_0 = arith.constant 0 : i32
    %c0_i32_1 = arith.constant 0 : i32
    return %c0_i32, %c0_i32_0 : i32, i32
  }
  func.func @transform_7(%arg0: i32) -> (i32, i32) {
    %c0_i32 = arith.constant 0 : i32
    %c0_i32_0 = arith.constant 0 : i32
    return %arg0, %c0_i32 : i32, i32
  }
}

</mosaic_0001>

<bundles_post_ra>
// kernel: netf_forward.1
= control target key start
LH: loop header
LB: loop body
LE: loop exit
PB: predicated region body
PF: predicated region fallthrough
CT: control target
= control target key end

     0   :  { %vm97_vm0 = vcmask 1042432   ;;  %vm109_vm1 = vcmask 1045504   ;;  %s2945_s17 = smov 126   ;;  %s2946_s18 = smov 125   ;;  %vm5409_vm2 = vcmask 1022976   ;;  %vm5426_vm3 = vcmask 1014784   ;;  %s5332_s0 = inlined_call_operand.vmem [shape: f32[2,3,1024], index: 0, kind: input, shape index: {}]   ;;  %s5333_s1 = inlined_call_operand.vmem [shape: f32[8,200], index: 1, kind: input, shape index: {}]   ;;  %s5334_s2 = inlined_call_operand.vmem [shape: f32[8,1], index: 2, kind: input, shape index: {}]   ;;  %s5335_s3 = inlined_call_operand.vmem [shape: f32[8,200], index: 3, kind: input, shape index: {}]   ;;  %s5336_s4 = inlined_call_operand.vmem [shape: f32[8,1], index: 4, kind: input, shape index: {}]   ;;  %s5337_s6 = inlined_call_operand.vmem [shape: f32[16,1], index: 6, kind: input, shape index: {}]   ;;  %s5338_s5 = inlined_call_operand.vmem [shape: f32[16,200], index: 5, kind: input, shape index: {}]   ;;  %s5339_s7 = inlined_call_operand.vmem [shape: f32[16,1], index: 7, kind: output, shape index: {}]  }
   0x1   :  { %v28_v0 = vld [vmem:[%s5332_s0 + $0x10] sm:$0x77]  ;;  %v26_v1 = vld [vmem:[%s5332_s0] sm:$0x77]  ;;  %v29_v2 = vld [vmem:[%s5332_s0 + $0x18] sm:$0x77] }
   0x2   :  { %43 = vst [vmem:[#allocation1 + $0x20] ss:$2 sm:$0xff] %v28_v0  ;;  %v27_v3 = vld [vmem:[%s5332_s0 + $0x8] sm:$0x77]  ;;  %v2154_v4 = vld [vmem:[%s5332_s0 + $0x30] sm:$0x77] }
   0x3   :  { %39 = vst [vmem:[#allocation1] ss:$2 sm:$0xff] %v26_v1  ;;  %v2152_v5 = vld [vmem:[%s5332_s0 + $0x20] sm:$0x77]  ;;  %v2155_v6 = vld [vmem:[%s5332_s0 + $0x38] sm:$0x77] }
   0x4   :  { %45 = vst [vmem:[#allocation1 + $0x30] ss:$2 sm:$0xff] %v29_v2  ;;  %v2153_v10 = vld [vmem:[%s5332_s0 + $0x28] sm:$0x77]  ;;  %s2944_s0 = smov 127   ;;  %s2947_s19 = smov 124  }
   0x5   :  { %41 = vst [vmem:[#allocation1 + $0x10] ss:$2 sm:$0xff] %v27_v3  ;;  %s2948_s20 = smov 96   ;;  %s2949_s21 = smov 95   ;;  %vm5383_vm4 = vcmask 261120   ;;  %vm5456_vm5 = vcmask 1031168  }
   0x6   :  { %s2950_s22 = smov 32   ;;  %s2951_s23 = smov 61   ;;  %vm5422_vm6 = vcmask 1039360   ;;  %vm278_vm7 = vcmask 785408   ;;  %vm312_vm8 = vcmask 777216   ;;  %vm5388_vm9 = vcmask 490496  }
   0x7   :  { %s2952_s24 = smov 62   ;;  %s2953_s25 = smov 60   ;;  %vm550_vm10 = vcmask 498688   ;;  %vm516_vm11 = vcmask 506880   ;;  %vm482_vm12 = vcmask 515072   ;;  %vm448_vm13 = vcmask 523264  }
   0x8   :  { %s2954_s26 = smov 64   ;;  %s2955_s27 = smov 92   ;;  %vm414_vm14 = vcmask 752640   ;;  %vm380_vm15 = vcmask 760832  }
   0x9   :  { %v50_v7 = vld.sshfl [vmem:[#allocation1 + $0x20] sm:$0xff pattern:$0x75316420]  ;;  %v51_v8 = vld.sshfl [vmem:[#allocation1 + $0x28] sm:$0xff pattern:$0x75316420] }
   0xa   :  { %70 = vst [vmem:[#allocation1 + $0x20] ss:$2 sm:$0xff] %v2154_v4  ;;  %v46_v9 = vld.sshfl [vmem:[#allocation1] sm:$0xff pattern:$0x75316420]  ;;  %s2956_s28 = smov 63  }
   0xb   :  { %v47_v11 = vld.sshfl [vmem:[#allocation1 + $0x8] sm:$0xff pattern:$0x75316420]  ;;  %v52_v12 = vld.sshfl [vmem:[#allocation1 + $0x30] sm:$0xff pattern:$0x75316420] }
   0xc   :  { %66 = vst [vmem:[#allocation1] ss:$2 sm:$0xff] %v2152_v5  ;;  %v53_v13 = vld.sshfl [vmem:[#allocation1 + $0x38] sm:$0xff pattern:$0x75316420]  ;;  %s2957_s29 = smov 94  }
   0xd   :  { %72 = vst [vmem:[#allocation1 + $0x30] ss:$2 sm:$0xff] %v2155_v6  ;;  %v48_v14 = vld.sshfl [vmem:[#allocation1 + $0x10] sm:$0xff pattern:$0x75316420]  ;;  %s2958_s30 = smov 93  }
   0xe   :  { %v49_v15 = vld.sshfl [vmem:[#allocation1 + $0x18] sm:$0xff pattern:$0x75316420]  ;;  %s2959_s8 = smov 29   ;;  %s2960_s9 = smov 28  }
   0xf   :  { %68 = vst [vmem:[#allocation1 + $0x10] ss:$2 sm:$0xff] %v2153_v10  ;;  %s2961_s10 = smov 30   ;;  %s2962_s11 = smov 31  }
  0x11   :  { %v77_v16 = vld.sshfl [vmem:[#allocation1 + $0x20] sm:$0xff pattern:$0x75316420]  ;;  %v78_v17 = vld.sshfl [vmem:[#allocation1 + $0x28] sm:$0xff pattern:$0x75316420] }
  0x12   :  { %v85_v18 = vrot.slane %v77_v16, 5  ;;  %v86_v19 = vrot.slane %v78_v17, 5 }
  0x13   :  { %v73_v20 = vld.sshfl [vmem:[#allocation1] sm:$0xff pattern:$0x75316420]  ;;  %v74_v21 = vld.sshfl [vmem:[#allocation1 + $0x8] sm:$0xff pattern:$0x75316420] }
  0x14   :  { %v3036_v22 = vsel %vm97_vm0, %v50_v7, %v85_v18  ;;  %v3039_v23 = vsel %vm97_vm0, %v51_v8, %v86_v19  ;;  %v81_v24 = vrot.slane %v73_v20, 5  ;;  %v82_v25 = vrot.slane %v74_v21, 5  ;;  %v79_v26 = vld.sshfl [vmem:[#allocation1 + $0x30] sm:$0xff pattern:$0x75316420] }
  0x15   :  { %5475 = vst [vmem:[#allocation2_spill] sm:$0xff] %v3036_v22  ;;  %v114_v27 = vsel %vm109_vm1, %v3036_v22, 0.0  ;;  %v115_v28 = vsel %vm109_vm1, %v3039_v23, 0.0  ;;  %v80_v29 = vld.sshfl [vmem:[#allocation1 + $0x38] sm:$0xff pattern:$0x75316420] }
  0x16   :  { %5476 = vst [vmem:[#allocation3_spill] sm:$0xff] %v3039_v23  ;;  %v87_v30 = vrot.slane %v79_v26, 5  ;;  %v3045_v31 = vpack.i.bf16 %v115_v28, %v114_v27  ;;  %v3048_v32 = vsel %vm97_vm0, %v46_v9, %v81_v24  ;;  %v3051_v33 = vsel %vm97_vm0, %v47_v11, %v82_v25  ;;  %v75_v35 = vld.sshfl [vmem:[#allocation1 + $0x10] sm:$0xff pattern:$0x75316420] }
  0x17   :  { %5477 = vst [vmem:[#allocation4_spill] sm:$0xff] %v3048_v32  ;;  %v88_v34 = vrot.slane %v80_v29, 5  ;;  %v110_v36 = vsel %vm109_vm1, %v3048_v32, 0.0  ;;  %v111_v37 = vsel %vm109_vm1, %v3051_v33, 0.0  ;;  %v83_v40 = vrot.slane %v75_v35, 5 }
  0x18   :  { %v3058_v38 = vsel %vm97_vm0, %v52_v12, %v87_v30  ;;  %v76_v39 = vld.sshfl [vmem:[#allocation1 + $0x18] sm:$0xff pattern:$0x75316420]  ;;  %2227 = vrot.lane.b32.xlu1 %v3045_v31, %s2944_s0  ;;  %v2236_v41 = vpack.i.bf16 %v111_v37, %v110_v36 }
  0x19   :  { %5478 = vst [vmem:[#allocation5_spill] sm:$0xff] %v3058_v38  ;;  %v3063_v42 = vsel %vm97_vm0, %v53_v13, %v88_v34  ;;  %v116_v43 = vsel %vm109_vm1, %v3058_v38, 0.0  ;;  %v84_v45 = vrot.slane %v76_v39, 5  ;;  %v3070_v46 = vsel %vm97_vm0, %v48_v14, %v83_v40 }
  0x1a   :  { %5479 = vst [vmem:[#allocation6_spill] sm:$0xff] %v3063_v42  ;;  %v117_v44 = vsel %vm109_vm1, %v3063_v42, 0.0  ;;  %2237 = vrot.lane.b32.xlu2 %v2236_v41, %s2945_s17  ;;  %2217 = vrot.lane.b32.xlu0 %v2236_v41, %s2944_s0  ;;  %v112_v48 = vsel %vm109_vm1, %v3070_v46, 0.0 }
  0x1b   :  { %5480 = vst [vmem:[#allocation7_spill] sm:$0xff] %v3070_v46  ;;  %v3075_v47 = vsel %vm97_vm0, %v49_v15, %v84_v45  ;;  %v3079_v49 = vpack.i.bf16 %v117_v44, %v116_v43  ;;  %v2331_v52 = vpack.i.bf16 %v112_v48, %v111_v37  ;;  %vm5384_vm0 = vcmask 769024  }
  0x1c   :  { %v113_v50 = vsel %vm109_vm1, %v3075_v47, 0.0 }
  0x1d   :  { %v2241_v51 = vpack.i.bf16 %v113_v50, %v112_v48  ;;  %v3116_v53 = vpack.i.bf16 %v113_v50, %v110_v36 }
  0x20   :  { %2232 = vrot.lane.b32.xlu1 %v3079_v49, %s2944_s0 }
  0x22   :  { %2242 = vrot.lane.b32.xlu2 %v2241_v51, %s2945_s17  ;;  %2222 = vrot.lane.b32.xlu0 %v2241_v51, %s2944_s0 }
  0x28   :  { %2252 = vrot.lane.b32.xlu1 %v3079_v49, %s2945_s17 }
  0x2a   :  { %2257 = vrot.lane.b32.xlu2 %v2236_v41, %s2946_s18  ;;  %2247 = vrot.lane.b32.xlu0 %v3045_v31, %s2945_s17 }
  0x30   :  { %2267 = vrot.lane.b32.xlu1 %v3045_v31, %s2946_s18 }
  0x32   :  { %2272 = vrot.lane.b32.xlu2 %v3079_v49, %s2946_s18  ;;  %2262 = vrot.lane.b32.xlu0 %v2241_v51, %s2946_s18  ;;  %s2966_s18 = smov 120  }
  0x38   :  { %2282 = vrot.lane.b32.xlu1 %v2241_v51, %s2947_s19 }
  0x3a   :  { %2287 = vrot.lane.b32.xlu2 %v3045_v31, %s2947_s19  ;;  %2277 = vrot.lane.b32.xlu0 %v2236_v41, %s2947_s19 }
  0x40   :  { %2297 = vrot.lane.b32.xlu1 %v2236_v41, %s2948_s20 }
  0x42   :  { %2302 = vrot.lane.b32.xlu2 %v2241_v51, %s2948_s20  ;;  %2292 = vrot.lane.b32.xlu0 %v3079_v49, %s2947_s19 }
  0x48   :  { %2312 = vrot.lane.b32.xlu1 %v3079_v49, %s2948_s20 }
  0x4a   :  { %2317 = vrot.lane.b32.xlu2 %v2236_v41, %s2949_s21  ;;  %2307 = vrot.lane.b32.xlu0 %v3045_v31, %s2948_s20 }
  0x50   :  { %2327 = vrot.lane.b32.xlu1 %v3045_v31, %s2949_s21 }
  0x52   :  { %2332 = vrot.lane.b32.xlu2 %v2331_v52, %s2950_s22  ;;  %2322 = vrot.lane.b32.xlu0 %v2241_v51, %s2949_s21 }
  0x58   :  { %2342 = vrot.lane.b32.xlu1 %v2331_v52, %s2951_s23 }
  0x5a   :  { %2347 = vrot.lane.b32.xlu2 %v2331_v52, %s2952_s24  ;;  %2337 = vrot.lane.b32.xlu0 %v2331_v52, %s2953_s25 }
  0x60   :  { %2357 = vrot.lane.b32.xlu1 %v2331_v52, %s2954_s26 }
  0x62   :  { %2362 = vrot.lane.b32.xlu2 %v2331_v52, %s2955_s27  ;;  %2352 = vrot.lane.b32.xlu0 %v2331_v52, %s2956_s28 }
  0x68   :  { %2372 = vrot.lane.b32.xlu1 %v2331_v52, %s2957_s29 }
  0x6a   :  { %2377 = vrot.lane.b32.xlu2 %v3116_v53, %s2950_s22  ;;  %2367 = vrot.lane.b32.xlu0 %v2331_v52, %s2958_s30 }
  0x70   :  { %2387 = vrot.lane.b32.xlu1 %v3116_v53, %s2953_s25 }
  0x72   :  { %2392 = vrot.lane.b32.xlu2 %v2331_v52, %s2959_s8  ;;  %2382 = vrot.lane.b32.xlu0 %v2331_v52, %s2960_s9 }
  0x74   :  { %v3126_v54 = vpop.permute.xlu2 %2237 }
  0x75   :  { %5481 = vst [vmem:[#allocation8_spill] sm:$0xff] %v3126_v54  ;;  %v5345_v29 = vunpack.i.h.bf16 %v3126_v54 }
  0x78   :  { %2402 = vrot.lane.b32.xlu1 %v2331_v52, %s2961_s10 }
  0x7a   :  { %2407 = vrot.lane.b32.xlu2 %v3116_v53, %s2952_s24  ;;  %2397 = vrot.lane.b32.xlu0 %v3116_v53, %s2951_s23 }
  0x7c   :  { %v3133_v55 = vpop.permute.xlu2 %2242 }
  0x7d   :  { %v5353_v27 = vunpack.i.h.bf16 %v3133_v55  ;;  %v2244_v35 = vunpack.i.l.bf16 %v3133_v55 }
  0x7f   :  { %v3275_v43 = vsel %vm5456_vm5, %v2244_v35, %v5353_v27  ;;  %v3287_v50 = vsel %vm5456_vm5, %v5345_v29, %v2244_v35 }
  0x80   :  { %2417 = vrot.lane.b32.xlu1 %v3116_v53, %s2956_s28  ;;  %5493 = vst [vmem:[#allocation20_spill] sm:$0xff] %v3275_v43 }
  0x82   :  { %2422 = vrot.lane.b32.xlu2 %v3045_v31, %s2950_s22  ;;  %2412 = vrot.lane.b32.xlu0 %v2331_v52, %s2962_s11 }
  0x84   :  { %v3140_v56 = vpop.permute.xlu2 %2257 }
  0x85   :  { %v2260_v57 = vunpack.i.h.bf16 %v3140_v56  ;;  %v2259_v58 = vunpack.i.l.bf16 %v3140_v56 }
  0x87   :  { %v3147_v59 = vsel %vm5409_vm2, %v2259_v58, %v2260_v57 }
  0x88   :  { %5482 = vst [vmem:[#allocation9_spill] sm:$0xff] %v3147_v59  ;;  %2432 = vrot.lane.b32.xlu1 %v3045_v31, %s2953_s25 }
  0x8a   :  { %2437 = vrot.lane.b32.xlu2 %v3116_v53, %s2955_s27  ;;  %2427 = vrot.lane.b32.xlu0 %v3116_v53, %s2954_s26  ;;  %v3155_v60 = vpop.permute.xlu1 %2227 }
  0x8b   :  { %5483 = vst [vmem:[#allocation10_spill] sm:$0xff] %v3155_v60 }
  0x8c   :  { %v3157_v61 = vpop.permute.xlu2 %2272  ;;  %v3159_v62 = vpop.permute.xlu0 %2217 }
  0x8d   :  { %5484 = vst [vmem:[#allocation11_spill] sm:$0xff] %v3157_v61  ;;  %v5341_v63 = vunpack.i.h.bf16 %v3157_v61  ;;  %v5340_v7 = vunpack.i.l.bf16 %v3157_v61  ;;  %v5344_v44 = vunpack.i.h.bf16 %v3159_v62 }
  0x8e   :  { %5485 = vst [vmem:[#allocation12_spill] sm:$0xff] %v3159_v62 }
  0x8f   :  { %v3165_v0 = vsel %vm5409_vm2, %v5341_v63, %v2259_v58 }
  0x90   :  { %5486 = vst [vmem:[#allocation13_spill] sm:$0xff] %v3165_v0  ;;  %2447 = vrot.lane.b32.xlu1 %v3116_v53, %s2958_s30 }
  0x92   :  { %2452 = vrot.lane.b32.xlu2 %v3045_v31, %s2952_s24  ;;  %2442 = vrot.lane.b32.xlu0 %v3045_v31, %s2951_s23  ;;  %v3173_v1 = vpop.permute.xlu1 %2232 }
  0x93   :  { %5487 = vst [vmem:[#allocation14_spill] sm:$0xff] %v3173_v1 }
  0x94   :  { %v3175_v2 = vpop.permute.xlu2 %2287  ;;  %v3177_v3 = vpop.permute.xlu0 %2222 }
  0x95   :  { %v5352_v36 = vunpack.i.h.bf16 %v3177_v3  ;;  %v2224_v37 = vunpack.i.l.bf16 %v3177_v3  ;;  %v5360_v52 = vunpack.i.h.bf16 %v3175_v2 }
  0x97   :  { %v3292_v51 = vsel %vm5422_vm6, %v2224_v37, %v5352_v36 }
  0x98   :  { %2462 = vrot.lane.b32.xlu1 %v3116_v53, %s2957_s29  ;;  %5495 = vst [vmem:[#allocation22_spill] sm:$0xff] %v3292_v51 }
  0x9a   :  { %2467 = vrot.lane.b32.xlu2 %v3045_v31, %s2956_s28  ;;  %2457 = vrot.lane.b32.xlu0 %v3079_v49, %s2950_s22  ;;  %v3185_v4 = vpop.permute.xlu1 %2252 }
  0x9b   :  { %5488 = vst [vmem:[#allocation15_spill] sm:$0xff] %v3185_v4 }
  0x9c   :  { %v3187_v5 = vpop.permute.xlu2 %2302  ;;  %v3189_v6 = vpop.permute.xlu0 %2247 }
  0x9d   :  { %5489 = vst [vmem:[#allocation16_spill] sm:$0xff] %v3189_v6 }
  0xa0   :  { %2477 = vrot.lane.b32.xlu1 %v3045_v31, %s2954_s26 }
  0xa2   :  { %2482 = vrot.lane.b32.xlu2 %v3079_v49, %s2951_s23  ;;  %2472 = vrot.lane.b32.xlu0 %v3079_v49, %s2953_s25  ;;  %v3198_v8 = vpop.permute.xlu1 %2267 }
  0xa3   :  { %v5359_v9 = vunpack.i.h.bf16 %v3198_v8  ;;  %v5358_v10 = vunpack.i.l.bf16 %v3198_v8 }
  0xa4   :  { %v3202_v11 = vpop.permute.xlu2 %2317  ;;  %v2263_v12 = vpop.permute.xlu0 %2262 }
  0xa5   :  { %v2265_v13 = vunpack.i.h.bf16 %v2263_v12  ;;  %v3209_v14 = vsel %vm5409_vm2, %v5359_v9, %v5340_v7  ;;  %v2264_v19 = vunpack.i.l.bf16 %v2263_v12  ;;  %v3303_v12 = vsel %vm5422_vm6, %v5344_v44, %v2224_v37 }
  0xa6   :  { %5490 = vst [vmem:[#allocation17_spill] sm:$0xff] %v3209_v14 }
  0xa7   :  { %v3214_v15 = vsel %vm5409_vm2, %v2265_v13, %v5358_v10  ;;  %v3258_v39 = vsel %vm5409_vm2, %v2264_v19, %v2265_v13  ;;  %v3268_v40 = vsel %vm5409_vm2, %v2260_v57, %v2264_v19 }
  0xa8   :  { %2492 = vrot.lane.b32.xlu1 %v3079_v49, %s2952_s24  ;;  %5492 = vst [vmem:[#allocation19_spill] sm:$0xff] %v3258_v39 }
  0xaa   :  { %2497 = vrot.lane.b32.xlu2 %v3045_v31, %s2958_s30  ;;  %2487 = vrot.lane.b32.xlu0 %v3045_v31, %s2955_s27  ;;  %v3222_v16 = vpop.permute.xlu1 %2282 }
  0xab   :  { %v5354_v17 = vunpack.i.h.bf16 %v3222_v16  ;;  %v2284_v18 = vunpack.i.l.bf16 %v3222_v16 }
  0xac   :  { %v3226_v20 = vpop.permute.xlu2 %2332  ;;  %v3228_v21 = vpop.permute.xlu0 %2277 }
  0xad   :  { %v2335_v24 = vunpack.i.h.bf16 %v3226_v20  ;;  %v2334_v25 = vunpack.i.l.bf16 %v3226_v20  ;;  %v5348_v26 = vunpack.i.h.bf16 %v3228_v21  ;;  %v3237_v28 = vsel %vm5426_vm3, %v2284_v18, %v5354_v17 }
  0xae   :  { %5491 = vst [vmem:[#allocation18_spill] sm:$0xff] %v3237_v28  ;;  %848 = vmatpush.msra.mxu3 %v3237_v28  ;;  %v5347_v56 = vunpack.i.l.bf16 %v3228_v21 }
  0xaf   :  { %v3243_v30 = vsel %vm5426_vm3, %v5348_v26, %v2284_v18  ;;  %v620_v34 = vsel %vm5383_vm4, %v2334_v25, %v2335_v24 }
  0xb0   :  { %808 = vmatpush.msra.mxu1 %v3243_v30  ;;  %2507 = vrot.lane.b32.xlu1 %v3116_v53, %s2960_s9 }
  0xb1   :  { %849 = vmatpush.msra.mxu3 %v3258_v39  ;;  %821 = vmatpush.msra.mxu2 %v620_v34 }
  0xb2   :  { %2512 = vrot.lane.b32.xlu2 %v3045_v31, %s2957_s29  ;;  %2502 = vrot.lane.b32.xlu0 %v3079_v49, %s2956_s28  ;;  %v3270_v41 = vpop.permute.xlu1 %2297 }
  0xb3   :  { %809 = vmatpush.msra.mxu1 %v3268_v40  ;;  %850 = vmatpush.msra.mxu3 %v3275_v43  ;;  %v5351_v37 = vunpack.i.l.bf16 %v3270_v41  ;;  %v5537_v43 = vunpack.i.l.bf16 %v3270_v41 }
  0xb4   :  { %v3280_v45 = vpop.permute.xlu2 %2347  ;;  %v3282_v48 = vpop.permute.xlu0 %2292 }
  0xb5   :  { %5494 = vst [vmem:[#allocation21_spill] sm:$0xff] %v3282_v48  ;;  %v5343_v57 = vunpack.i.h.bf16 %v3282_v48  ;;  %v5342_v58 = vunpack.i.l.bf16 %v3282_v48  ;;  %810 = vmatpush.msra.mxu1 %v3287_v50  ;;  %851 = vmatpush.msra.mxu3 %v3292_v51 }
  0xb7   :  { %811 = vmatpush.msra.mxu1 %v3303_v12  ;;  %2160 = vmatpush.msk.msra.mxu3 %vm109_vm1, %v3070_v46  ;;  %v3313_v13 = vsel %vm5426_vm3, %v5343_v57, %v5347_v56  ;;  %v3320_v18 = vsel %vm5426_vm3, %v5360_v52, %v5342_v58 }
  0xb8   :  { %5496 = vst [vmem:[#allocation23_spill] sm:$0xff] %v3313_v13  ;;  %2522 = vrot.lane.b32.xlu1 %v3116_v53, %s2959_s8 }
  0xb9   :  { %5497 = vst [vmem:[#allocation24_spill] sm:$0xff] %v3320_v18  ;;  %2157 = vmatpush.msk.msra.mxu1 %vm109_vm1, %v3051_v33 }
  0xba   :  { %2527 = vrot.lane.b32.xlu2 %v3079_v49, %s2955_s27  ;;  %2517 = vrot.lane.b32.xlu0 %v3079_v49, %s2954_s26  ;;  %v3330_v19 = vpop.permute.xlu1 %2312 }
  0xbb   :  { %5498 = vst [vmem:[#allocation25_spill] sm:$0xff] %v3330_v19  ;;  %v5346_v34 = vunpack.i.h.bf16 %v3330_v19  ;;  %v5349_v35 = vunpack.i.l.bf16 %v3330_v19 }
  0xbc   :  { %v3335_v7 = vpop.permute.xlu2 %2362  ;;  %v3337_v63 = vpop.permute.xlu0 %2307 }
  0xbd   :  { %v5350_v58 = vunpack.i.h.bf16 %v3337_v63  ;;  %v3345_v57 = vsel %vm278_vm7, %v5346_v34, %v5351_v37 }
  0xbe   :  { %5499 = vst [vmem:[#allocation26_spill] sm:$0xff] %v3345_v57 }
  0xbf   :  { %v3352_v44 = vsel %vm278_vm7, %v5350_v58, %v5349_v35 }
  0xc0   :  { %5500 = vst [vmem:[#allocation27_spill] sm:$0xff] %v3352_v44  ;;  %2537 = vrot.lane.b32.xlu1 %v3079_v49, %s2958_s30 }
  0xc2   :  { %2542 = vrot.lane.b32.xlu2 %v3116_v53, %s2962_s11  ;;  %2532 = vrot.lane.b32.xlu0 %v3116_v53, %s2961_s10  ;;  %v3360_v29 = vpop.permute.xlu1 %2327 }
  0xc3   :  { %v5355_v34 = vunpack.i.l.bf16 %v3360_v29 }
  0xc4   :  { %v3363_v56 = vpop.permute.xlu2 %2377  ;;  %v3365_v26 = vpop.permute.xlu0 %2322 }
  0xc5   :  { %v5357_v35 = vunpack.i.h.bf16 %v3363_v56  ;;  %v5356_v58 = vunpack.i.l.bf16 %v3363_v56  ;;  %v2325_v37 = vunpack.i.h.bf16 %v3365_v26  ;;  %v5361_v36 = vunpack.i.l.bf16 %v3365_v26 }
  0xc7   :  { %v619_v53 = vsel %vm5383_vm4, %v5356_v58, %v2334_v25  ;;  %v3379_v27 = vsel %vm312_vm8, %v2325_v37, %v5355_v34  ;;  %v3388_v17 = vsel %vm5383_vm4, %v2335_v24, %v5357_v35  ;;  %v3393_v25 = vsel %vm312_vm8, %v5361_v36, %v2325_v37 }
  0xc8   :  { %2552 = vrot.lane.b32.xlu1 %v3079_v49, %s2957_s29  ;;  %781 = vmatpush.msra.mxu0 %v619_v53  ;;  %vm754_vm4 = vcmask 228352  }
  0xca   :  { %2557 = vrot.lane.b32.xlu2 %v3045_v31, %s2959_s8  ;;  %2547 = vrot.lane.b32.xlu0 %v3045_v31, %s2960_s9  ;;  %v3399_v34 = vpop.permute.xlu1 %2342 }
  0xcb   :  { %v5364_v53 = vunpack.i.h.bf16 %v3399_v34  ;;  %v5365_v20 = vunpack.i.l.bf16 %v3399_v34 }
  0xcc   :  { %v3403_v58 = vpop.permute.xlu2 %2392  ;;  %v3405_v24 = vpop.permute.xlu0 %2337 }
  0xcd   :  { %v5362_v37 = vunpack.i.h.bf16 %v3405_v24  ;;  %v5363_v35 = vunpack.i.l.bf16 %v3405_v24  ;;  %v552_v36 = vsel %vm550_vm10, %v5365_v20, %v5364_v53  ;;  %v5501_v53 = vunpack.i.h.bf16 %v3280_v45 }
  0xce   :  { %v5502_v20 = vunpack.i.l.bf16 %v3280_v45  ;;  %v5511_v48 = vunpack.i.l.bf16 %v3403_v58 }
  0xcf   :  { %v586_v10 = vsel %vm5388_vm9, %v5363_v35, %v5362_v37 }
  0xd0   :  { %822 = vmatpush.msra.mxu2 %v586_v10  ;;  %2567 = vrot.lane.b32.xlu1 %v3045_v31, %s2961_s10 }
  0xd2   :  { %2572 = vrot.lane.b32.xlu2 %v3045_v31, %s2962_s11  ;;  %2562 = vrot.lane.b32.xlu0 %v3079_v49, %s2949_s21  ;;  %v3427_v37 = vpop.permute.xlu1 %2357  ;;  %v518_v31 = vsel %vm516_vm11, %v5502_v20, %v5501_v53 }
  0xd3   :  { %823 = vmatpush.msra.mxu2 %v552_v36  ;;  %v5503_v53 = vunpack.i.h.bf16 %v3427_v37  ;;  %v5504_v20 = vunpack.i.l.bf16 %v3427_v37 }
  0xd4   :  { %v3431_v52 = vpop.permute.xlu2 %2407  ;;  %v3433_v9 = vpop.permute.xlu0 %2352 }
  0xd5   :  { %v5370_v19 = vunpack.i.h.bf16 %v3433_v9  ;;  %v5371_v38 = vunpack.i.l.bf16 %v3433_v9  ;;  %824 = vmatpush.msra.mxu2 %v518_v31  ;;  %v450_v31 = vsel %vm448_vm13, %v5504_v20, %v5503_v53  ;;  %v5505_v53 = vunpack.i.h.bf16 %v3335_v7 }
  0xd6   :  { %v5506_v20 = vunpack.i.l.bf16 %v3335_v7 }
  0xd7   :  { %v484_v36 = vsel %vm482_vm12, %v5371_v38, %v5370_v19 }
  0xd8   :  { %825 = vmatpush.msra.mxu2 %v484_v36  ;;  %2582 = vrot.lane.b32.xlu1 %v3079_v49, %s2959_s8  ;;  %v416_v23 = vsel %vm414_vm14, %v5506_v20, %v5505_v53  ;;  %v5389_v53 = vunpack.i.l.bf16 %v3187_v5  ;;  %v5385_v20 = vunpack.i.h.bf16 %v3202_v11 }
  0xda   :  { %2587 = vrot.lane.b32.xlu2 %v3079_v49, %s2961_s10  ;;  %2577 = vrot.lane.b32.xlu0 %v3079_v49, %s2960_s9  ;;  %v3460_v19 = vpop.permute.xlu1 %2372 }
  0xdb   :  { %826 = vmatpush.msra.mxu2 %v450_v31  ;;  %v5382_v36 = vunpack.i.h.bf16 %v3460_v19  ;;  %v5507_v42 = vunpack.i.l.bf16 %v3460_v19 }
  0xdc   :  { %v3464_v10 = vpop.permute.xlu2 %2422  ;;  %v3466_v35 = vpop.permute.xlu0 %2367 }
  0xdd   :  { %v5379_v44 = vunpack.i.h.bf16 %v3466_v35  ;;  %v5380_v31 = vunpack.i.l.bf16 %v3466_v35  ;;  %827 = vmatpush.msra.mxu2 %v416_v23  ;;  %v348_v61 = vsel %vm5384_vm0, %v5507_v42, %v5382_v36  ;;  %vm720_vm0 = vcmask 236544  }
  0xdf   :  { %v382_v38 = vsel %vm380_vm15, %v5380_v31, %v5379_v44  ;;  %v5392_v44 = vunpack.i.h.bf16 %v3403_v58  ;;  %v5509_v31 = vunpack.i.h.bf16 %v3270_v41 }
  0xe0   :  { %828 = vmatpush.msra.mxu2 %v382_v38  ;;  %v5508_v38 = vunpack.i.l.bf16 %v3365_v26 }
  0xe1   :  { %v280_v26 = vsel %vm278_vm7, %v5509_v31, %v5389_v53  ;;  %v722_v31 = vsel %vm720_vm0, %v5511_v48, %v5392_v44  ;;  %v2289_v53 = vunpack.i.l.bf16 %v3175_v2 }
  0xe2   :  { %2592 = vrot.lane.b32.xlu0 %v3079_v49, %s2962_s11  ;;  %829 = vmatpush.msra.mxu2 %v348_v61  ;;  %v3490_v23 = vpop.permute.xlu1 %2387  ;;  %v314_v42 = vsel %vm312_vm8, %v5385_v20, %v5508_v38  ;;  %v5510_v38 = vunpack.i.l.bf16 %v3405_v24 }
  0xe3   :  { %v5390_v18 = vunpack.i.l.bf16 %v3490_v23 }
  0xe4   :  { %v3500_v36 = vpop.permute.xlu2 %2437  ;;  %v3502_v14 = vpop.permute.xlu0 %2382  ;;  %830 = vmatpush.msra.mxu2 %v314_v42 }
  0xe5   :  { %v5391_v49 = vunpack.i.h.bf16 %v3502_v14  ;;  %v5393_v61 = vunpack.i.l.bf16 %v3502_v14  ;;  %v585_v20 = vsel %vm5388_vm9, %v5390_v18, %v5510_v38  ;;  %vm5398_vm9 = vcmask 244736  }
  0xe6   :  { %831 = vmatpush.msra.mxu2 %v280_v26  ;;  %782 = vmatpush.msra.mxu0 %v585_v20 }
  0xe7   :  { %v756_v42 = vsel %vm754_vm4, %v5393_v61, %v5391_v49 }
  0xe8   :  { %832 = vmatpush.msra.mxu2 %v3243_v30  ;;  %853 = vmatpush.msra.mxu3 %v756_v42  ;;  %v2249_v30 = vunpack.i.l.bf16 %v3189_v6 }
  0xea   :  { %833 = vmatpush.msra.mxu2 %v3268_v40  ;;  %854 = vmatpush.msra.mxu3 %v722_v31  ;;  %v3528_v26 = vpop.permute.xlu1 %2402  ;;  %v5512_v31 = vunpack.i.l.bf16 %v3399_v34 }
  0xeb   :  { %v5394_v20 = vunpack.i.h.bf16 %v3528_v26  ;;  %v5395_v38 = vunpack.i.l.bf16 %v3528_v26 }
  0xec   :  { %v3533_v18 = vpop.permute.xlu2 %2452  ;;  %v3535_v49 = vpop.permute.xlu0 %2397  ;;  %834 = vmatpush.msra.mxu2 %v3287_v50  ;;  %v5513_v50 = vunpack.i.h.bf16 %v3399_v34  ;;  %v5516_v34 = vunpack.i.l.bf16 %v3280_v45 }
  0xed   :  { %v5396_v40 = vunpack.i.h.bf16 %v3535_v49  ;;  %v2399_v48 = vunpack.i.l.bf16 %v3535_v49  ;;  %v688_v42 = vsel %vm5398_vm9, %v5395_v38, %v5394_v20  ;;  %v5514_v20 = vunpack.i.h.bf16 %v3175_v2 }
  0xee   :  { %835 = vmatpush.msra.mxu2 %v3303_v12  ;;  %855 = vmatpush.msra.mxu3 %v688_v42  ;;  %v5517_v42 = vunpack.i.l.bf16 %v3431_v52  ;;  %v5402_v38 = vunpack.i.h.bf16 %v3155_v60  ;;  %v5519_v2 = vunpack.i.l.bf16 %v3198_v8  ;;  %vm5452_vm9 = vcmask 252928  }
  0xef   :  { %v551_v44 = vsel %vm550_vm10, %v2399_v48, %v5512_v31  ;;  %v3555_v61 = vsel %vm550_vm10, %v5513_v50, %v5396_v40  ;;  %v3564_v31 = vsel %vm5426_vm3, %v2289_v53, %v5514_v20  ;;  %v5524_v12 = vunpack.i.l.bf16 %v3433_v9 }
  0xf0   :  { %783 = vmatpush.msra.mxu0 %v551_v44  ;;  %2159 = vmatpush.msk.msra.mxu2 %vm109_vm1, %v3051_v33  ;;  %5515 = vst [vmem:[#allocation28_spill] sm:$0xff] %v3564_v31  ;;  %v517_v50 = vsel %vm516_vm11, %v5517_v42, %v5516_v34  ;;  %v2229_v44 = vunpack.i.l.bf16 %v3155_v60  ;;  %v5518_v33 = vunpack.i.h.bf16 %v3198_v8  ;;  %v5521_v42 = vunpack.i.h.bf16 %v3189_v6 }
  0xf1   :  { %v5526_v60 = vunpack.i.h.bf16 %v3222_v16 }
  0xf2   :  { %928 = vmatpush.msrb.mxu2 %v3564_v31  ;;  %784 = vmatpush.msra.mxu0 %v517_v50  ;;  %v3579_v20 = vsel %vm5409_vm2, %v5519_v2, %v5518_v33  ;;  %v3581_v40 = vpop.permute.xlu1 %2417  ;;  %v3592_v50 = vsel %vm5456_vm5, %v2249_v30, %v5521_v42  ;;  %v3600_v2 = vsel %vm5422_vm6, %v2229_v44, %v5402_v38  ;;  %vm5534_vm2 = vcmask 769024  }
  0xf3   :  { %5520 = vst [vmem:[#allocation29_spill] sm:$0xff] %v3579_v20  ;;  %v5525_v51 = vunpack.i.l.bf16 %v3581_v40  ;;  %v3616_v38 = vsel %vm5426_vm3, %v5526_v60, %v2289_v53  ;;  %v5530_v60 = vunpack.i.l.bf16 %v3335_v7 }
  0xf4   :  { %929 = vmatpush.msrb.mxu2 %v3579_v20  ;;  %v3585_v46 = vpop.permute.xlu2 %2467  ;;  %v3587_v34 = vpop.permute.xlu0 %2412  ;;  %5522 = vst [vmem:[#allocation30_spill] sm:$0xff] %v3592_v50  ;;  %v5539_v20 = vunpack.i.l.bf16 %v3228_v21 }
  0xf5   :  { %v5403_v8 = vunpack.i.h.bf16 %v3587_v34  ;;  %v5404_v33 = vunpack.i.l.bf16 %v3587_v34  ;;  %5523 = vst [vmem:[#allocation31_spill] sm:$0xff] %v3600_v2  ;;  %v483_v6 = vsel %vm482_vm12, %v5525_v51, %v5524_v12 }
  0xf6   :  { %930 = vmatpush.msrb.mxu2 %v3592_v50  ;;  %785 = vmatpush.msra.mxu0 %v483_v6  ;;  %v5536_v50 = vunpack.i.h.bf16 %v3270_v41  ;;  %v5541_v41 = vunpack.i.h.bf16 %v3126_v54 }
  0xf7   :  { %v654_v42 = vsel %vm5452_vm9, %v5404_v33, %v5403_v8  ;;  %v5528_v33 = vunpack.i.h.bf16 %v3177_v3  ;;  %v5531_v3 = vunpack.i.l.bf16 %v3500_v36 }
  0xf8   :  { %931 = vmatpush.msrb.mxu2 %v3600_v2  ;;  %856 = vmatpush.msra.mxu3 %v654_v42  ;;  %v5527_v42 = vunpack.i.h.bf16 %v3133_v55  ;;  %v5529_v55 = vunpack.i.l.bf16 %v3427_v37  ;;  %v5533_v2 = vunpack.i.l.bf16 %v3460_v19  ;;  %v279_v13 = vsel %vm278_vm7, %v5537_v43, %v5536_v50 }
  0xf9   :  { %v5543_v50 = vunpack.i.h.bf16 %v3159_v62 }
  0xfa   :  { %888 = vmatpush.msrb.mxu3 %v3616_v38  ;;  %2166 = vmatpush.msk.msrb.mxu2 %vm109_vm1, %v3036_v22  ;;  %v3621_v51 = vpop.permute.xlu1 %2432  ;;  %v3631_v16 = vsel %vm5456_vm5, %v5527_v42, %v2249_v30  ;;  %v3640_v22 = vsel %vm5422_vm6, %v5528_v33, %v2229_v44  ;;  %v415_v44 = vsel %vm414_vm14, %v5531_v3, %v5530_v60  ;;  %v5419_v3 = vunpack.i.l.bf16 %v3202_v11 }
  0xfc   :  { %889 = vmatpush.msrb.mxu3 %v3214_v15  ;;  %v3624_v6 = vpop.permute.xlu2 %2482  ;;  %v3626_v12 = vpop.permute.xlu0 %2427 }
  0xfd   :  { %v5407_v53 = vunpack.i.h.bf16 %v3624_v6  ;;  %v5406_v8 = vunpack.i.l.bf16 %v3626_v12 }
  0xfe   :  { %890 = vmatpush.msrb.mxu3 %v3631_v16 }
  0xff   :  { %v449_v30 = vsel %vm448_vm13, %v5406_v8, %v5529_v55  ;;  %v3651_v42 = vsel %vm550_vm10, %v5407_v53, %v2399_v48  ;;  %v5532_v48 = vunpack.i.l.bf16 %v3466_v35 }
 0x100   :  { %891 = vmatpush.msrb.mxu3 %v3640_v22  ;;  %786 = vmatpush.msra.mxu0 %v449_v30 }
 0x102   :  { %2163 = vmatpush.msk.msrb.mxu3 %vm109_vm1, %v3075_v47  ;;  %787 = vmatpush.msra.mxu0 %v415_v44  ;;  %v3660_v33 = vpop.permute.xlu1 %2447 }
 0x103   :  { %v5412_v55 = vunpack.i.l.bf16 %v3660_v33  ;;  %v5436_v57 = vunpack.i.h.bf16 %v3660_v33 }
 0x104   :  { %v3663_v8 = vpop.permute.xlu0 %2442  ;;  %v3681_v1 = vpop.permute.xlu2 %2497 }
 0x105   :  { %v381_v30 = vsel %vm380_vm15, %v5412_v55, %v5532_v48  ;;  %v5535_v48 = vunpack.i.h.bf16 %v3202_v11  ;;  %v5435_v31 = vunpack.i.l.bf16 %v3681_v1 }
 0x106   :  { %788 = vmatpush.msra.mxu0 %v381_v30 }
 0x107   :  { %v313_v30 = vsel %vm312_vm8, %v5419_v3, %v5535_v48  ;;  %v5546_v3 = vunpack.i.h.bf16 %v3363_v56 }
 0x10a   :  { %v3670_v53 = vpop.permute.xlu1 %2462 }
 0x10b   :  { %v5416_v60 = vunpack.i.l.bf16 %v3670_v53 }
 0x10c   :  { %v3674_v44 = vpop.permute.xlu0 %2457 }
 0x10d   :  { %v347_v0 = vsel %vm5534_vm2, %v5416_v60, %v5533_v2  ;;  %v5538_v60 = vunpack.i.h.bf16 %v3228_v21  ;;  %v3717_v21 = vpop.permute.xlu2 %2512  ;;  %vm777_vm2 = vcmask 588800  }
 0x10e   :  { %789 = vmatpush.msra.mxu0 %v347_v0  ;;  %v5418_v0 = vunpack.i.l.bf16 %v3126_v54 }
 0x10f   :  { %v3703_v48 = vsel %vm5426_vm3, %v5539_v20, %v5538_v60  ;;  %vm5549_vm3 = vcmask 490496  }
 0x110   :  { %790 = vmatpush.msra.mxu0 %v313_v30  ;;  %5540 = vst [vmem:[#allocation32_spill] sm:$0xff] %v3703_v48  ;;  %v5420_v30 = vunpack.i.l.bf16 %v3159_v62  ;;  %v3713_v43 = vsel %vm5456_vm5, %v5418_v0, %v5541_v41  ;;  %v3731_v41 = vld [vmem:[%s5333_s1] sm:$0xff]  ;;  %v3736_v0 = vld [vmem:[%s5333_s1 + $0x8] sm:$0xff] }
 0x111   :  { %5542 = vst [vmem:[#allocation33_spill] sm:$0xff] %v3713_v43  ;;  %837 = vmatmul.f32.vlgmr.msra.gmra.mxu2 %v3731_v41  ;;  %2161 = vmatmul.msk.f32.vlgmr.msra.gmra.mxu3 %vm777_vm2, %v3736_v0 }
 0x112   :  { %v3688_v55 = vpop.permute.xlu1 %2477  ;;  %791 = vmatpush.msra.mxu0 %v279_v13  ;;  %v3726_v60 = vsel %vm5422_vm6, %v5420_v30, %v5543_v50  ;;  %v5430_v50 = vunpack.i.h.bf16 %v3490_v23  ;;  %vm5547_vm6 = vcmask 261120   ;;  %v5552_v30 = vunpack.i.l.bf16 %v3533_v18 }
 0x113   :  { %5544 = vst [vmem:[#allocation34_spill] sm:$0xff] %v3726_v60 }
 0x114   :  { %v3696_v2 = vpop.permute.xlu0 %2472  ;;  %792 = vmatpush.msra.mxu0 %v3703_v48  ;;  %v5548_v48 = vunpack.i.l.bf16 %v3621_v51 }
 0x115   :  { %v3779_v4 = vpop.permute.xlu2 %2527 }
 0x116   :  { %793 = vmatpush.msra.mxu0 %v3147_v59  ;;  %v588_v62 = vsel %vm5549_vm3, %v5430_v50, %v5548_v48  ;;  %v5555_v48 = vunpack.i.h.bf16 %v3581_v40  ;;  %vm5563_vm3 = vcmask 769024  }
 0x118   :  { %794 = vmatpush.msra.mxu0 %v3713_v43  ;;  %v5545_v43 = vunpack.i.l.bf16 %v3464_v10 }
 0x11a   :  { %v3719_v20 = vpop.permute.xlu1 %2492  ;;  %795 = vmatpush.msra.mxu0 %v3726_v60  ;;  %v622_v60 = vsel %vm5547_vm6, %v5546_v3, %v5545_v43  ;;  %v5550_v3 = vunpack.i.l.bf16 %v3663_v8  ;;  %v5551_v43 = vunpack.i.h.bf16 %v3535_v49  ;;  %vm5568_vm6 = vcmask 244736  }
 0x11c   :  { %v3741_v13 = vpop.permute.xlu0 %2487  ;;  %2156 = vmatpush.msk.msra.mxu0 %vm109_vm1, %v3048_v32  ;;  %v5553_v32 = vunpack.i.h.bf16 %v3431_v52 }
 0x11d   :  { %797 = vmatmul.f32.vlgmr.msra.gmra.mxu0 %v3731_v41 }
 0x11e   :  { %901 = vmatpush.msrb.mxu0 %v622_v60  ;;  %v554_v60 = vsel %vm550_vm10, %v5551_v43, %v5550_v3  ;;  %v520_v54 = vsel %vm516_vm11, %v5553_v32, %v5552_v30  ;;  %v5434_v43 = vunpack.i.h.bf16 %v3500_v36 }
 0x120   :  { %902 = vmatpush.msrb.mxu0 %v588_v62  ;;  %v5556_v62 = vunpack.i.l.bf16 %v3502_v14 }
 0x122   :  { %903 = vmatpush.msrb.mxu0 %v554_v60  ;;  %v3769_v59 = vpop.permute.xlu1 %2507  ;;  %v5554_v60 = vunpack.i.l.bf16 %v3585_v46 }
 0x123   :  { %v5557_v32 = vunpack.i.l.bf16 %v3769_v59  ;;  %v5558_v39 = vunpack.i.h.bf16 %v3769_v59 }
 0x124   :  { %v3781_v49 = vpop.permute.xlu0 %2502  ;;  %904 = vmatpush.msrb.mxu0 %v520_v54  ;;  %v486_v50 = vsel %vm482_vm12, %v5555_v48, %v5554_v60  ;;  %v5559_v54 = vunpack.i.h.bf16 %v3502_v14  ;;  %v5561_v48 = vunpack.i.h.bf16 %v3626_v12  ;;  %v5441_v60 = vunpack.i.h.bf16 %v3670_v53 }
 0x125   :  { %v755_v30 = vsel %vm754_vm4, %v5557_v32, %v5556_v62  ;;  %v5438_v14 = vunpack.i.l.bf16 %v3717_v21 }
 0x126   :  { %905 = vmatpush.msrb.mxu0 %v486_v50  ;;  %v757_v3 = vsel %vm754_vm4, %v5559_v54, %v5558_v39  ;;  %813 = vmatpush.msra.mxu1 %v755_v30  ;;  %v5560_v50 = vunpack.i.l.bf16 %v3688_v55  ;;  %v5562_v39 = vunpack.i.l.bf16 %v3741_v13 }
 0x127   :  { %893 = vmatpush.msrb.mxu3 %v757_v3 }
 0x128   :  { %v452_v62 = vsel %vm448_vm13, %v5561_v48, %v5560_v50  ;;  %v418_v32 = vsel %vm414_vm14, %v5434_v43, %v5562_v39  ;;  %v384_v50 = vsel %vm380_vm15, %v5436_v57, %v5435_v31  ;;  %v108_v39 = vld [vmem:[%s5334_s2] sm:$0xff]  ;;  %v350_v43 = vsel %vm5563_vm3, %v5441_v60, %v5438_v14  ;;  %v3835_v31 = vpop.permute.xlu2 %2542  ;;  %vm5570_vm3 = vmmov %vm5568_vm6  ;;  %s2964_s2 = smov 58  }
 0x129   :  { %906 = vmatpush.msrb.mxu0 %v452_v62  ;;  %v2963_v62 = vmov 0   ;;  %v5440_v14 = vunpack.i.h.bf16 %v3187_v5  ;;  %v5445_v60 = vunpack.i.h.bf16 %v3674_v44 }
 0x12a   :  { %v3815_v30 = vpop.permute.xlu1 %2522  ;;  %2596 = vset.pattern.permute.xlu1 %v2963_v62  ;;  %2817 = vset.pattern.permute.xlu0 %v2963_v62 }
 0x12b   :  { %907 = vmatpush.msrb.mxu0 %v418_v32  ;;  %v5442_v3 = vunpack.i.h.bf16 %v3815_v30  ;;  %v5439_v54 = vunpack.i.l.bf16 %v3815_v30  ;;  %774 = vperm.xlu1 %2596, %v108_v39   ;;  %v5565_v32 = vunpack.i.h.bf16 %v3403_v58 }
 0x12c   :  { %v3824_v48 = vpop.permute.xlu0 %2517  ;;  %2943 = vset.pattern.permute.xlu2 %v2963_v62  ;;  %v2425_v62 = vunpack.i.h.bf16 %v3464_v10 }
 0x12d   :  { %908 = vmatpush.msrb.mxu0 %v384_v50  ;;  %v5564_v50 = vunpack.i.l.bf16 %v3403_v58  ;;  %v723_v28 = vsel %vm720_vm0, %v5565_v32, %v5442_v3  ;;  %v2545_v58 = vunpack.i.h.bf16 %v3835_v31  ;;  %v5567_v32 = vunpack.i.l.bf16 %v3528_v26 }
 0x12e   :  { %894 = vmatpush.msrb.mxu3 %v723_v28  ;;  %v5571_v3 = vunpack.i.l.bf16 %v3587_v34 }
 0x12f   :  { %909 = vmatpush.msrb.mxu0 %v350_v43  ;;  %v721_v57 = vsel %vm720_vm0, %v5439_v54, %v5564_v50  ;;  %v5566_v43 = vunpack.i.l.bf16 %v3337_v63 }
 0x130   :  { %814 = vmatpush.msra.mxu1 %v721_v57  ;;  %v5443_v57 = vunpack.i.l.bf16 %v3835_v31 }
 0x131   :  { %910 = vmatpush.msrb.mxu0 %v3379_v27  ;;  %v282_v39 = vsel %vm278_vm7, %v5440_v14, %v5566_v43  ;;  %v3875_v14 = vpop.permute.xlu2 %2557 }
 0x132   :  { %v3854_v50 = vpop.permute.xlu1 %2537 }
 0x133   :  { %911 = vmatpush.msrb.mxu0 %v282_v39 }
 0x134   :  { %v3856_v54 = vpop.permute.xlu0 %2532 }
 0x135   :  { %912 = vmatpush.msrb.mxu0 %v3616_v38  ;;  %v2535_v28 = vunpack.i.h.bf16 %v3856_v54  ;;  %v5444_v27 = vunpack.i.l.bf16 %v3856_v54  ;;  %v5569_v38 = vunpack.i.h.bf16 %v3528_v26  ;;  %v5572_v26 = vunpack.i.h.bf16 %v3587_v34 }
 0x136   :  { %v2455_v34 = vunpack.i.h.bf16 %v3533_v18 }
 0x137   :  { %913 = vmatpush.msrb.mxu0 %v3214_v15  ;;  %v687_v43 = vsel %vm5568_vm6, %v5444_v27, %v5567_v32  ;;  %v689_v39 = vsel %vm5570_vm3, %v5569_v38, %v2535_v28  ;;  %v2435_v15 = vunpack.i.h.bf16 %v3621_v51  ;;  %v653_v32 = vsel %vm5452_vm9, %v5443_v57, %v5571_v3 }
 0x138   :  { %815 = vmatpush.msra.mxu1 %v687_v43  ;;  %895 = vmatpush.msrb.mxu3 %v689_v39  ;;  %v655_v38 = vsel %vm5452_vm9, %v5572_v26, %v2545_v58  ;;  %v2445_v39 = vunpack.i.h.bf16 %v3663_v8  ;;  %vm5574_vm6 = vcmask 261120   ;;  %v5446_v26 = vunpack.i.h.bf16 %v3696_v2 }
 0x139   :  { %914 = vmatpush.msrb.mxu0 %v3631_v16  ;;  %v5573_v16 = vunpack.i.l.bf16 %v3464_v10  ;;  %v5576_v57 = vunpack.i.h.bf16 %v3405_v24  ;;  %vm5577_vm3 = vcmask 490496   ;;  %v5580_v24 = vunpack.i.l.bf16 %v3363_v56 }
 0x13a   :  { %816 = vmatpush.msra.mxu1 %v653_v32  ;;  %896 = vmatpush.msrb.mxu3 %v655_v38  ;;  %v3890_v43 = vpop.permute.xlu1 %2552  ;;  %v5575_v38 = vunpack.i.h.bf16 %v3490_v23  ;;  %v5583_v56 = vunpack.i.h.bf16 %v3769_v59  ;;  %v2494_v10 = vunpack.i.l.bf16 %v3719_v20 }
 0x13b   :  { %915 = vmatpush.msrb.mxu0 %v3640_v22  ;;  %v623_v3 = vsel %vm5574_vm6, %v5573_v16, %v2425_v62  ;;  %2158 = vmatmul.msk.f32.vlgmr.msra.gmra.mxu1 %vm777_vm2, %v3736_v0  ;;  %v5448_v22 = vunpack.i.l.bf16 %v3875_v14  ;;  %vm5579_vm6 = vmmov %vm5577_vm3 }
 0x13c   :  { %861 = vmatpush.msrb.mxu1 %v3388_v17  ;;  %941 = vmatpush.msra.mxu3 %v623_v3  ;;  %v3902_v32 = vpop.permute.xlu0 %2547  ;;  %v587_v17 = vsel %vm5577_vm3, %v5576_v57, %v5575_v38  ;;  %v5578_v3 = vunpack.i.l.bf16 %v3621_v51  ;;  %vm5581_vm3 = vcmask 261120   ;;  %v5449_v38 = vunpack.i.h.bf16 %v3585_v46 }
 0x13d   :  { %v5447_v16 = vunpack.i.l.bf16 %v3902_v32  ;;  %2165 = vmatpush.msk.msrb.mxu0 %vm109_vm1, %v3075_v47  ;;  %v635_v57 = vsel %vm5581_vm3, %v5445_v60, %v5580_v24  ;;  %v5582_v47 = vunpack.i.l.bf16 %v3663_v8  ;;  %2164 = vmatmul.msk.f32.vlgmr.msrb.gmra.mxu3 %vm777_vm2, %v3736_v0  ;;  %vm5596_vm3 = vcmask 244736  }
 0x13e   :  { %862 = vmatpush.msrb.mxu1 %v587_v17  ;;  %v589_v27 = vsel %vm5579_vm6, %v5578_v3, %v2435_v15  ;;  %917 = vmatmul.f32.vlgmr.msrb.gmra.mxu0 %v3731_v41  ;;  %v5614_v51 = vunpack.i.l.bf16 %v3360_v29  ;;  %v5619_v8 = vunpack.i.h.bf16 %v3337_v63 }
 0x13f   :  { %942 = vmatpush.msra.mxu3 %v589_v27  ;;  %1061 = vmatpush.msra.mxu0 %v635_v57  ;;  %v555_v17 = vsel %vm550_vm10, %v5582_v47, %v2445_v39  ;;  %v758_v3 = vsel %vm754_vm4, %v5583_v56, %v5447_v16  ;;  %v5450_v27 = vunpack.i.h.bf16 %v3719_v20  ;;  %v5585_v57 = vunpack.i.h.bf16 %v3431_v52 }
 0x140   :  { %863 = vmatpush.msrb.mxu1 %v3555_v61  ;;  %933 = vmatpush.msrb.mxu2 %v758_v3  ;;  %v5584_v61 = vunpack.i.l.bf16 %v3490_v23  ;;  %v5586_v47 = vunpack.i.h.bf16 %v3280_v45  ;;  %v2480_v56 = vunpack.i.h.bf16 %v3688_v55  ;;  %v5588_v3 = vunpack.i.h.bf16 %v3815_v30 }
 0x141   :  { %943 = vmatpush.msra.mxu3 %v555_v17  ;;  %v5587_v17 = vunpack.i.l.bf16 %v3533_v18  ;;  %v5451_v45 = vunpack.i.h.bf16 %v3781_v49 }
 0x142   :  { %v601_v24 = vsel %vm5579_vm6, %v5446_v26, %v5584_v61  ;;  %v519_v60 = vsel %vm516_vm11, %v5586_v47, %v5585_v57  ;;  %v724_v61 = vsel %vm720_vm0, %v5588_v3, %v5448_v22  ;;  %v3962_v26 = vpop.permute.xlu2 %2572  ;;  %v3969_v47 = vpop.permute.xlu1 %2567  ;;  %vm5605_vm6 = vcmask 261120  }
 0x143   :  { %1062 = vmatpush.msra.mxu0 %v601_v24  ;;  %864 = vmatpush.msrb.mxu1 %v519_v60  ;;  %v521_v23 = vsel %vm516_vm11, %v5587_v17, %v2455_v34  ;;  %v5589_v60 = vunpack.i.h.bf16 %v3581_v40  ;;  %v5590_v24 = vunpack.i.h.bf16 %v3433_v9  ;;  %v2490_v17 = vunpack.i.h.bf16 %v3741_v13 }
 0x144   :  { %944 = vmatpush.msra.mxu3 %v521_v23  ;;  %934 = vmatpush.msrb.mxu2 %v724_v61  ;;  %v2574_v16 = vunpack.i.l.bf16 %v3962_v26  ;;  %v5591_v23 = vunpack.i.l.bf16 %v3585_v46  ;;  %v2569_v61 = vunpack.i.l.bf16 %v3969_v47  ;;  %v2520_v9 = vunpack.i.h.bf16 %v3824_v48 }
 0x145   :  { %v485_v57 = vsel %vm482_vm12, %v5590_v24, %v5589_v60  ;;  %1063 = vmatpush.msra.mxu0 %v3651_v42  ;;  %v5592_v60 = vunpack.i.l.bf16 %v3431_v52  ;;  %v5593_v42 = vunpack.i.h.bf16 %v3626_v12  ;;  %v5595_v52 = vunpack.i.l.bf16 %v3688_v55  ;;  %v5632_v55 = vld [vmem:[#allocation14_spill] sm:$0xff] }
 0x146   :  { %865 = vmatpush.msrb.mxu1 %v485_v57  ;;  %v487_v3 = vsel %vm482_vm12, %v5591_v23, %v5449_v38  ;;  %v5594_v57 = vunpack.i.h.bf16 %v3427_v37  ;;  %v2500_v23 = vunpack.i.h.bf16 %v3681_v1  ;;  %v2459_v38 = vunpack.i.l.bf16 %v3674_v44 }
 0x147   :  { %945 = vmatpush.msra.mxu3 %v487_v3  ;;  %v533_v24 = vsel %vm516_vm11, %v5450_v27, %v5592_v60  ;;  %v453_v3 = vsel %vm448_vm13, %v5595_v52, %v2480_v56  ;;  %v690_v37 = vsel %vm5596_vm3, %v2535_v28, %v2569_v61  ;;  %v2530_v60 = vunpack.i.h.bf16 %v3779_v4 }
 0x148   :  { %v451_v22 = vsel %vm448_vm13, %v5594_v57, %v5593_v42  ;;  %1064 = vmatpush.msra.mxu0 %v533_v24  ;;  %v5597_v42 = vunpack.i.l.bf16 %v3581_v40  ;;  %v5598_v24 = vunpack.i.h.bf16 %v3500_v36  ;;  %v5599_v57 = vunpack.i.h.bf16 %v3335_v7  ;;  %935 = vmatpush.msrb.mxu2 %v690_v37 }
 0x149   :  { %866 = vmatpush.msrb.mxu1 %v451_v22  ;;  %946 = vmatpush.msra.mxu3 %v453_v3  ;;  %v2515_v27 = vunpack.i.h.bf16 %v3717_v21  ;;  %v2474_v28 = vunpack.i.l.bf16 %v3696_v2  ;;  %v5600_v40 = vunpack.i.l.bf16 %v3741_v13  ;;  %v656_v7 = vsel %vm5452_vm9, %v2545_v58, %v2574_v16  ;;  %v5635_v13 = vld [vmem:[#allocation31_spill] sm:$0xff] }
 0x14a   :  { %v499_v22 = vsel %vm482_vm12, %v5451_v45, %v5597_v42  ;;  %v417_v52 = vsel %vm414_vm14, %v5599_v57, %v5598_v24  ;;  %v2540_v37 = vunpack.i.h.bf16 %v3854_v50  ;;  %v5601_v42 = vunpack.i.l.bf16 %v3626_v12  ;;  %936 = vmatpush.msrb.mxu2 %v656_v7  ;;  %v4040_v45 = vpop.permute.xlu0 %2562 }
 0x14b   :  { %1065 = vmatpush.msra.mxu0 %v499_v22  ;;  %867 = vmatpush.msrb.mxu1 %v417_v52  ;;  %v419_v3 = vsel %vm414_vm14, %v5600_v40, %v2490_v17  ;;  %v5602_v24 = vunpack.i.h.bf16 %v3660_v33  ;;  %v5603_v57 = vunpack.i.h.bf16 %v3466_v35  ;;  %v2330_v40 = vunpack.i.h.bf16 %v3360_v29 }
 0x14c   :  { %947 = vmatpush.msra.mxu3 %v419_v3  ;;  %v465_v22 = vsel %vm448_vm13, %v2520_v9, %v5601_v42  ;;  %v2484_v58 = vunpack.i.l.bf16 %v3624_v6  ;;  %v5604_v12 = vunpack.i.l.bf16 %v3681_v1  ;;  %v624_v35 = vsel %vm5605_vm6, %v2425_v62, %v2459_v38  ;;  %2167 = vmatmul.msk.f32.vlgmr.msrb.gmra.mxu2 %vm777_vm2, %v3736_v0 }
 0x14d   :  { %v383_v52 = vsel %vm380_vm15, %v5603_v57, %v5602_v24  ;;  %1066 = vmatpush.msra.mxu0 %v465_v22  ;;  %v2555_v7 = vunpack.i.h.bf16 %v3890_v43  ;;  %v5606_v42 = vunpack.i.l.bf16 %v3500_v36  ;;  %v5607_v24 = vunpack.i.h.bf16 %v3670_v53  ;;  %981 = vmatpush.msra.mxu2 %v624_v35 }
 0x14e   :  { %868 = vmatpush.msrb.mxu1 %v383_v52  ;;  %v385_v3 = vsel %vm380_vm15, %v5604_v12, %v2500_v23  ;;  %v5608_v57 = vunpack.i.h.bf16 %v3460_v19  ;;  %vm5609_vm3 = vcmask 769024   ;;  %v5610_v62 = vunpack.i.l.bf16 %v3717_v21 }
 0x14f   :  { %948 = vmatpush.msra.mxu3 %v385_v3  ;;  %v431_v22 = vsel %vm414_vm14, %v2530_v60, %v5606_v42  ;;  %vm5611_vm6 = vmmov %vm5609_vm3  ;;  %vm5612_vm9 = vcmask 490496   ;;  %v5454_v19 = vunpack.i.h.bf16 %v4040_v45  ;;  %v5613_v3 = vunpack.i.l.bf16 %v3660_v33 }
 0x150   :  { %v349_v52 = vsel %vm5609_vm3, %v5608_v57, %v5607_v24  ;;  %1067 = vmatpush.msra.mxu0 %v431_v22  ;;  %v351_v36 = vsel %vm5611_vm6, %v5610_v62, %v2515_v27  ;;  %v590_v12 = vsel %vm5612_vm9, %v2435_v15, %v2474_v28  ;;  %v2504_v42 = vunpack.i.l.bf16 %v3781_v49  ;;  %vm5616_vm9 = vmmov %vm5609_vm3 }
 0x151   :  { %869 = vmatpush.msrb.mxu1 %v349_v52  ;;  %949 = vmatpush.msra.mxu3 %v351_v36  ;;  %v397_v35 = vsel %vm380_vm15, %v2540_v37, %v5613_v3  ;;  %v317_v15 = vsel %vm312_vm8, %v5614_v51, %v2330_v40  ;;  %v556_v33 = vsel %vm550_vm10, %v2445_v39, %v2484_v58  ;;  %v5615_v22 = vunpack.i.l.bf16 %v3670_v53  ;;  %v5625_v51 = vld [vmem:[#allocation26_spill] sm:$0xff] }
 0x152   :  { %982 = vmatpush.msra.mxu2 %v590_v12  ;;  %1068 = vmatpush.msra.mxu0 %v397_v35  ;;  %v5618_v57 = vunpack.i.l.bf16 %v3187_v5  ;;  %v2519_v62 = vunpack.i.l.bf16 %v3824_v48  ;;  %v5620_v39 = vunpack.i.l.bf16 %v3337_v63  ;;  %v522_v36 = vsel %vm516_vm11, %v2455_v34, %v2494_v10  ;;  %v5622_v63 = vld [vmem:[#allocation18_spill] sm:$0xff]  ;;  %v5624_v34 = vld [vmem:[#allocation28_spill] sm:$0xff] }
 0x153   :  { %870 = vmatpush.msrb.mxu1 %v3393_v25  ;;  %950 = vmatpush.msra.mxu3 %v317_v15  ;;  %v363_v24 = vsel %vm5616_vm9, %v2555_v7, %v5615_v22  ;;  %v5617_v25 = vunpack.i.h.bf16 %v3187_v5  ;;  %v5621_v5 = vunpack.i.l.bf16 %v3202_v11  ;;  %v2529_v3 = vunpack.i.l.bf16 %v3779_v4  ;;  %v5626_v15 = vld [vmem:[#allocation19_spill] sm:$0xff] }
 0x154   :  { %983 = vmatpush.msra.mxu2 %v556_v33  ;;  %1069 = vmatpush.msra.mxu0 %v363_v24  ;;  %v283_v53 = vsel %vm278_vm7, %v5620_v39, %v5619_v8  ;;  %v5623_v35 = vunpack.i.h.bf16 %v3585_v46  ;;  %v2539_v11 = vunpack.i.l.bf16 %v3854_v50  ;;  %v454_v33 = vsel %vm448_vm13, %v2480_v56, %v2519_v62  ;;  %v5627_v22 = vld [vmem:[#allocation15_spill] sm:$0xff]  ;;  %v5628_v46 = vld [vmem:[#allocation29_spill] sm:$0xff]  ;;  %v5631_v8 = vld [vmem:[#allocation30_spill] sm:$0xff] }
 0x155   :  { %v281_v52 = vsel %vm278_vm7, %v5618_v57, %v5617_v25  ;;  %951 = vmatpush.msra.mxu3 %v283_v53  ;;  %v329_v12 = vsel %vm312_vm8, %v5454_v19, %v5621_v5  ;;  %v2255_v24 = vunpack.i.h.bf16 %v5627_v22  ;;  %v5629_v25 = vld [vmem:[#allocation23_spill] sm:$0xff]  ;;  %v5630_v57 = vld [vmem:[#allocation20_spill] sm:$0xff]  ;;  %v2235_v56 = vunpack.i.h.bf16 %v5632_v55  ;;  %v5633_v39 = vld [vmem:[#allocation13_spill] sm:$0xff] }
 0x156   :  { %871 = vmatpush.msrb.mxu1 %v281_v52  ;;  %984 = vmatpush.msra.mxu2 %v522_v36  ;;  %v488_v18 = vsel %vm482_vm12, %v5623_v35, %v2504_v42  ;;  %v420_v52 = vsel %vm414_vm14, %v2490_v17, %v2529_v3  ;;  %v5634_v53 = vld [vmem:[#allocation22_spill] sm:$0xff]  ;;  %v386_v36 = vsel %vm380_vm15, %v2500_v23, %v2539_v11  ;;  %v5455_v5 = vunpack.i.l.bf16 %v3890_v43  ;;  %v5636_v17 = vld [vmem:[#allocation8_spill] sm:$0xff]  ;;  %v5638_v35 = vld [vmem:[#allocation7_spill] sm:$0xff]  ;;  %v4164_v23 = vpop.permute.xlu0 %2577 }
 0x157   :  { %1070 = vmatpush.msra.mxu0 %v329_v12  ;;  %952 = vmatpush.msra.mxu3 %v5624_v34  ;;  %v5637_v12 = vunpack.i.l.bf16 %v5636_v17  ;;  %v5453_v1 = vunpack.i.l.bf16 %v4040_v45  ;;  %v5639_v34 = vld [vmem:[#allocation2_spill] sm:$0xff]  ;;  %vm5643_vm3 = vcmask 1014784   ;;  %vm5647_vm6 = vcmask 1039360   ;;  %v5649_v17 = vld [vmem:[#allocation11_spill] sm:$0xff] }
 0x158   :  { %872 = vmatpush.msrb.mxu1 %v5622_v63  ;;  %985 = vmatpush.msra.mxu2 %v488_v18  ;;  %v2254_v18 = vunpack.i.l.bf16 %v5627_v22  ;;  %v5645_v22 = vld [vmem:[#allocation12_spill] sm:$0xff]  ;;  %v5663_v19 = vunpack.i.l.bf16 %v3875_v14  ;;  %v421_v48 = vsel %vm414_vm14, %v2529_v3, %v2530_v60  ;;  %v5685_v60 = vunpack.i.l.bf16 %v3835_v31 }
 0x159   :  { %1071 = vmatpush.msra.mxu0 %v5625_v51  ;;  %953 = vmatpush.msra.mxu3 %v5628_v46  ;;  %v4157_v63 = vsel %vm5456_vm5, %v2255_v24, %v5637_v12  ;;  %v5640_v51 = vld [vmem:[#allocation21_spill] sm:$0xff]  ;;  %v5650_v12 = vunpack.i.h.bf16 %v5649_v17  ;;  %v318_v21 = vsel %vm312_vm8, %v2330_v40, %v5453_v1  ;;  %v5657_v40 = vld [vmem:[#allocation6_spill] sm:$0xff]  ;;  %v2575_v1 = vunpack.i.h.bf16 %v3962_v26 }
 0x15a   :  { %873 = vmatpush.msrb.mxu1 %v5626_v15  ;;  %986 = vmatpush.msra.mxu2 %v454_v33  ;;  %v5641_v15 = vunpack.i.h.bf16 %v5640_v51  ;;  %v5642_v33 = vunpack.i.l.bf16 %v5640_v51  ;;  %v5669_v26 = vunpack.i.h.bf16 %v3674_v44  ;;  %v5674_v44 = vld [vmem:[#allocation33_spill] sm:$0xff]  ;;  %vm5688_vm14 = vcmask 769024  }
 0x15b   :  { %1072 = vmatpush.msra.mxu0 %v5629_v25  ;;  %954 = vmatpush.msra.mxu3 %v5631_v8  ;;  %v5690_v31 = vunpack.i.h.bf16 %v4040_v45 }
 0x15c   :  { %874 = vmatpush.msrb.mxu1 %v5630_v57  ;;  %987 = vmatpush.msra.mxu2 %v420_v52  ;;  %v4174_v46 = vsel %vm5643_vm3, %v5642_v33, %v5641_v15  ;;  %v5644_v57 = vld [vmem:[#allocation24_spill] sm:$0xff]  ;;  %v5646_v52 = vunpack.i.l.bf16 %v5645_v22  ;;  %vm5652_vm3 = vcmask 1022976   ;;  %v4211_v15 = vsel %vm5456_vm5, %v2254_v18, %v2255_v24  ;;  %v4214_v22 = vpop.permute.xlu1 %2582 }
 0x15d   :  { %1073 = vmatpush.msra.mxu0 %v5633_v39  ;;  %955 = vmatpush.msra.mxu3 %v5635_v13  ;;  %v5648_v13 = vld [vmem:[#allocation17_spill] sm:$0xff]  ;;  %v2550_v33 = vunpack.i.h.bf16 %v3902_v32 }
 0x15e   :  { %875 = vmatpush.msrb.mxu1 %v5634_v53  ;;  %988 = vmatpush.msra.mxu2 %v386_v36  ;;  %v4181_v8 = vsel %vm5647_vm6, %v2235_v56, %v5646_v52  ;;  %v2234_v53 = vunpack.i.l.bf16 %v5632_v55  ;;  %v352_v36 = vsel %vm5616_vm9, %v2515_v27, %v5455_v5  ;;  %v5653_v27 = vld [vmem:[#allocation16_spill] sm:$0xff]  ;;  %v5655_v52 = vld [vmem:[#allocation10_spill] sm:$0xff]  ;;  %vm5659_vm9 = vmmov %vm5647_vm6 }
 0x15f   :  { %1074 = vmatpush.msra.mxu0 %v4157_v63  ;;  %2168 = vmatpush.msk.msra.mxu3 %vm109_vm1, %v5639_v34  ;;  %v5654_v55 = vunpack.i.h.bf16 %v5653_v27  ;;  %v4234_v27 = vpop.permute.xlu2 %2587 }
 0x160   :  { %2162 = vmatpush.msk.msrb.mxu1 %vm109_vm1, %v5638_v35  ;;  %957 = vmatmul.f32.vlgmr.msra.gmra.mxu3 %v3731_v41  ;;  %v5651_v35 = vunpack.i.l.bf16 %v5649_v17  ;;  %v2579_v17 = vunpack.i.l.bf16 %v4164_v23  ;;  %v4225_v24 = vsel %vm5659_vm9, %v2234_v53, %v2235_v56  ;;  %v5661_v56 = vld [vmem:[#allocation5_spill] sm:$0xff]  ;;  %vm5666_vm9 = vcmask 252928  }
 0x161   :  { %877 = vmatmul.f32.vlgmr.msrb.gmra.mxu1 %v3731_v41  ;;  %1008 = vmatpush.msrb.mxu3 %v4174_v46  ;;  %v182_v51 = vsel %vm5456_vm5, %v5654_v55, %v2254_v18  ;;  %v2560_v18 = vunpack.i.h.bf16 %v3875_v14  ;;  %v2570_v55 = vunpack.i.h.bf16 %v3969_v47  ;;  %vm5667_vm5 = vmmov %vm5666_vm9 }
 0x162   :  { %968 = vmatpush.msra.mxu1 %v5644_v57  ;;  %1075 = vmatpush.msra.mxu0 %v4181_v8  ;;  %v4197_v34 = vsel %vm5652_vm3, %v5651_v35, %v5650_v12  ;;  %v5658_v12 = vld [vmem:[#allocation27_spill] sm:$0xff]  ;;  %v2584_v35 = vunpack.i.l.bf16 %v4214_v22  ;;  %vm5664_vm3 = vcmask 244736  }
 0x163   :  { %989 = vmatpush.msra.mxu2 %v352_v36  ;;  %1009 = vmatpush.msrb.mxu3 %v4197_v34  ;;  %v5656_v36 = vunpack.i.h.bf16 %v5655_v52  ;;  %v4237_v52 = vpop.permute.xlu0 %2592  ;;  %v725_v5 = vsel %vm720_vm0, %v5663_v19, %v2560_v18  ;;  %v657_v19 = vsel %vm5666_vm9, %v2574_v16, %v2575_v1 }
 0x164   :  { %969 = vmatpush.msra.mxu1 %v5648_v13  ;;  %2177 = vmatpush.msk.msra.mxu0 %vm109_vm1, %v5657_v40 }
 0x165   :  { %990 = vmatpush.msra.mxu2 %v318_v21  ;;  %1010 = vmatpush.msrb.mxu3 %v4211_v15  ;;  %v148_v29 = vsel %vm5647_vm6, %v5656_v36, %v2234_v53  ;;  %v5660_v21 = vld [vmem:[#allocation3_spill] sm:$0xff]  ;;  %v5662_v53 = vunpack.i.l.bf16 %v3902_v32  ;;  %v2594_v32 = vunpack.i.l.bf16 %v4237_v52  ;;  %vm5665_vm6 = vmmov %vm5664_vm3 }
 0x166   :  { %970 = vmatpush.msra.mxu1 %v182_v51  ;;  %1077 = vmatmul.f32.vlgmr.msra.gmra.mxu0 %v3731_v41 }
 0x167   :  { %991 = vmatpush.msra.mxu2 %v5658_v12  ;;  %1011 = vmatpush.msrb.mxu3 %v4225_v24  ;;  %v759_v36 = vsel %vm754_vm4, %v5662_v53, %v2550_v33  ;;  %v2589_v12 = vunpack.i.l.bf16 %v4234_v27  ;;  %v658_v47 = vsel %vm5667_vm5, %v2575_v1, %v2594_v32  ;;  %v5672_v1 = vunpack.i.h.bf16 %v3696_v2 }
 0x168   :  { %971 = vmatpush.msra.mxu1 %v148_v29  ;;  %vm5673_vm5 = vcmask 490496   ;;  %v5677_v2 = vunpack.i.h.bf16 %v3719_v20  ;;  %v5680_v20 = vunpack.i.l.bf16 %v3769_v59 }
 0x169   :  { %992 = vmatpush.msra.mxu2 %v5644_v57  ;;  %2172 = vmatpush.msk.msrb.mxu3 %vm109_vm1, %v5661_v56  ;;  %v760_v57 = vsel %vm754_vm4, %v2550_v33, %v2579_v17  ;;  %v691_v33 = vsel %vm5664_vm3, %v2569_v61, %v2570_v55  ;;  %v692_v14 = vsel %vm5665_vm6, %v2570_v55, %v2589_v12  ;;  %v5668_v61 = vld [vmem:[#allocation32_spill] sm:$0xff]  ;;  %vm5670_vm3 = vcmask 261120  }
 0x16a   :  { %2169 = vmatpush.msk.msra.mxu1 %vm109_vm1, %v5660_v21  ;;  %v625_v16 = vsel %vm5670_vm3, %v2459_v38, %v5669_v26  ;;  %v5675_v38 = vunpack.i.h.bf16 %v3624_v6  ;;  %v5678_v6 = vld [vmem:[#allocation4_spill] sm:$0xff] }
 0x16b   :  { %993 = vmatpush.msra.mxu2 %v5648_v13  ;;  %1013 = vmatpush.msrb.mxu3 %v760_v57  ;;  %v726_v13 = vsel %vm720_vm0, %v2560_v18, %v2584_v35  ;;  %v5676_v18 = vld [vmem:[#allocation34_spill] sm:$0xff] }
 0x16c   :  { %973 = vmatpush.msra.mxu1 %v759_v36 }
 0x16d   :  { %994 = vmatpush.msra.mxu2 %v182_v51  ;;  %1014 = vmatpush.msrb.mxu3 %v726_v13  ;;  %v591_v51 = vsel %vm5673_vm5, %v2474_v28, %v5672_v1  ;;  %v523_v28 = vsel %vm516_vm11, %v2494_v10, %v5677_v2 }
 0x16e   :  { %974 = vmatpush.msra.mxu1 %v725_v5  ;;  %v5671_v5 = vld [vmem:[#allocation9_spill] sm:$0xff] }
 0x16f   :  { %995 = vmatpush.msra.mxu2 %v148_v29  ;;  %1015 = vmatpush.msrb.mxu3 %v692_v14  ;;  %v2580_v29 = vunpack.i.h.bf16 %v4164_v23 }
 0x170   :  { %975 = vmatpush.msra.mxu1 %v691_v33 }
 0x171   :  { %2171 = vmatpush.msk.msra.mxu2 %vm109_vm1, %v5660_v21  ;;  %1016 = vmatpush.msrb.mxu3 %v658_v47  ;;  %v2590_v21 = vunpack.i.h.bf16 %v4234_v27  ;;  %v771_v10 = vsel %vm754_vm4, %v2580_v29, %v5680_v20 }
 0x172   :  { %976 = vmatpush.msra.mxu1 %v657_v19  ;;  %997 = vmatmul.f32.vlgmr.msra.gmra.mxu2 %v3731_v41 }
 0x173   :  { %1088 = vmatpush.msrb.mxu2 %v5668_v61  ;;  %2170 = vmatmul.msk.f32.vlgmr.msra.gmra.mxu1 %vm777_vm2, %v3736_v0 }
 0x174   :  { %1021 = vmatpush.msrb.mxu1 %v625_v16  ;;  %1048 = vmatpush.msra.mxu3 %v5629_v25  ;;  %v557_v25 = vsel %vm550_vm10, %v2484_v58, %v5675_v38  ;;  %v5679_v58 = vunpack.i.h.bf16 %v3781_v49  ;;  %v761_v49 = vsel %vm754_vm4, %v2579_v17, %v2580_v29  ;;  %vm5683_vm4 = vmmov %vm5665_vm6 }
 0x175   :  { %2173 = vmatmul.msk.f32.vlgmr.msrb.gmra.mxu3 %vm777_vm2, %v3736_v0  ;;  %1089 = vmatpush.msrb.mxu2 %v5671_v5  ;;  %vm5684_vm10 = vmmov %vm5683_vm4 }
 0x176   :  { %1022 = vmatpush.msrb.mxu1 %v591_v51  ;;  %1049 = vmatpush.msra.mxu3 %v5633_v39  ;;  %v2585_v39 = vunpack.i.h.bf16 %v4214_v22  ;;  %v693_v4 = vsel %vm5684_vm10, %v2589_v12, %v2590_v21 }
 0x177   :  { %1090 = vmatpush.msrb.mxu2 %v5674_v44 }
 0x178   :  { %1023 = vmatpush.msrb.mxu1 %v557_v25  ;;  %1050 = vmatpush.msra.mxu3 %v4157_v63  ;;  %v489_v63 = vsel %vm482_vm12, %v2504_v42, %v5679_v58  ;;  %v2595_v42 = vunpack.i.h.bf16 %v4237_v52  ;;  %vm5686_vm12 = vmmov %vm5666_vm9 }
 0x179   :  { %1091 = vmatpush.msrb.mxu2 %v5676_v18 }
 0x17a   :  { %1024 = vmatpush.msrb.mxu1 %v523_v28  ;;  %1051 = vmatpush.msra.mxu3 %v4181_v8  ;;  %v455_v8 = vsel %vm448_vm13, %v2519_v62, %v2520_v9  ;;  %v727_v9 = vsel %vm720_vm0, %v2584_v35, %v2585_v39  ;;  %v5682_v62 = vunpack.i.l.bf16 %v3856_v54  ;;  %v669_v3 = vsel %vm5686_vm12, %v2595_v42, %v5685_v60 }
 0x17b   :  { %2178 = vmatpush.msk.msrb.mxu2 %vm109_vm1, %v5678_v6  ;;  %v5687_v54 = vunpack.i.l.bf16 %v3890_v43  ;;  %v5692_v43 = vld [vmem:[#allocation25_spill] sm:$0xff]  ;;  %vm5703_vm12 = vcmask 1014784  }
 0x17c   :  { %1025 = vmatpush.msrb.mxu1 %v489_v63  ;;  %2175 = vmatpush.msk.msra.mxu3 %vm109_vm1, %v5657_v40  ;;  %v5681_v40 = vunpack.i.l.bf16 %v3815_v30  ;;  %v703_v23 = vsel %vm5683_vm4, %v2590_v21, %v5682_v62  ;;  %v387_v30 = vsel %vm380_vm15, %v2539_v11, %v2540_v37  ;;  %vm5689_vm15 = vmmov %vm5666_vm9  ;;  %v5691_v37 = vunpack.i.l.bf16 %v4040_v45 }
 0x17d   :  { %1093 = vmatpush.msrb.mxu2 %v771_v10  ;;  %v353_v22 = vsel %vm5688_vm14, %v5687_v54, %v2555_v7  ;;  %v659_v50 = vsel %vm5689_vm15, %v2594_v32, %v2595_v42  ;;  %v5693_v7 = vunpack.i.h.bf16 %v5692_v43  ;;  %v5694_v17 = vunpack.i.l.bf16 %v5692_v43 }
 0x17e   :  { %1026 = vmatpush.msrb.mxu1 %v455_v8  ;;  %1053 = vmatpush.msra.mxu3 %v761_v49  ;;  %v737_v59 = vsel %vm720_vm0, %v2585_v39, %v5681_v40  ;;  %v319_v11 = vsel %vm312_vm8, %v5691_v37, %v5690_v31  ;;  %vm5704_vm14 = vcmask 1031168   ;;  %vm1510_vm15 = vcmask 457728  }
 0x17f   :  { %1094 = vmatpush.msrb.mxu2 %v737_v59  ;;  %v285_v35 = vsel %vm278_vm7, %v5694_v17, %v5693_v7 }
 0x180   :  { %1027 = vmatpush.msrb.mxu1 %v421_v48  ;;  %1054 = vmatpush.msra.mxu3 %v727_v9 }
 0x181   :  { %1095 = vmatpush.msrb.mxu2 %v703_v23 }
 0x182   :  { %1028 = vmatpush.msrb.mxu1 %v387_v30  ;;  %1055 = vmatpush.msra.mxu3 %v693_v4 }
 0x183   :  { %1096 = vmatpush.msrb.mxu2 %v669_v3 }
 0x184   :  { %1029 = vmatpush.msrb.mxu1 %v353_v22  ;;  %1056 = vmatpush.msra.mxu3 %v659_v50 }
 0x185   :  { %2179 = vmatmul.msk.f32.vlgmr.msrb.gmra.mxu2 %vm777_vm2, %v3736_v0  ;;  %2176 = vmatmul.msk.f32.vlgmr.msra.gmra.mxu3 %vm777_vm2, %v3736_v0 }
 0x186   :  { %1030 = vmatpush.msrb.mxu1 %v319_v11 }
 0x188   :  { %1031 = vmatpush.msrb.mxu1 %v285_v35 }
 0x18a   :  { %1032 = vmatpush.msrb.mxu1 %v4174_v46 }
 0x18c   :  { %1033 = vmatpush.msrb.mxu1 %v4197_v34 }
 0x18e   :  { %1034 = vmatpush.msrb.mxu1 %v4211_v15 }
 0x190   :  { %1035 = vmatpush.msrb.mxu1 %v4225_v24 }
 0x192   :  { %2174 = vmatpush.msk.msrb.mxu1 %vm109_vm1, %v5661_v56  ;;  %vm5695_vm1 = vcmask 1039360  }
 0x193   :  { %1037 = vmatmul.f32.vlgmr.msrb.gmra.mxu1 %v3731_v41  ;;  %vm5696_vm0 = vmmov %vm5695_vm1 }
 0x194   :  { %v838_v45 = vpop.f32.mrf.mxu2  ;;  %v858_v55 = vpop.f32.mrf.mxu3  ;;  %vm5697_vm6 = vmmov %vm5696_vm0 }
 0x195   :  { %vm5698_vm9 = vmmov %vm5696_vm0 }
 0x196   :  { %vm5699_vm3 = vmmov %vm5696_vm0 }
 0x197   :  { %vm5700_vm5 = vmmov %vm5696_vm0 }
 0x198   :  { %vm5701_vm4 = vmmov %vm5696_vm0 }
 0x199   :  { %vm5702_vm10 = vmmov %vm5696_vm0 }
 0x19a   :  { %v798_v34 = vpop.f32.mrf.mxu0 }
 0x19d   :  { %v775_v27 = vpop.permute.xlu1 %774 }
 0x19e   :  { %v839_v52 = vadd.f32 %v838_v45, %v775_v27  ;;  %v799_v26 = vadd.f32 %v798_v34, %v775_v27 }
 0x1a0   :  { %v4382_v36 = vadd.f32 %v858_v55, %v839_v52 }
 0x1a2   :  { %v1102_v15 = vmax.f32 %v4382_v36, 0.0 }
 0x1b8   :  { %v818_v0 = vpop.f32.mrf.mxu1 }
 0x1b9   :  { %v819_v38 = vadd.f32 %v818_v0, %v799_v26 }
 0x1bb   :  { %v918_v56 = vpop.f32.mrf.mxu0  ;;  %v1101_v18 = vmax.f32 %v819_v38, 0.0 }
 0x1bc   :  { %v919_v32 = vadd.f32 %v918_v56, %v775_v27 }
 0x1c0   :  { %v898_v12 = vpop.f32.mrf.mxu3 }
 0x1cf   :  { %v938_v33 = vpop.f32.mrf.mxu2 }
 0x1d0   :  { %v4395_v19 = vadd.f32 %v938_v33, %v919_v32 }
 0x1d2   :  { %v1104_v16 = vmax.f32 %v4395_v19, 0.0 }
 0x1de   :  { %v878_v53 = vpop.f32.mrf.mxu1 }
 0x1df   :  { %v879_v46 = vadd.f32 %v878_v53, %v775_v27 }
 0x1e1   :  { %v4384_v57 = vadd.f32 %v898_v12, %v879_v46 }
 0x1e3   :  { %v1103_v24 = vmax.f32 %v4384_v57, 0.0  ;;  %v958_v13 = vpop.f32.mrf.mxu3  ;;  %v1078_v39 = vpop.f32.mrf.mxu0 }
 0x1e4   :  { %v959_v14 = vadd.f32 %v958_v13, %v775_v27  ;;  %v1079_v58 = vadd.f32 %v1078_v39, %v775_v27 }
 0x1e5   :  { %v2607_v41 = vpack.i.bf16 %v1103_v24, %v1102_v15 }
 0x1e7   :  { %2608 = vrot.lane.b32.xlu0 %v2607_v41, %s2949_s21  ;;  %2603 = vrot.lane.b32.xlu1 %v2607_v41, %s2948_s20 }
 0x1e8   :  { %2598 = vrot.lane.b32.xlu2 %v2607_v41, %s2944_s0 }
 0x1f0   :  { %v978_v47 = vpop.f32.mrf.mxu1 }
 0x1f1   :  { %v4397_v61 = vadd.f32 %v978_v47, %v959_v14 }
 0x1f3   :  { %v1105_v5 = vmax.f32 %v4397_v61, 0.0 }
 0x1f5   :  { %v998_v1 = vpop.f32.mrf.mxu2  ;;  %v2622_v51 = vpack.i.bf16 %v1105_v5, %v1104_v16 }
 0x1f6   :  { %v999_v44 = vadd.f32 %v998_v1, %v775_v27 }
 0x1f7   :  { %2623 = vrot.lane.b32.xlu1 %v2622_v51, %s2949_s21  ;;  %2618 = vrot.lane.b32.xlu2 %v2622_v51, %s2948_s20 }
 0x1f8   :  { %v1018_v25 = vpop.f32.mrf.mxu3  ;;  %2613 = vrot.lane.b32.xlu0 %v2622_v51, %s2944_s0 }
 0x1f9   :  { %v4408_v29 = vadd.f32 %v1018_v25, %v999_v44 }
 0x1fb   :  { %v1106_v2 = vmax.f32 %v4408_v29, 0.0 }
 0x1fd   :  { %v2637_v28 = vpack.i.bf16 %v1106_v2, %v1101_v18 }
 0x1ff   :  { %2638 = vrot.lane.b32.xlu1 %v2637_v28, %s2949_s21  ;;  %2628 = vrot.lane.b32.xlu2 %v2637_v28, %s2944_s0 }
 0x200   :  { %2633 = vrot.lane.b32.xlu0 %v2637_v28, %s2948_s20 }
 0x208   :  { %v1098_v6 = vpop.f32.mrf.mxu2  ;;  %v1058_v21 = vpop.f32.mrf.mxu3 }
 0x209   :  { %v4416_v20 = vadd.f32 %v1098_v6, %v1079_v58 }
 0x20b   :  { %v1108_v49 = vmax.f32 %v4416_v20, 0.0 }
 0x210   :  { %v1038_v63 = vpop.f32.mrf.mxu1 }
 0x211   :  { %v1039_v10 = vadd.f32 %v1038_v63, %v775_v27 }
 0x213   :  { %v4418_v8 = vadd.f32 %v1058_v21, %v1039_v10 }
 0x215   :  { %v1107_v42 = vmax.f32 %v4418_v8, 0.0 }
 0x217   :  { %v2652_v40 = vpack.i.bf16 %v1108_v49, %v1107_v42 }
 0x219   :  { %2653 = vrot.lane.b32.xlu1 %v2652_v40, %s2949_s21  ;;  %2648 = vrot.lane.b32.xlu0 %v2652_v40, %s2948_s20  ;;  %s2967_s20 = smov 122  }
 0x21a   :  { %2643 = vrot.lane.b32.xlu2 %v2652_v40, %s2944_s0  ;;  %s2965_s0 = smov 56  }
 0x242   :  { %v2599_v59 = vpop.permute.xlu2 %2598 }
 0x243   :  { %v2601_v50 = vunpack.i.h.bf16 %v2599_v59  ;;  %v2600_v31 = vunpack.i.l.bf16 %v2599_v59 }
 0x245   :  { %v1134_v17 = vsel %vm5695_vm1, %v2600_v31, %v2601_v50  ;;  %vm1479_vm1 = vcmask 474112  }
 0x246   :  { %v1151_v12 = vmax.f32 %v1102_v15, %v1134_v17 }
 0x251   :  { %v4429_v9 = vpop.permute.xlu2 %2618 }
 0x252   :  { %v2620_v41 = vunpack.i.l.bf16 %v4429_v9  ;;  %v2621_v38 = vunpack.i.h.bf16 %v4429_v9 }
 0x259   :  { %v2604_v48 = vpop.permute.xlu1 %2603  ;;  %v2609_v62 = vpop.permute.xlu0 %2608 }
 0x25a   :  { %v4433_v4 = vpop.permute.xlu2 %2628  ;;  %v2611_v60 = vunpack.i.h.bf16 %v2609_v62  ;;  %v2610_v3 = vunpack.i.l.bf16 %v2609_v62  ;;  %v2606_v54 = vunpack.i.h.bf16 %v2604_v48  ;;  %v2605_v22 = vunpack.i.l.bf16 %v2604_v48 }
 0x25b   :  { %v2630_v37 = vunpack.i.l.bf16 %v4433_v4  ;;  %v2631_v19 = vunpack.i.h.bf16 %v4433_v4 }
 0x25c   :  { %v1208_v11 = vsel %vm312_vm8, %v2610_v3, %v2611_v60  ;;  %v1175_v43 = vsel %vm278_vm7, %v2605_v22, %v2606_v54  ;;  %v1176_v14 = vsel %vm278_vm7, %v2606_v54, %v2620_v41 }
 0x25d   :  { %v1133_v27 = vsel %vm5696_vm0, %v2630_v37, %v2600_v31  ;;  %v1225_v53 = vmax.f32 %v1175_v43, %v1208_v11  ;;  %vm5705_vm0 = vcmask 490496  }
 0x25e   :  { %v1150_v56 = vmax.f32 %v1101_v18, %v1133_v27  ;;  %v1177_v18 = vsel %vm278_vm7, %v2620_v41, %v2621_v38 }
 0x25f   :  { %v4457_v47 = vmax.f32 %v1151_v12, %v1225_v53 }
 0x269   :  { %v2624_v23 = vpop.permute.xlu1 %2623 }
 0x26a   :  { %v4431_v30 = vpop.permute.xlu0 %2613  ;;  %v2625_v35 = vunpack.i.l.bf16 %v2624_v23  ;;  %v2626_v51 = vunpack.i.h.bf16 %v2624_v23 }
 0x26b   :  { %v2615_v55 = vunpack.i.l.bf16 %v4431_v30  ;;  %v2616_v44 = vunpack.i.h.bf16 %v4431_v30 }
 0x26c   :  { %v1209_v32 = vsel %vm312_vm8, %v2611_v60, %v2625_v35  ;;  %v1210_v57 = vsel %vm312_vm8, %v2625_v35, %v2626_v51 }
 0x26d   :  { %v1135_v33 = vsel %vm5697_vm6, %v2601_v50, %v2615_v55  ;;  %v1226_v1 = vmax.f32 %v1176_v14, %v1209_v32  ;;  %v1227_v28 = vmax.f32 %v1177_v18, %v1210_v57  ;;  %v1137_v59 = vsel %vm5699_vm3, %v2616_v44, %v2631_v19  ;;  %vm5706_vm6 = vmmov %vm5703_vm12 }
 0x26e   :  { %v1152_v36 = vmax.f32 %v1103_v24, %v1135_v33  ;;  %v1136_v24 = vsel %vm5698_vm9, %v2615_v55, %v2616_v44  ;;  %v1154_v60 = vmax.f32 %v1105_v5, %v1137_v59  ;;  %vm5707_vm9 = vmmov %vm5706_vm6 }
 0x26f   :  { %v1153_v39 = vmax.f32 %v1104_v16, %v1136_v24  ;;  %vm5708_vm3 = vmmov %vm5704_vm14 }
 0x270   :  { %v4470_v25 = vmax.f32 %v1152_v36, %v1226_v1 }
 0x271   :  { %v4438_v7 = vpop.permute.xlu1 %2638  ;;  %v4484_v21 = vmax.f32 %v1153_v39, %v1227_v28 }
 0x272   :  { %v2640_v0 = vunpack.i.l.bf16 %v4438_v7  ;;  %v4442_v45 = vpop.permute.xlu0 %2633  ;;  %v2682_v6 = vpack.i.bf16 %v4470_v25, %v4457_v47  ;;  %v2641_v58 = vunpack.i.h.bf16 %v4438_v7 }
 0x273   :  { %v2635_v52 = vunpack.i.l.bf16 %v4442_v45  ;;  %v2636_v63 = vunpack.i.h.bf16 %v4442_v45  ;;  %v2707_v62 = vpack.i.bf16 %v4484_v21, %v4470_v25 }
 0x274   :  { %v1207_v46 = vsel %vm312_vm8, %v2640_v0, %v2610_v3  ;;  %v2644_v10 = vpop.permute.xlu2 %2643  ;;  %v1211_v16 = vsel %vm312_vm8, %v2626_v51, %v2641_v58 }
 0x275   :  { %v1174_v34 = vsel %vm278_vm7, %v2635_v52, %v2605_v22  ;;  %v1178_v40 = vsel %vm278_vm7, %v2621_v38, %v2636_v63  ;;  %v2646_v48 = vunpack.i.h.bf16 %v2644_v10  ;;  %v2645_v20 = vunpack.i.l.bf16 %v2644_v10 }
 0x276   :  { %v1224_v13 = vmax.f32 %v1174_v34, %v1207_v46  ;;  %v1228_v9 = vmax.f32 %v1178_v40, %v1211_v16 }
 0x277   :  { %v1149_v22 = vsel %vm5700_vm5, %v2646_v48, %v2630_v37  ;;  %v1138_v35 = vsel %vm5701_vm4, %v2631_v19, %v2645_v20  ;;  %vm5709_vm5 = vmmov %vm5708_vm3 }
 0x278   :  { %v4459_v26 = vmax.f32 %v1150_v56, %v1224_v13  ;;  %v4500_v50 = vmax.f32 %v1154_v60, %v1228_v9  ;;  %v1157_v61 = vmax.f32 %v1108_v49, %v1149_v22  ;;  %v1155_v45 = vmax.f32 %v1106_v2, %v1138_v35  ;;  %vm5710_vm4 = vmmov %vm5705_vm0 }
 0x27a   :  { %v2672_v15 = vpack.i.bf16 %v4457_v47, %v4459_v26  ;;  %v2722_v7 = vpack.i.bf16 %v4500_v50, %v4484_v21 }
 0x27c   :  { %2673 = vrot.lane.b32.xlu0 %v2672_v15, %s2952_s24  ;;  %2663 = vrot.lane.b32.xlu1 %v2672_v15, %s2964_s2 }
 0x27d   :  { %2658 = vrot.lane.b32.xlu2 %v2672_v15, %s2965_s0 }
 0x284   :  { %2683 = vrot.lane.b32.xlu0 %v2682_v6, %s2966_s18  ;;  %2688 = vrot.lane.b32.xlu1 %v2682_v6, %s2967_s20 }
 0x285   :  { %2668 = vrot.lane.b32.xlu2 %v2672_v15, %s2953_s25 }
 0x28b   :  { %v2654_v23 = vpop.permute.xlu1 %2653  ;;  %v2649_v30 = vpop.permute.xlu0 %2648 }
 0x28c   :  { %v2656_v3 = vunpack.i.h.bf16 %v2654_v23  ;;  %v2651_v54 = vunpack.i.h.bf16 %v2649_v30  ;;  %2708 = vrot.lane.b32.xlu0 %v2707_v62, %s2964_s2  ;;  %2698 = vrot.lane.b32.xlu1 %v2682_v6, %s2945_s17  ;;  %v2655_v4 = vunpack.i.l.bf16 %v2654_v23  ;;  %v2650_v37 = vunpack.i.l.bf16 %v2649_v30 }
 0x28d   :  { %2678 = vrot.lane.b32.xlu2 %v2682_v6, %s2954_s26 }
 0x28e   :  { %v1223_v31 = vsel %vm312_vm8, %v2656_v3, %v2640_v0  ;;  %v1190_v11 = vsel %vm278_vm7, %v2651_v54, %v2635_v52  ;;  %v1212_v49 = vsel %vm312_vm8, %v2641_v58, %v2655_v4  ;;  %v1179_v17 = vsel %vm278_vm7, %v2636_v63, %v2650_v37 }
 0x28f   :  { %v1231_v5 = vmax.f32 %v1190_v11, %v1223_v31  ;;  %v1229_v0 = vmax.f32 %v1179_v17, %v1212_v49  ;;  %v1213_v29 = vsel %vm312_vm8, %v2655_v4, %v2656_v3  ;;  %v1180_v2 = vsel %vm278_vm7, %v2650_v37, %v2651_v54 }
 0x290   :  { %v1139_v52 = vsel %vm5702_vm10, %v2645_v20, %v2646_v48  ;;  %v1230_v53 = vmax.f32 %v1180_v2, %v1213_v29  ;;  %vm1358_vm7 = vcmask 982016   ;;  %vm1327_vm8 = vcmask 998400   ;;  %vm5711_vm10 = vmmov %vm5705_vm0 }
 0x291   :  { %v4506_v43 = vmax.f32 %v1157_v61, %v1231_v5  ;;  %v4524_v27 = vmax.f32 %v1155_v45, %v1229_v0  ;;  %v1156_v12 = vmax.f32 %v1107_v42, %v1139_v52 }
 0x293   :  { %v2757_v55 = vpack.i.bf16 %v4524_v27, %v4459_v26  ;;  %v2777_v46 = vpack.i.bf16 %v4524_v27, %v4500_v50  ;;  %v4541_v34 = vmax.f32 %v1156_v12, %v1230_v53 }
 0x294   :  { %2723 = vrot.lane.b32.xlu0 %v2722_v7, %s2954_s26  ;;  %2703 = vrot.lane.b32.xlu1 %v2707_v62, %s2965_s0 }
 0x295   :  { %2693 = vrot.lane.b32.xlu2 %v2682_v6, %s2947_s19  ;;  %v2787_v41 = vpack.i.bf16 %v4506_v43, %v4541_v34 }
 0x29c   :  { %2733 = vrot.lane.b32.xlu0 %v2722_v7, %s2967_s20  ;;  %2718 = vrot.lane.b32.xlu1 %v2707_v62, %s2952_s24 }
 0x29d   :  { %2713 = vrot.lane.b32.xlu2 %v2707_v62, %s2953_s25 }
 0x2a4   :  { %2743 = vrot.lane.b32.xlu0 %v2722_v7, %s2945_s17  ;;  %2738 = vrot.lane.b32.xlu1 %v2722_v7, %s2947_s19 }
 0x2a5   :  { %2728 = vrot.lane.b32.xlu2 %v2722_v7, %s2966_s18 }
 0x2ac   :  { %2758 = vrot.lane.b32.xlu0 %v2757_v55, %s2967_s20  ;;  %2753 = vrot.lane.b32.xlu1 %v2757_v55, %s2966_s18 }
 0x2ad   :  { %2748 = vrot.lane.b32.xlu2 %v2757_v55, %s2954_s26 }
 0x2b4   :  { %2768 = vrot.lane.b32.xlu0 %v2757_v55, %s2945_s17  ;;  %2778 = vrot.lane.b32.xlu1 %v2777_v46, %s2964_s2 }
 0x2b5   :  { %2763 = vrot.lane.b32.xlu2 %v2757_v55, %s2947_s19 }
 0x2bc   :  { %2773 = vrot.lane.b32.xlu0 %v2777_v46, %s2965_s0  ;;  %2788 = vrot.lane.b32.xlu1 %v2787_v41, %s2954_s26 }
 0x2bd   :  { %2783 = vrot.lane.b32.xlu2 %v2777_v46, %s2953_s25 }
 0x2c4   :  { %2798 = vrot.lane.b32.xlu0 %v2787_v41, %s2967_s20  ;;  %2808 = vrot.lane.b32.xlu1 %v2787_v41, %s2947_s19 }
 0x2c5   :  { %2793 = vrot.lane.b32.xlu2 %v2787_v41, %s2966_s18 }
 0x2cc   :  { %2803 = vrot.lane.b32.xlu0 %v2777_v46, %s2952_s24  ;;  %1506 = vrot.lane.b32.xlu1 %v4541_v34, %s2965_s0 }
 0x2cd   :  { %2813 = vrot.lane.b32.xlu2 %v2787_v41, %s2945_s17 }
 0x2d4   :  { %1445 = vrot.lane.b32.xlu0 %v4541_v34, %s2953_s25  ;;  %1415 = vrot.lane.b32.xlu1 %v4541_v34, %s2952_s24 }
 0x2d5   :  { %1475 = vrot.lane.b32.xlu2 %v4541_v34, %s2964_s2 }
 0x2d7   :  { %v4561_v8 = vpop.permute.xlu2 %2658 }
 0x2d8   :  { %v2661_v62 = vunpack.i.h.bf16 %v4561_v8  ;;  %v5460_v23 = vunpack.i.l.bf16 %v4561_v8 }
 0x2da   :  { %v1511_v61 = vsel %vm1510_vm15, %v5460_v23, %v2661_v62 }
 0x2dc   :  { %1477 = vrot.lane.b32.xlu0 %v4506_v43, %s2964_s2  ;;  %1447 = vrot.lane.b32.xlu1 %v4506_v43, %s2953_s25 }
 0x2dd   :  { %1508 = vrot.lane.b32.xlu2 %v4506_v43, %s2965_s0 }
 0x2df   :  { %v4569_v42 = vpop.permute.xlu2 %2668 }
 0x2e0   :  { %v2671_v31 = vunpack.i.h.bf16 %v4569_v42  ;;  %v5458_v11 = vunpack.i.l.bf16 %v4569_v42 }
 0x2e2   :  { %v1449_v0 = vsel %vm5705_vm0, %v5458_v11, %v2671_v31  ;;  %vm5718_vm0 = vmmov %vm5706_vm6 }
 0x2e5   :  { %1417 = vrot.lane.b32.xlu2 %v4506_v43, %s2952_s24 }
 0x2e7   :  { %v4573_v56 = vpop.permute.xlu2 %2678 }
 0x2e8   :  { %v2681_v32 = vunpack.i.h.bf16 %v4573_v56  ;;  %v2680_v13 = vunpack.i.l.bf16 %v4573_v56 }
 0x2ea   :  { %v4580_v33 = vsel %vm448_vm13, %v2680_v13, %v2681_v32 }
 0x2eb   :  { %1560 = vmatpush.msrb.mxu3 %v4580_v33 }
 0x2ee   :  { %v4583_v14 = vpop.permute.xlu0 %2673  ;;  %v4585_v1 = vpop.permute.xlu1 %2663 }
 0x2ef   :  { %v4587_v36 = vpop.permute.xlu2 %2693  ;;  %v2666_v54 = vunpack.i.h.bf16 %v4585_v1  ;;  %v5459_v22 = vunpack.i.l.bf16 %v4585_v1  ;;  %v2676_v4 = vunpack.i.h.bf16 %v4583_v14  ;;  %v5457_v37 = vunpack.i.l.bf16 %v4583_v14 }
 0x2f0   :  { %v2696_v28 = vunpack.i.h.bf16 %v4587_v36  ;;  %v2695_v39 = vunpack.i.l.bf16 %v4587_v36 }
 0x2f1   :  { %v1480_v17 = vsel %vm1479_vm1, %v5459_v22, %v2666_v54  ;;  %v1419_v55 = vsel %vm516_vm11, %v5457_v37, %v2676_v4 }
 0x2f2   :  { %v4618_v63 = vsel %vm5703_vm12, %v2695_v39, %v2696_v28  ;;  %vm5712_vm12 = vmmov %vm5706_vm6 }
 0x2f6   :  { %v4589_v15 = vpop.permute.xlu0 %2683  ;;  %v4591_v51 = vpop.permute.xlu1 %2688 }
 0x2f7   :  { %v2686_v44 = vunpack.i.h.bf16 %v4589_v15  ;;  %v2685_v38 = vunpack.i.l.bf16 %v4589_v15  ;;  %v2691_v57 = vunpack.i.h.bf16 %v4591_v51  ;;  %v2690_v24 = vunpack.i.l.bf16 %v4591_v51  ;;  %v4597_v18 = vpop.permute.xlu2 %2713 }
 0x2f8   :  { %v2715_v22 = vunpack.i.l.bf16 %v4597_v18 }
 0x2f9   :  { %v4604_v6 = vsel %vm1358_vm7, %v2685_v38, %v2686_v44  ;;  %v4610_v58 = vsel %vm1327_vm8, %v2690_v24, %v2691_v57 }
 0x2fa   :  { %1561 = vmatpush.msrb.mxu3 %v4604_v6 }
 0x2fc   :  { %1562 = vmatpush.msrb.mxu3 %v4610_v58 }
 0x2fe   :  { %v4620_v10 = vpop.permute.xlu0 %2708  ;;  %v4622_v19 = vpop.permute.xlu1 %2698  ;;  %1563 = vmatpush.msrb.mxu3 %v4618_v63 }
 0x2ff   :  { %v2701_v16 = vunpack.i.h.bf16 %v4622_v19  ;;  %v5465_v40 = vunpack.i.l.bf16 %v4622_v19  ;;  %v4627_v59 = vpop.permute.xlu2 %2728  ;;  %v2711_v37 = vunpack.i.h.bf16 %v4620_v10 }
 0x300   :  { %v5467_v48 = vunpack.i.h.bf16 %v4627_v59  ;;  %v2730_v9 = vunpack.i.l.bf16 %v4627_v59 }
 0x301   :  { %v4638_v30 = vsel %vm5704_vm14, %v5465_v40, %v2701_v16  ;;  %vm5715_vm14 = vmmov %vm5708_vm3 }
 0x302   :  { %1564 = vmatpush.msrb.mxu3 %v4638_v30  ;;  %v4642_v60 = vsel %vm1358_vm7, %v2686_v44, %v2730_v9  ;;  %v4647_v3 = vsel %vm1358_vm7, %v2730_v9, %v5467_v48 }
 0x303   :  { %1587 = vmatpush.msra.mxu1 %v4642_v60  ;;  %1627 = vmatpush.msrb.mxu0 %v4647_v3 }
 0x304   :  { %1565 = vmatpush.msrb.mxu3 %v4457_v47 }
 0x306   :  { %v4661_v5 = vpop.permute.xlu0 %2723  ;;  %v4663_v7 = vpop.permute.xlu1 %2703  ;;  %1566 = vmatpush.msrb.mxu3 %v1511_v61 }
 0x307   :  { %v2725_v20 = vunpack.i.l.bf16 %v4661_v5  ;;  %v4668_v49 = vpop.permute.xlu2 %2748  ;;  %v2726_v15 = vunpack.i.h.bf16 %v4661_v5  ;;  %v5714_v5 = vunpack.i.l.bf16 %v4622_v19 }
 0x308   :  { %1567 = vmatpush.msrb.mxu3 %v1480_v17  ;;  %v5461_v35 = vunpack.i.l.bf16 %v4668_v49  ;;  %v5472_v48 = vunpack.i.h.bf16 %v4668_v49 }
 0x309   :  { %v4684_v45 = vsel %vm448_vm13, %v2681_v32, %v2725_v20 }
 0x30a   :  { %1568 = vmatpush.msrb.mxu3 %v1449_v0  ;;  %1600 = vmatpush.msra.mxu2 %v4684_v45  ;;  %v1389_v29 = vsel %vm448_vm13, %v5461_v35, %v2680_v13 }
 0x30c   :  { %1569 = vmatpush.msrb.mxu3 %v1419_v55  ;;  %1601 = vmatpush.msra.mxu2 %v4642_v60  ;;  %v2705_v55 = vunpack.i.l.bf16 %v4663_v7 }
 0x30e   :  { %v4698_v2 = vpop.permute.xlu0 %2733  ;;  %v4700_v52 = vpop.permute.xlu1 %2718  ;;  %1570 = vmatpush.msrb.mxu3 %v1389_v29  ;;  %v1512_v35 = vsel %vm1510_vm15, %v2661_v62, %v2705_v55 }
 0x30f   :  { %v5464_v53 = vunpack.i.h.bf16 %v4698_v2  ;;  %v2735_v46 = vunpack.i.l.bf16 %v4698_v2  ;;  %v4723_v61 = vpop.permute.xlu2 %2763 }
 0x310   :  { %v5469_v40 = vunpack.i.l.bf16 %v4723_v61  ;;  %v2766_v19 = vunpack.i.h.bf16 %v4723_v61 }
 0x311   :  { %v4705_v12 = vsel %vm1327_vm8, %v2691_v57, %v2735_v46  ;;  %v4710_v41 = vsel %vm1327_vm8, %v2735_v46, %v5464_v53  ;;  %v2720_v53 = vunpack.i.l.bf16 %v4700_v52 }
 0x312   :  { %1588 = vmatpush.msra.mxu1 %v4705_v12  ;;  %1602 = vmatpush.msra.mxu2 %v4705_v12  ;;  %v4822_v51 = vsel %vm5712_vm12, %v5469_v40, %v2695_v39  ;;  %v4848_v40 = vsel %vm448_vm13, %v2726_v15, %v5472_v48  ;;  %vm5727_vm12 = vmmov %vm5709_vm5 }
 0x313   :  { %1628 = vmatpush.msrb.mxu0 %v4710_v41 }
 0x316   :  { %v4715_v56 = vpop.permute.xlu0 %2743  ;;  %v4717_v32 = vpop.permute.xlu1 %2738 }
 0x317   :  { %v2745_v13 = vunpack.i.l.bf16 %v4715_v56  ;;  %v5463_v44 = vunpack.i.h.bf16 %v4717_v32  ;;  %v2740_v57 = vunpack.i.l.bf16 %v4717_v32  ;;  %v5462_v9 = vunpack.i.h.bf16 %v4715_v56 }
 0x319   :  { %v4728_v17 = vsel %vm5706_vm6, %v2696_v28, %v2740_v57  ;;  %v4733_v0 = vsel %vm5707_vm9, %v2740_v57, %v5463_v44  ;;  %v4742_v29 = vsel %vm5708_vm3, %v2701_v16, %v2745_v13  ;;  %v5466_v28 = vunpack.i.h.bf16 %v4663_v7  ;;  %vm5720_vm6 = vmmov %vm5708_vm3 }
 0x31a   :  { %1589 = vmatpush.msra.mxu1 %v4728_v17  ;;  %1603 = vmatpush.msra.mxu2 %v4728_v17  ;;  %v4750_v46 = vsel %vm5709_vm5, %v2745_v13, %v5462_v9  ;;  %v2710_v57 = vunpack.i.l.bf16 %v4620_v10  ;;  %v2716_v9 = vunpack.i.h.bf16 %v4597_v18  ;;  %vm5722_vm9 = vmmov %vm5710_vm4  ;;  %v1242_v18 = vld [vmem:[%s5336_s4] sm:$0xff]  ;;  %s2968_s4 = smov 116  }
 0x31b   :  { %1629 = vmatpush.msrb.mxu0 %v4733_v0  ;;  %v4772_v44 = vsel %vm1510_vm15, %v2705_v55, %v5466_v28  ;;  %v2721_v55 = vunpack.i.h.bf16 %v4700_v52  ;;  %vm5723_vm3 = vmmov %vm5718_vm0  ;;  %1554 = vperm.xlu0 %2817, %v1242_v18  }
 0x31c   :  { %1590 = vmatpush.msra.mxu1 %v4742_v29  ;;  %1604 = vmatpush.msra.mxu2 %v4742_v29  ;;  %v4792_v28 = vsel %vm1479_vm1, %v2710_v57, %v2711_v37 }
 0x31d   :  { %1630 = vmatpush.msrb.mxu0 %v4750_v46  ;;  %v4835_v36 = vsel %vm516_vm11, %v2720_v53, %v2721_v55 }
 0x31e   :  { %v4755_v11 = vpop.permute.xlu0 %2758  ;;  %v4757_v16 = vpop.permute.xlu1 %2753  ;;  %1591 = vmatpush.msra.mxu1 %v4470_v25  ;;  %1605 = vmatpush.msra.mxu2 %v4470_v25 }
 0x31f   :  { %v5471_v23 = vunpack.i.l.bf16 %v4755_v11  ;;  %v5468_v13 = vunpack.i.l.bf16 %v4757_v16  ;;  %1631 = vmatpush.msrb.mxu0 %v4484_v21 }
 0x320   :  { %1592 = vmatpush.msra.mxu1 %v1512_v35  ;;  %1606 = vmatpush.msra.mxu2 %v1512_v35  ;;  %v1481_v35 = vsel %vm1479_vm1, %v2666_v54, %v2710_v57  ;;  %v1450_v57 = vsel %vm5710_vm4, %v2671_v31, %v2715_v22 }
 0x321   :  { %1632 = vmatpush.msrb.mxu0 %v4772_v44  ;;  %v4782_v62 = vsel %vm1358_vm7, %v5468_v13, %v2685_v38  ;;  %v4796_v38 = vpop.permute.xlu2 %2783  ;;  %v4804_v54 = vsel %vm1327_vm8, %v5471_v23, %v2690_v24  ;;  %v2756_v13 = vunpack.i.h.bf16 %v4757_v16  ;;  %v1420_v24 = vsel %vm516_vm11, %v2676_v4, %v2720_v53 }
 0x322   :  { %1571 = vmatpush.msrb.mxu3 %v4782_v62  ;;  %1593 = vmatpush.msra.mxu1 %v1481_v35  ;;  %v4843_v4 = vsel %vm448_vm13, %v2725_v20, %v2726_v15  ;;  %v5713_v53 = vunpack.i.h.bf16 %v4627_v59 }
 0x323   :  { %1607 = vmatpush.msra.mxu2 %v1481_v35  ;;  %1633 = vmatpush.msrb.mxu0 %v4792_v28  ;;  %v4813_v35 = vsel %vm5711_vm10, %v2715_v22, %v2716_v9  ;;  %vm5726_vm10 = vmmov %vm5718_vm0 }
 0x324   :  { %1572 = vmatpush.msrb.mxu3 %v4804_v54  ;;  %1594 = vmatpush.msra.mxu1 %v1450_v57 }
 0x325   :  { %1608 = vmatpush.msra.mxu2 %v1450_v57  ;;  %1634 = vmatpush.msrb.mxu0 %v4813_v35  ;;  %v2761_v57 = vunpack.i.h.bf16 %v4755_v11 }
 0x326   :  { %v4827_v31 = vpop.permute.xlu0 %2768  ;;  %v4829_v22 = vpop.permute.xlu1 %2778  ;;  %1573 = vmatpush.msrb.mxu3 %v4822_v51  ;;  %1595 = vmatpush.msra.mxu1 %v1420_v24 }
 0x327   :  { %v5470_v39 = vunpack.i.l.bf16 %v4827_v31  ;;  %1609 = vmatpush.msra.mxu2 %v1420_v24  ;;  %1635 = vmatpush.msrb.mxu0 %v4835_v36  ;;  %v4856_v24 = vsel %vm1358_vm7, %v5713_v53, %v2756_v13  ;;  %v2771_v15 = vunpack.i.h.bf16 %v4827_v31  ;;  %v2780_v23 = vunpack.i.l.bf16 %v4829_v22 }
 0x328   :  { %1640 = vmatpush.msrb.mxu1 %v4843_v4 }
 0x329   :  { %1680 = vmatpush.msra.mxu0 %v4848_v40  ;;  %1610 = vmatpush.msra.mxu2 %v4580_v33  ;;  %v4863_v20 = vsel %vm5715_vm14, %v5470_v39, %v5714_v5  ;;  %v5716_v33 = vunpack.i.h.bf16 %v4698_v2  ;;  %v4880_v53 = vpop.permute.xlu2 %2793  ;;  %vm5732_vm14 = vmmov %vm5718_vm0 }
 0x32a   :  { %1641 = vmatpush.msrb.mxu1 %v4647_v3  ;;  %1574 = vmatpush.msrb.mxu3 %v4863_v20  ;;  %v2796_v18 = vunpack.i.h.bf16 %v4880_v53 }
 0x32b   :  { %1681 = vmatpush.msra.mxu0 %v4856_v24  ;;  %1611 = vmatpush.msra.mxu2 %v4604_v6  ;;  %v4874_v59 = vsel %vm1327_vm8, %v5716_v33, %v2761_v57  ;;  %v5717_v6 = vunpack.i.h.bf16 %v4717_v32  ;;  %v5719_v32 = vunpack.i.h.bf16 %v4715_v56  ;;  %v2785_v56 = vunpack.i.l.bf16 %v4796_v38 }
 0x32c   :  { %1642 = vmatpush.msrb.mxu1 %v4710_v41  ;;  %1575 = vmatpush.msrb.mxu3 %v4459_v26 }
 0x32d   :  { %1682 = vmatpush.msra.mxu0 %v4874_v59  ;;  %1612 = vmatpush.msra.mxu2 %v4610_v58  ;;  %v4889_v2 = vsel %vm5718_vm0, %v5717_v6, %v2766_v19  ;;  %v5473_v58 = vunpack.i.l.bf16 %v4880_v53  ;;  %v4906_v6 = vsel %vm5720_vm6, %v5719_v32, %v2771_v15  ;;  %v4948_v32 = vld [vmem:[%s5335_s3 + $0x8] sm:$0xff]  ;;  %vm5735_vm0 = vmmov %vm5709_vm5 }
 0x32e   :  { %1643 = vmatpush.msrb.mxu1 %v4733_v0  ;;  %1667 = vmatpush.msra.mxu3 %v4856_v24  ;;  %v4891_v5 = vpop.permute.xlu0 %2773  ;;  %v4893_v33 = vpop.permute.xlu1 %2788  ;;  %vm5737_vm6 = vmmov %vm5710_vm4 }
 0x32f   :  { %1683 = vmatpush.msra.mxu0 %v4889_v2  ;;  %v2775_v39 = vunpack.i.l.bf16 %v4891_v5  ;;  %1613 = vmatpush.msra.mxu2 %v4618_v63  ;;  %v5721_v63 = vunpack.i.h.bf16 %v4663_v7  ;;  %v4931_v7 = vld [vmem:[%s5335_s3] sm:$0xff] }
 0x330   :  { %1644 = vmatpush.msrb.mxu1 %v4750_v46  ;;  %1668 = vmatpush.msra.mxu3 %v4874_v59 }
 0x331   :  { %1684 = vmatpush.msra.mxu0 %v4906_v6  ;;  %1614 = vmatpush.msra.mxu2 %v4638_v30  ;;  %v1514_v48 = vsel %vm1510_vm15, %v5721_v63, %v2775_v39  ;;  %v4926_v30 = vsel %vm1358_vm7, %v2756_v13, %v5473_v58  ;;  %v4950_v63 = vpop.permute.xlu2 %2813 }
 0x332   :  { %1645 = vmatpush.msrb.mxu1 %v4484_v21  ;;  %1669 = vmatpush.msra.mxu3 %v4889_v2 }
 0x333   :  { %1685 = vmatpush.msra.mxu0 %v4500_v50  ;;  %1615 = vmatpush.msra.mxu2 %v4457_v47  ;;  %v1483_v47 = vsel %vm1479_vm1, %v2711_v37, %v2780_v23  ;;  %v1452_v37 = vsel %vm5722_vm9, %v2716_v9, %v2785_v56  ;;  %v2776_v9 = vunpack.i.h.bf16 %v4891_v5  ;;  %vm5741_vm9 = vmmov %vm5710_vm4 }
 0x334   :  { %1646 = vmatpush.msrb.mxu1 %v4772_v44  ;;  %1670 = vmatpush.msra.mxu3 %v4906_v6 }
 0x335   :  { %1686 = vmatpush.msra.mxu0 %v1514_v48  ;;  %1707 = vmatpush.msrb.mxu2 %v4926_v30 }
 0x336   :  { %1647 = vmatpush.msrb.mxu1 %v4792_v28  ;;  %1671 = vmatpush.msra.mxu3 %v4500_v50  ;;  %v4941_v44 = vpop.permute.xlu0 %2798  ;;  %v4943_v13 = vpop.permute.xlu1 %2808 }
 0x337   :  { %1687 = vmatpush.msra.mxu0 %v1483_v47  ;;  %v2800_v28 = vunpack.i.l.bf16 %v4941_v44  ;;  %1576 = vmatmul.f32.vlgmr.msrb.gmra.mxu3 %v4931_v7  ;;  %v2810_v10 = vunpack.i.l.bf16 %v4943_v13 }
 0x338   :  { %1648 = vmatpush.msrb.mxu1 %v4813_v35  ;;  %1672 = vmatpush.msra.mxu3 %v1514_v48  ;;  %v2815_v35 = vunpack.i.l.bf16 %v4950_v63 }
 0x339   :  { %1688 = vmatpush.msra.mxu0 %v1452_v37  ;;  %v4966_v58 = vsel %vm1327_vm8, %v2761_v57, %v2800_v28  ;;  %2180 = vmatmul.msk.f32.vlgmr.msra.gmra.mxu1 %vm777_vm2, %v4948_v32  ;;  %v4982_v48 = vsel %vm5723_vm3, %v2766_v19, %v2810_v10  ;;  %v2790_v57 = vunpack.i.l.bf16 %v4893_v33  ;;  %vm5745_vm3 = vmmov %vm5735_vm0 }
 0x33a   :  { %1649 = vmatpush.msrb.mxu1 %v4835_v36  ;;  %1673 = vmatpush.msra.mxu3 %v1483_v47  ;;  %v5474_v47 = vunpack.i.h.bf16 %v4829_v22 }
 0x33b   :  { %1708 = vmatpush.msrb.mxu2 %v4966_v58  ;;  %2181 = vmatmul.msk.f32.vlgmr.msrb.gmra.mxu0 %vm777_vm2, %v4948_v32 }
 0x33c   :  { %1650 = vmatpush.msrb.mxu1 %v4684_v45  ;;  %1674 = vmatpush.msra.mxu3 %v1452_v37  ;;  %v4994_v45 = vsel %vm5709_vm5, %v2771_v15, %v2815_v35  ;;  %v2786_v15 = vunpack.i.h.bf16 %v4796_v38  ;;  %v1515_v37 = vsel %vm1510_vm15, %v2775_v39, %v2776_v9  ;;  %v2801_v39 = vunpack.i.h.bf16 %v4941_v44  ;;  %v1476_v44 = vpop.permute.xlu2 %1475  ;;  %vm5746_vm5 = vmmov %vm5735_vm0 }
 0x33d   :  { %1709 = vmatpush.msrb.mxu2 %v4982_v48  ;;  %v5736_v38 = vunpack.i.l.bf16 %v4668_v49 }
 0x33e   :  { %1651 = vmatpush.msrb.mxu1 %v4642_v60  ;;  %v4987_v36 = vpop.permute.xlu0 %2803  ;;  %1616 = vmatmul.f32.vlgmr.msra.gmra.mxu2 %v4931_v7 }
 0x33f   :  { %v2805_v19 = vunpack.i.l.bf16 %v4987_v36  ;;  %1710 = vmatpush.msrb.mxu2 %v4994_v45 }
 0x340   :  { %1652 = vmatpush.msrb.mxu1 %v4705_v12  ;;  %v5724_v12 = vunpack.i.h.bf16 %v4668_v49 }
 0x341   :  { %1711 = vmatpush.msrb.mxu2 %v4524_v27  ;;  %v1422_v60 = vsel %vm516_vm11, %v2721_v55, %v2805_v19  ;;  %v2806_v55 = vunpack.i.h.bf16 %v4987_v36 }
 0x342   :  { %1653 = vmatpush.msrb.mxu1 %v4728_v17  ;;  %1675 = vmatpush.msra.mxu3 %v1422_v60  ;;  %v5017_v52 = vsel %vm448_vm13, %v5724_v12, %v2790_v57  ;;  %v1484_v17 = vsel %vm1479_vm1, %v2780_v23, %v5474_v47  ;;  %v2811_v12 = vunpack.i.h.bf16 %v4943_v13  ;;  %v5725_v23 = vunpack.i.l.bf16 %v4880_v53  ;;  %v1507_v47 = vpop.permute.xlu1 %1506 }
 0x343   :  { %1689 = vmatpush.msra.mxu0 %v1422_v60  ;;  %1712 = vmatpush.msrb.mxu2 %v1515_v37  ;;  %v2791_v60 = vunpack.i.h.bf16 %v4893_v33  ;;  %v5728_v13 = vunpack.i.l.bf16 %v4757_v16  ;;  %v5730_v16 = vunpack.i.h.bf16 %v4829_v22  ;;  %v5734_v22 = vunpack.i.l.bf16 %v4827_v31 }
 0x344   :  { %1654 = vmatpush.msrb.mxu1 %v4742_v29  ;;  %1720 = vmatpush.msrb.mxu3 %v5017_v52  ;;  %v1453_v29 = vsel %vm5710_vm4, %v2785_v56, %v2786_v15  ;;  %v2816_v56 = vunpack.i.h.bf16 %v4950_v63 }
 0x345   :  { %1690 = vmatpush.msra.mxu0 %v4843_v4  ;;  %1713 = vmatpush.msrb.mxu2 %v1484_v17  ;;  %v5042_v4 = vsel %vm1358_vm7, %v5725_v23, %v2796_v18  ;;  %v5061_v53 = vsel %vm448_vm13, %v2790_v57, %v2791_v60  ;;  %v1536_v63 = vsel %vm1358_vm7, %v2796_v18, %v5728_v13 }
 0x346   :  { %1655 = vmatpush.msrb.mxu1 %v4470_v25  ;;  %1721 = vmatpush.msrb.mxu3 %v4926_v30  ;;  %v1423_v25 = vsel %vm516_vm11, %v2805_v19, %v2806_v55  ;;  %v1485_v57 = vsel %vm1479_vm1, %v5730_v16, %v1476_v44  ;;  %v5731_v19 = vunpack.i.l.bf16 %v4723_v61  ;;  %v1539_v31 = vsel %vm448_vm13, %v2791_v60, %v5736_v38 }
 0x347   :  { %1691 = vmatpush.msra.mxu0 %v4647_v3  ;;  %1714 = vmatpush.msrb.mxu2 %v1453_v29  ;;  %v5054_v3 = vsel %vm1327_vm8, %v2800_v28, %v2801_v39  ;;  %v5078_v28 = vsel %vm5727_vm12, %v2815_v35, %v2816_v56  ;;  %vm5749_vm12 = vmmov %vm5732_vm14 }
 0x348   :  { %1747 = vmatpush.msra.mxu1 %v5042_v4  ;;  %1722 = vmatpush.msrb.mxu3 %v4966_v58  ;;  %v1530_v5 = vsel %vm5732_vm14, %v2811_v12, %v5731_v19  ;;  %vm5750_vm14 = vmmov %vm5749_vm12 }
 0x349   :  { %1692 = vmatpush.msra.mxu0 %v4710_v41  ;;  %1715 = vmatpush.msrb.mxu2 %v1423_v25  ;;  %v5068_v41 = vsel %vm5726_vm10, %v2810_v10, %v2811_v12  ;;  %vm5748_vm10 = vmmov %vm5735_vm0 }
 0x34a   :  { %1748 = vmatpush.msra.mxu1 %v5054_v3  ;;  %1723 = vmatpush.msrb.mxu3 %v4982_v48  ;;  %v1416_v10 = vpop.permute.xlu1 %1415 }
 0x34b   :  { %1760 = vmatpush.msra.mxu2 %v5061_v53  ;;  %1693 = vmatpush.msra.mxu0 %v4733_v0  ;;  %v1446_v0 = vpop.permute.xlu0 %1445  ;;  %v1424_v61 = vsel %vm516_vm11, %v2806_v55, %v1416_v10 }
 0x34c   :  { %1749 = vmatpush.msra.mxu1 %v5068_v41  ;;  %2182 = vmatmul.msk.f32.vlgmr.msra.gmra.mxu3 %vm777_vm2, %v4948_v32 }
 0x34d   :  { %1724 = vmatpush.msrb.mxu3 %v4994_v45  ;;  %1761 = vmatpush.msra.mxu2 %v5042_v4 }
 0x34e   :  { %1694 = vmatpush.msra.mxu0 %v4750_v46  ;;  %1750 = vmatpush.msra.mxu1 %v5078_v28  ;;  %v1516_v46 = vsel %vm1510_vm15, %v2776_v9, %v1507_v47  ;;  %v1509_v9 = vpop.permute.xlu2 %1508 }
 0x34f   :  { %1725 = vmatpush.msrb.mxu3 %v4524_v27  ;;  %1762 = vmatpush.msra.mxu2 %v5054_v3  ;;  %v1517_v36 = vsel %vm1510_vm15, %v1507_v47, %v1509_v9 }
 0x350   :  { %1695 = vmatpush.msra.mxu0 %v4484_v21  ;;  %1751 = vmatpush.msra.mxu1 %v4541_v34  ;;  %v5729_v21 = vunpack.i.l.bf16 %v4755_v11 }
 0x351   :  { %1656 = vmatmul.f32.vlgmr.msrb.gmra.mxu1 %v4931_v7  ;;  %1726 = vmatpush.msrb.mxu3 %v1515_v37  ;;  %v1527_v37 = vsel %vm5735_vm0, %v2816_v56, %v5734_v22 }
 0x352   :  { %1763 = vmatpush.msra.mxu2 %v5068_v41  ;;  %1787 = vmatpush.msrb.mxu0 %v1536_v63  ;;  %v1533_v35 = vsel %vm1327_vm8, %v2801_v39, %v5729_v21  ;;  %vm5733_vm8 = vmmov %vm5710_vm4 }
 0x353   :  { %1752 = vmatpush.msra.mxu1 %v1516_v46  ;;  %1727 = vmatpush.msrb.mxu3 %v1484_v17  ;;  %v1454_v11 = vsel %vm5733_vm8, %v2786_v15, %v1446_v0  ;;  %v1478_v18 = vpop.permute.xlu0 %1477  ;;  %v1448_v15 = vpop.permute.xlu1 %1447  ;;  %vm5747_vm4 = vmmov %vm5735_vm0 }
 0x354   :  { %1764 = vmatpush.msra.mxu2 %v5078_v28  ;;  %1788 = vmatpush.msrb.mxu0 %v1533_v35  ;;  %v1455_v49 = vsel %vm5737_vm6, %v1446_v0, %v1448_v15  ;;  %vm5751_vm8 = vmmov %vm5749_vm12 }
 0x355   :  { %1753 = vmatpush.msra.mxu1 %v1485_v57  ;;  %1728 = vmatpush.msrb.mxu3 %v1453_v29 }
 0x356   :  { %1765 = vmatpush.msra.mxu2 %v4541_v34  ;;  %1789 = vmatpush.msrb.mxu0 %v1530_v5  ;;  %v1418_v33 = vpop.permute.xlu2 %1417 }
 0x357   :  { %1754 = vmatpush.msra.mxu1 %v1454_v11  ;;  %1729 = vmatpush.msrb.mxu3 %v1423_v25 }
 0x358   :  { %1766 = vmatpush.msra.mxu2 %v1516_v46  ;;  %1790 = vmatpush.msrb.mxu0 %v1527_v37 }
 0x359   :  { %1755 = vmatpush.msra.mxu1 %v1424_v61  ;;  %1730 = vmatpush.msrb.mxu3 %v4848_v40  ;;  %v1486_v40 = vsel %vm1479_vm1, %v1476_v44, %v1478_v18 }
 0x35a   :  { %1767 = vmatpush.msra.mxu2 %v1485_v57  ;;  %1791 = vmatpush.msrb.mxu0 %v4506_v43 }
 0x35b   :  { %1800 = vmatpush.msrb.mxu1 %v1539_v31  ;;  %1731 = vmatpush.msrb.mxu3 %v4856_v24  ;;  %v1425_v24 = vsel %vm516_vm11, %v1416_v10, %v1418_v33 }
 0x35c   :  { %1768 = vmatpush.msra.mxu2 %v1454_v11  ;;  %1792 = vmatpush.msrb.mxu0 %v1517_v36 }
 0x35d   :  { %1801 = vmatpush.msrb.mxu1 %v1536_v63  ;;  %1732 = vmatpush.msrb.mxu3 %v4874_v59 }
 0x35e   :  { %1769 = vmatpush.msra.mxu2 %v1424_v61  ;;  %1793 = vmatpush.msrb.mxu0 %v1486_v40 }
 0x35f   :  { %1802 = vmatpush.msrb.mxu1 %v1533_v35  ;;  %1733 = vmatpush.msrb.mxu3 %v4889_v2 }
 0x360   :  { %1770 = vmatpush.msra.mxu2 %v5017_v52  ;;  %1794 = vmatpush.msrb.mxu0 %v1455_v49 }
 0x361   :  { %1803 = vmatpush.msrb.mxu1 %v1530_v5  ;;  %1734 = vmatpush.msrb.mxu3 %v4906_v6 }
 0x362   :  { %1771 = vmatpush.msra.mxu2 %v4926_v30  ;;  %1795 = vmatpush.msrb.mxu0 %v1425_v24 }
 0x363   :  { %1804 = vmatpush.msrb.mxu1 %v1527_v37  ;;  %2183 = vmatmul.msk.f32.vlgmr.msrb.gmra.mxu2 %vm777_vm2, %v4948_v32 }
 0x364   :  { %1735 = vmatpush.msrb.mxu3 %v4500_v50  ;;  %1772 = vmatpush.msra.mxu2 %v4966_v58  ;;  %v5738_v50 = vunpack.i.l.bf16 %v4561_v8  ;;  %v5742_v8 = vunpack.i.l.bf16 %v4583_v14 }
 0x365   :  { %1805 = vmatpush.msrb.mxu1 %v4506_v43  ;;  %1696 = vmatmul.f32.vlgmr.msra.gmra.mxu0 %v4931_v7 }
 0x366   :  { %1827 = vmatpush.msra.mxu3 %v4782_v62  ;;  %1773 = vmatpush.msra.mxu2 %v4982_v48  ;;  %v1551_v43 = vsel %vm1510_vm15, %v1509_v9, %v5738_v50  ;;  %vm5743_vm15 = vmmov %vm5735_vm0 }
 0x367   :  { %1806 = vmatpush.msrb.mxu1 %v1517_v36  ;;  %1736 = vmatmul.f32.vlgmr.msrb.gmra.mxu3 %v4931_v7 }
 0x368   :  { %1828 = vmatpush.msra.mxu3 %v4804_v54  ;;  %1774 = vmatpush.msra.mxu2 %v4994_v45 }
 0x369   :  { %1807 = vmatpush.msrb.mxu1 %v1486_v40 }
 0x36a   :  { %1829 = vmatpush.msra.mxu3 %v4822_v51  ;;  %1775 = vmatpush.msra.mxu2 %v4524_v27  ;;  %v5739_v27 = vunpack.i.l.bf16 %v4585_v1  ;;  %v1542_v51 = vsel %vm516_vm11, %v1418_v33, %v5742_v8 }
 0x36b   :  { %2184 = vmatmul.msk.f32.vlgmr.msra.gmra.mxu1 %vm777_vm2, %v4948_v32  ;;  %1776 = vmatmul.f32.vlgmr.msra.gmra.mxu2 %v4931_v7 }
 0x36c   :  { %1808 = vmatpush.msrb.mxu1 %v1455_v49  ;;  %1830 = vmatpush.msra.mxu3 %v4863_v20  ;;  %v1548_v62 = vsel %vm1479_vm1, %v1478_v18, %v5739_v27  ;;  %vm5744_vm1 = vmmov %vm5735_vm0 }
 0x36d   :  { %2185 = vmatmul.msk.f32.vlgmr.msrb.gmra.mxu0 %vm777_vm2, %v4948_v32  ;;  %vm5752_vm0 = vmmov %vm5751_vm8 }
 0x36e   :  { %1809 = vmatpush.msrb.mxu1 %v1425_v24  ;;  %1831 = vmatpush.msra.mxu3 %v4459_v26  ;;  %v5740_v26 = vunpack.i.l.bf16 %v4569_v42  ;;  %vm5753_vm6 = vmmov %vm5752_vm0 }
 0x370   :  { %1810 = vmatpush.msrb.mxu1 %v5061_v53  ;;  %1832 = vmatpush.msra.mxu3 %v1551_v43  ;;  %v1545_v54 = vsel %vm5741_vm9, %v1448_v15, %v5740_v26  ;;  %vm5754_vm9 = vmmov %vm5752_vm0 }
 0x372   :  { %1811 = vmatpush.msrb.mxu1 %v5042_v4  ;;  %1833 = vmatpush.msra.mxu3 %v1548_v62 }
 0x374   :  { %1812 = vmatpush.msrb.mxu1 %v5054_v3  ;;  %1834 = vmatpush.msra.mxu3 %v1545_v54 }
 0x376   :  { %1813 = vmatpush.msrb.mxu1 %v5068_v41  ;;  %1835 = vmatpush.msra.mxu3 %v1542_v51 }
 0x377   :  { %2186 = vmatmul.msk.f32.vlgmr.msra.gmra.mxu3 %vm777_vm2, %v4948_v32 }
 0x378   :  { %1814 = vmatpush.msrb.mxu1 %v5078_v28 }
 0x37a   :  { %1815 = vmatpush.msrb.mxu1 %v4541_v34 }
 0x37b   :  { %1816 = vmatmul.f32.vlgmr.msrb.gmra.mxu1 %v4931_v7 }
 0x38d   :  { %v1555_v30 = vpop.permute.xlu0 %1554 }
 0x3b6   :  { %v1597_v1 = vpop.f32.mrf.mxu1 }
 0x3b8   :  { %v1637_v59 = vpop.f32.mrf.mxu0 }
 0x3ba   :  { %v1577_v42 = vpop.f32.mrf.mxu3 }
 0x3bb   :  { %v1578_v13 = vadd.f32 %v1577_v42, %v1555_v30 }
 0x3bd   :  { %v1598_v35 = vadd.f32 %v1597_v1, %v1578_v13 }
 0x3bf   :  { %v5192_v16 = vmax.f32 %v1598_v35, 0.0 }
 0x3c1   :  { %v1617_v20 = vpop.f32.mrf.mxu2 }
 0x3c2   :  { %v1618_v34 = vadd.f32 %v1617_v20, %v1555_v30 }
 0x3c4   :  { %v5175_v12 = vadd.f32 %v1637_v59, %v1618_v34 }
 0x3c6   :  { %v1841_v53 = vmax.f32 %v5175_v12, 0.0 }
 0x3ce   :  { %v1657_v58 = vpop.f32.mrf.mxu1 }
 0x3cf   :  { %v1677_v2 = vpop.f32.mrf.mxu3  ;;  %v1658_v39 = vadd.f32 %v1657_v58, %v1555_v30 }
 0x3d1   :  { %v5177_v23 = vadd.f32 %v1677_v2, %v1658_v39 }
 0x3d3   :  { %v1842_v41 = vmax.f32 %v5177_v23, 0.0 }
 0x3d5   :  { %v2853_v46 = vpack.i.bf16 %v1841_v53, %v1842_v41 }
 0x3e2   :  { %v1697_v6 = vpop.f32.mrf.mxu0 }
 0x3e3   :  { %v1698_v4 = vadd.f32 %v1697_v6, %v1555_v30 }
 0x3e6   :  { %v1717_v14 = vpop.f32.mrf.mxu2 }
 0x3e7   :  { %v1718_v44 = vadd.f32 %v1717_v14, %v1698_v4 }
 0x3e8   :  { %v1757_v47 = vpop.f32.mrf.mxu1 }
 0x3e9   :  { %v1843_v63 = vmax.f32 %v1718_v44, 0.0 }
 0x3ea   :  { %v1737_v48 = vpop.f32.mrf.mxu3  ;;  %v1797_v32 = vpop.f32.mrf.mxu0 }
 0x3eb   :  { %v1738_v45 = vadd.f32 %v1737_v48, %v1555_v30 }
 0x3ed   :  { %v5172_v52 = vadd.f32 %v1757_v47, %v1738_v45 }
 0x3ee   :  { %v1777_v55 = vpop.f32.mrf.mxu2 }
 0x3ef   :  { %v1778_v17 = vadd.f32 %v1777_v55, %v1555_v30  ;;  %v1844_v7 = vmax.f32 %v5172_v52, 0.0 }
 0x3f1   :  { %v1798_v60 = vadd.f32 %v1797_v32, %v1778_v17 }
 0x3f3   :  { %v1845_v29 = vmax.f32 %v1798_v60, 0.0 }
 0x3f5   :  { %v2838_v25 = vpack.i.bf16 %v1845_v29, %v1844_v7 }
 0x3f7   :  { %2839 = vrot.lane.b32.xlu0 %v2838_v25, %s2952_s24  ;;  %2819 = vrot.lane.b32.xlu1 %v2838_v25, %s2945_s17 }
 0x3f8   :  { %v1817_v56 = vpop.f32.mrf.mxu1 }
 0x3f9   :  { %v1818_v3 = vadd.f32 %v1817_v56, %v1555_v30 }
 0x3fa   :  { %v1837_v28 = vpop.f32.mrf.mxu3 }
 0x3fb   :  { %v1838_v0 = vadd.f32 %v1837_v28, %v1818_v3 }
 0x3fd   :  { %v1846_v10 = vmax.f32 %v1838_v0, 0.0 }
 0x3ff   :  { %2824 = vrot.lane.b32.xlu1 %v2838_v25, %s2954_s26  ;;  %2854 = vrot.lane.b32.xlu0 %v2853_v46, %s2954_s26  ;;  %v2828_v21 = vpack.i.bf16 %v1843_v63, %v1846_v10 }
 0x401   :  { %2829 = vrot.lane.b32.xlu2 %v2828_v21, %s2945_s17 }
 0x407   :  { %2844 = vrot.lane.b32.xlu1 %v2828_v21, %s2952_s24  ;;  %1886 = vrot.lane.b32.xlu0 %v5192_v16, %s2954_s26 }
 0x409   :  { %2834 = vrot.lane.b32.xlu2 %v2828_v21, %s2954_s26 }
 0x40f   :  { %2859 = vrot.lane.b32.xlu1 %v2853_v46, %s2952_s24 }
 0x411   :  { %2849 = vrot.lane.b32.xlu2 %v2853_v46, %s2945_s17 }
 0x417   :  { %1912 = vrot.lane.b32.xlu1 %v5192_v16, %s2952_s24  ;;  %s2970_s24 = smov 112  }
 0x419   :  { %1854 = vrot.lane.b32.xlu2 %v5192_v16, %s2945_s17  ;;  %s2969_s17 = smov 4  }
 0x45b   :  { %v2830_v57 = vpop.permute.xlu2 %2829 }
 0x45c   :  { %v2831_v31 = vunpack.i.l.bf16 %v2830_v57  ;;  %v2832_v15 = vunpack.i.h.bf16 %v2830_v57 }
 0x463   :  { %v2835_v5 = vpop.permute.xlu2 %2834 }
 0x464   :  { %v2837_v33 = vunpack.i.h.bf16 %v2835_v5  ;;  %v2836_v24 = vunpack.i.l.bf16 %v2835_v5 }
 0x469   :  { %v2820_v19 = vpop.permute.xlu1 %2819  ;;  %v2840_v11 = vpop.permute.xlu0 %2839 }
 0x46a   :  { %v2822_v22 = vunpack.i.h.bf16 %v2820_v19  ;;  %v2842_v18 = vunpack.i.h.bf16 %v2840_v11  ;;  %v2841_v38 = vunpack.i.l.bf16 %v2840_v11  ;;  %v2821_v36 = vunpack.i.l.bf16 %v2820_v19 }
 0x46b   :  { %v2850_v51 = vpop.permute.xlu2 %2849 }
 0x46c   :  { %v1873_v40 = vsel %vm5743_vm15, %v2822_v22, %v2831_v31  ;;  %v1930_v50 = vsel %vm516_vm11, %v2841_v38, %v2842_v18  ;;  %v1871_v27 = vsel %vm5744_vm1, %v2832_v15, %v2821_v36  ;;  %v1872_v62 = vsel %vm5745_vm3, %v2821_v36, %v2822_v22  ;;  %vm5755_vm15 = vmmov %vm5752_vm0 }
 0x46d   :  { %v1885_v8 = vmax.f32 %v1845_v29, %v1873_v40  ;;  %v1883_v58 = vmax.f32 %v1843_v63, %v1871_v27  ;;  %v1884_v6 = vmax.f32 %v1844_v7, %v1872_v62  ;;  %v2851_v45 = vunpack.i.l.bf16 %v2850_v51  ;;  %vm5756_vm1 = vmmov %vm5752_vm0 }
 0x46e   :  { %v2852_v44 = vunpack.i.h.bf16 %v2850_v51  ;;  %vm5757_vm3 = vmmov %vm5752_vm0 }
 0x46f   :  { %v1870_v60 = vsel %vm5746_vm5, %v2851_v45, %v2832_v15  ;;  %vm5758_vm5 = vmmov %vm5752_vm0 }
 0x470   :  { %v1882_v25 = vmax.f32 %v1842_v41, %v1870_v60  ;;  %v1869_v35 = vsel %vm5748_vm10, %v2852_v44, %v2851_v45 }
 0x471   :  { %v2825_v9 = vpop.permute.xlu1 %2824  ;;  %v2855_v14 = vpop.permute.xlu0 %2854  ;;  %v1881_v11 = vmax.f32 %v1841_v53, %v1869_v35 }
 0x472   :  { %v2827_v37 = vunpack.i.h.bf16 %v2825_v9  ;;  %v2826_v61 = vunpack.i.l.bf16 %v2825_v9  ;;  %v2856_v17 = vunpack.i.l.bf16 %v2855_v14  ;;  %v2857_v28 = vunpack.i.h.bf16 %v2855_v14 }
 0x473   :  { %v1855_v56 = vpop.permute.xlu2 %1854 }
 0x474   :  { %v1904_v49 = vsel %vm448_vm13, %v2826_v61, %v2827_v37  ;;  %v1905_v1 = vsel %vm448_vm13, %v2827_v37, %v2836_v24  ;;  %v1903_v20 = vsel %vm448_vm13, %v2837_v33, %v2826_v61  ;;  %v1902_v52 = vsel %vm448_vm13, %v2856_v17, %v2837_v33 }
 0x475   :  { %v1942_v42 = vmax.f32 %v1904_v49, %v1930_v50  ;;  %v1868_v63 = vsel %vm5747_vm4, %v1855_v56, %v2852_v44  ;;  %v1901_v57 = vsel %vm448_vm13, %v2857_v28, %v2856_v17  ;;  %vm5759_vm4 = vmmov %vm5752_vm0 }
 0x476   :  { %v1880_v19 = vmax.f32 %v5192_v16, %v1868_v63 }
 0x477   :  { %v1948_v47 = vmax.f32 %v1884_v6, %v1942_v42 }
 0x479   :  { %v2845_v43 = vpop.permute.xlu1 %2844  ;;  %v1887_v0 = vpop.permute.xlu0 %1886 }
 0x47a   :  { %v2847_v26 = vunpack.i.h.bf16 %v2845_v43  ;;  %v2846_v54 = vunpack.i.l.bf16 %v2845_v43  ;;  %v1900_v23 = vsel %vm448_vm13, %v1887_v0, %v2857_v28  ;;  %vm1981_vm13 = vcmask 916480   ;;  %v1954_v0 = vld [vmem:[%s5337_s6] sm:$0xff] }
 0x47c   :  { %v1929_v59 = vsel %vm516_vm11, %v2847_v26, %v2841_v38  ;;  %v1931_v2 = vsel %vm516_vm11, %v2842_v18, %v2846_v54 }
 0x47d   :  { %v1941_v30 = vmax.f32 %v1903_v20, %v1929_v59  ;;  %v1943_v48 = vmax.f32 %v1905_v1, %v1931_v2 }
 0x47f   :  { %v1947_v55 = vmax.f32 %v1883_v58, %v1941_v30  ;;  %v1949_v32 = vmax.f32 %v1885_v8, %v1943_v48 }
 0x481   :  { %2097 = vmatpush.msra.mxu0 %v1947_v55  ;;  %v2860_v34 = vpop.permute.xlu1 %2859  ;;  %v2878_v39 = vpack.i.bf16 %v1949_v32, %v1948_v47 }
 0x482   :  { %v2861_v29 = vunpack.i.l.bf16 %v2860_v34  ;;  %v2862_v7 = vunpack.i.h.bf16 %v2860_v34 }
 0x483   :  { %2879 = vrot.lane.b32.xlu1 %v2878_v39, %s2947_s19  ;;  %2874 = vrot.lane.b32.xlu0 %v2878_v39, %s2966_s18 }
 0x484   :  { %v1928_v4 = vsel %vm516_vm11, %v2861_v29, %v2847_v26  ;;  %2864 = vrot.lane.b32.xlu2 %v2878_v39, %s2968_s4  ;;  %v1927_v10 = vsel %vm516_vm11, %v2862_v7, %v2861_v29 }
 0x485   :  { %v1940_v3 = vmax.f32 %v1902_v52, %v1928_v4  ;;  %v1939_v5 = vmax.f32 %v1901_v57, %v1927_v10 }
 0x487   :  { %v5223_v13 = vmax.f32 %v1882_v25, %v1940_v3  ;;  %v5239_v37 = vmax.f32 %v1881_v11, %v1939_v5 }
 0x489   :  { %v1913_v46 = vpop.permute.xlu1 %1912  ;;  %v2883_v21 = vpack.i.bf16 %v5223_v13, %v1947_v55  ;;  %v2893_v61 = vpack.i.bf16 %v1947_v55, %v5223_v13 }
 0x48a   :  { %v1926_v41 = vsel %vm516_vm11, %v1913_v46, %v2862_v7  ;;  %vm1974_vm11 = vcmask 949248  }
 0x48b   :  { %v1938_v9 = vmax.f32 %v1900_v23, %v1926_v41  ;;  %2884 = vrot.lane.b32.xlu1 %v2883_v21, %s2966_s18  ;;  %2028 = vrot.lane.b32.xlu0 %v1948_v47, %s2969_s17 }
 0x48c   :  { %2869 = vrot.lane.b32.xlu2 %v2883_v21, %s2968_s4 }
 0x48d   :  { %v5237_v22 = vmax.f32 %v1880_v19, %v1938_v9 }
 0x48f   :  { %v2903_v16 = vpack.i.bf16 %v5237_v22, %v5239_v37 }
 0x493   :  { %2894 = vrot.lane.b32.xlu0 %v2893_v61, %s2970_s24  ;;  %2904 = vrot.lane.b32.xlu1 %v2903_v16, %s2968_s4 }
 0x494   :  { %2889 = vrot.lane.b32.xlu2 %v2883_v21, %s2947_s19 }
 0x49b   :  { %1966 = vrot.lane.b32.xlu0 %v5239_v37, %s2966_s18 }
 0x49c   :  { %2899 = vrot.lane.b32.xlu2 %v2903_v16, %s2970_s24 }
 0x4de   :  { %v2865_v12 = vpop.permute.xlu2 %2864 }
 0x4df   :  { %v2867_v53 = vunpack.i.h.bf16 %v2865_v12  ;;  %v2866_v18 = vunpack.i.l.bf16 %v2865_v12 }
 0x4e1   :  { %v2039_v38 = vsel %vm1974_vm11, %v2866_v18, %v2867_v53 }
 0x4e2   :  { %v2908_v31 = vpack.i.bf16 %v2867_v53, %v2039_v38 }
 0x4e4   :  { %2909 = vrot.lane.b32.xlu1 %v2908_v31, %s2947_s19 }
 0x4e6   :  { %v5250_v36 = vpop.permute.xlu2 %2869 }
 0x4e7   :  { %v2871_v20 = vunpack.i.l.bf16 %v5250_v36  ;;  %v2872_v32 = vunpack.i.h.bf16 %v5250_v36 }
 0x4e9   :  { %v2027_v58 = vsel %vm1974_vm11, %v2871_v20, %v2866_v18  ;;  %v2012_v44 = vsel %vm1974_vm11, %v2872_v32, %v2871_v20 }
 0x4ea   :  { %v2928_v45 = vpack.i.bf16 %v2866_v18, %v2027_v58  ;;  %v1953_v58 = vld [vmem:[%s5338_s5 + $0x18] sm:$0xff] }
 0x4ee   :  { %v5252_v15 = vpop.permute.xlu2 %2889 }
 0x4ef   :  { %v2891_v30 = vunpack.i.l.bf16 %v5252_v15  ;;  %v2892_v3 = vunpack.i.h.bf16 %v5252_v15 }
 0x4f1   :  { %v2004_v63 = vsel %vm5751_vm8, %v2892_v3, %v2891_v30 }
 0x4f5   :  { %v2880_v40 = vpop.permute.xlu1 %2879  ;;  %v2875_v49 = vpop.permute.xlu0 %2874 }
 0x4f6   :  { %v2882_v33 = vunpack.i.h.bf16 %v2880_v40  ;;  %v2881_v24 = vunpack.i.l.bf16 %v2880_v40  ;;  %v2877_v50 = vunpack.i.h.bf16 %v2875_v49  ;;  %v2876_v43 = vunpack.i.l.bf16 %v2875_v49  ;;  %v2900_v27 = vpop.permute.xlu2 %2899 }
 0x4f7   :  { %v2902_v62 = vunpack.i.h.bf16 %v2900_v27  ;;  %v2901_v26 = vunpack.i.l.bf16 %v2900_v27 }
 0x4f8   :  { %v5255_v54 = vsel %vm5749_vm12, %v2881_v24, %v2882_v33  ;;  %v2036_v8 = vsel %vm1358_vm7, %v2876_v43, %v2877_v50  ;;  %v5271_v55 = vsel %vm5750_vm14, %v2891_v30, %v2881_v24 }
 0x4f9   :  { %v2923_v51 = vpack.i.bf16 %v2882_v33, %v5255_v54  ;;  %v2918_v42 = vpack.i.bf16 %v2877_v50, %v2036_v8  ;;  %v5260_v1 = vsel %vm1981_vm13, %v2902_v62, %v2901_v26  ;;  %v2938_v17 = vpack.i.bf16 %v2881_v24, %v5271_v55 }
 0x4fb   :  { %2919 = vrot.lane.b32.xlu0 %v2918_v42, %s2947_s19  ;;  %2924 = vrot.lane.b32.xlu2 %v2923_v51, %s2947_s19 }
 0x4fd   :  { %v2885_v59 = vpop.permute.xlu1 %2884  ;;  %v2029_v2 = vpop.permute.xlu0 %2028 }
 0x4fe   :  { %v2886_v6 = vunpack.i.l.bf16 %v2885_v59  ;;  %v2913_v14 = vpack.i.bf16 %v2029_v2, %v5239_v37  ;;  %v2887_v4 = vunpack.i.h.bf16 %v2885_v59  ;;  %v1951_v2 = vld [vmem:[%s5338_s5 + $0x8] sm:$0xff] }
 0x500   :  { %v2024_v48 = vsel %vm1358_vm7, %v2886_v6, %v2876_v43  ;;  %2914 = vrot.lane.b32.xlu1 %v2913_v14, %s2947_s19  ;;  %v2008_v28 = vsel %vm1358_vm7, %v2887_v4, %v2886_v6  ;;  %v1952_v6 = vld [vmem:[%s5338_s5 + $0x10] sm:$0xff] }
 0x501   :  { %v2933_v47 = vpack.i.bf16 %v2876_v43, %v2024_v48 }
 0x503   :  { %2934 = vrot.lane.b32.xlu0 %v2933_v47, %s2947_s19  ;;  %2929 = vrot.lane.b32.xlu2 %v2928_v45, %s2947_s19 }
 0x505   :  { %v2895_v34 = vpop.permute.xlu0 %2894  ;;  %v2905_v39 = vpop.permute.xlu1 %2904 }
 0x506   :  { %v2897_v60 = vunpack.i.h.bf16 %v2895_v34  ;;  %v2896_v29 = vunpack.i.l.bf16 %v2895_v34  ;;  %v2907_v52 = vunpack.i.h.bf16 %v2905_v39  ;;  %v2906_v7 = vunpack.i.l.bf16 %v2905_v39 }
 0x508   :  { %2939 = vrot.lane.b32.xlu1 %v2938_v17, %s2947_s19  ;;  %v2016_v25 = vsel %vm1981_vm13, %v2896_v29, %v2897_v60  ;;  %v1975_v56 = vsel %vm1974_vm11, %v2907_v52, %v2906_v7  ;;  %v1999_v10 = vsel %vm1981_vm13, %v2901_v26, %v2896_v29  ;;  %v1995_v21 = vsel %vm1974_vm11, %v2906_v7, %v2872_v32 }
 0x509   :  { %2098 = vmatpush.msra.mxu0 %v2016_v25 }
 0x50b   :  { %1958 = vrot.lane.b32.xlu0 %v5237_v22, %s2947_s19  ;;  %2099 = vmatpush.msra.mxu0 %v2012_v44 }
 0x50c   :  { %1964 = vrot.lane.b32.xlu2 %v5237_v22, %s2966_s18 }
 0x50d   :  { %2100 = vmatpush.msra.mxu0 %v2008_v28  ;;  %v1967_v46 = vpop.permute.xlu0 %1966 }
 0x50e   :  { %v1991_v35 = vsel %vm1358_vm7, %v1967_v46, %v2887_v4 }
 0x50f   :  { %2101 = vmatpush.msra.mxu0 %v2004_v63 }
 0x510   :  { %2083 = vperm.xlu1 %2596, %v1954_v0  }
 0x511   :  { %2102 = vmatpush.msra.mxu0 %v5223_v13  ;;  %v1955_v13 = vld [vmem:[%s5337_s6 + $0x8] sm:$0xff] }
 0x513   :  { %2103 = vmatpush.msra.mxu0 %v1999_v10 }
 0x514   :  { %2088 = vperm.xlu2 %2943, %v1955_v13  }
 0x515   :  { %2104 = vmatpush.msra.mxu0 %v1995_v21 }
 0x517   :  { %2105 = vmatpush.msra.mxu0 %v1991_v35 }
 0x555   :  { %v2925_v5 = vpop.permute.xlu2 %2924 }
 0x556   :  { %v2910_v57 = vpop.permute.xlu1 %2909  ;;  %v2927_v11 = vunpack.i.h.bf16 %v2925_v5  ;;  %v2926_v61 = vunpack.i.l.bf16 %v2925_v5 }
 0x557   :  { %v2912_v23 = vunpack.i.h.bf16 %v2910_v57  ;;  %v2911_v41 = vunpack.i.l.bf16 %v2910_v57 }
 0x558   :  { %v2069_v31 = vsel %vm5754_vm9, %v2926_v61, %v2927_v11 }
 0x559   :  { %v2071_v19 = vsel %vm5752_vm0, %v2911_v41, %v2912_v23 }
 0x55a   :  { %2127 = vmatpush.msrb.mxu2 %v2071_v19 }
 0x55d   :  { %v2930_v53 = vpop.permute.xlu2 %2929 }
 0x55e   :  { %v2932_v15 = vunpack.i.h.bf16 %v2930_v53  ;;  %v2931_v40 = vunpack.i.l.bf16 %v2930_v53 }
 0x560   :  { %v2068_v27 = vsel %vm5756_vm1, %v2931_v40, %v2932_v15 }
 0x566   :  { %v1965_v62 = vpop.permute.xlu2 %1964 }
 0x567   :  { %v1968_v20 = vsel %vm1358_vm7, %v1965_v62, %v1967_v46  ;;  %vm2145_vm7 = vcmask 7168  }
 0x56d   :  { %v2920_v9 = vpop.permute.xlu0 %2919 }
 0x56e   :  { %v2922_v16 = vunpack.i.h.bf16 %v2920_v9  ;;  %v2921_v12 = vunpack.i.l.bf16 %v2920_v9 }
 0x570   :  { %v2070_v18 = vsel %vm5753_vm6, %v2921_v12, %v2922_v16 }
 0x571   :  { %2128 = vmatpush.msrb.mxu2 %v2070_v18 }
 0x572   :  { %v2915_v38 = vpop.permute.xlu1 %2914 }
 0x573   :  { %v2916_v36 = vunpack.i.l.bf16 %v2915_v38  ;;  %2129 = vmatpush.msrb.mxu2 %v2069_v31  ;;  %v2917_v49 = vunpack.i.h.bf16 %v2915_v38 }
 0x575   :  { %v2935_v33 = vpop.permute.xlu0 %2934  ;;  %2130 = vmatpush.msrb.mxu2 %v5255_v54  ;;  %v1987_v24 = vsel %vm5755_vm15, %v2916_v36, %v2892_v3 }
 0x576   :  { %v2937_v50 = vunpack.i.h.bf16 %v2935_v33  ;;  %v2936_v43 = vunpack.i.l.bf16 %v2935_v33  ;;  %2106 = vmatpush.msra.mxu0 %v1987_v24 }
 0x577   :  { %2131 = vmatpush.msrb.mxu2 %v2917_v49 }
 0x578   :  { %2107 = vmatpush.msra.mxu0 %v5239_v37  ;;  %v2067_v8 = vsel %vm5757_vm3, %v2936_v43, %v2937_v50 }
 0x579   :  { %2132 = vmatpush.msrb.mxu2 %v2068_v27 }
 0x57a   :  { %v2940_v26 = vpop.permute.xlu1 %2939  ;;  %2108 = vmatpush.msra.mxu0 %v5260_v1  ;;  %v1950_v1 = vld [vmem:[%s5338_s5] sm:$0xff] }
 0x57b   :  { %v2942_v51 = vunpack.i.h.bf16 %v2940_v26  ;;  %v2941_v42 = vunpack.i.l.bf16 %v2940_v26  ;;  %2133 = vmatpush.msrb.mxu2 %v2067_v8 }
 0x57c   :  { %2109 = vmatpush.msra.mxu0 %v1975_v56 }
 0x57d   :  { %v1959_v54 = vpop.permute.xlu0 %1958  ;;  %v2066_v59 = vsel %vm5758_vm5, %v2941_v42, %v2942_v51 }
 0x57e   :  { %2110 = vmatpush.msra.mxu0 %v1968_v20  ;;  %2134 = vmatpush.msrb.mxu2 %v2066_v59  ;;  %v1962_v37 = vsel %vm5759_vm4, %v1959_v54, %v2916_v36 }
 0x580   :  { %2111 = vmatpush.msra.mxu0 %v1962_v37  ;;  %2135 = vmatpush.msrb.mxu2 %v5271_v55  ;;  %v2089_v55 = vpop.permute.xlu2 %2088 }
 0x581   :  { %2187 = vmatmul.msk.f32.vlgmr.msrb.gmra.mxu2 %vm777_vm2, %v1951_v2 }
 0x582   :  { %2112 = vmatpush.msra.mxu0 %v5237_v22  ;;  %v2084_v30 = vpop.permute.xlu1 %2083 }
 0x583   :  { %2113 = vmatmul.f32.vlgmr.msra.gmra.mxu0 %v1950_v1 }
 0x589   :  { %2188 = vmatmul.msk.f32.gmra.mxu2 %vm777_vm2, %v1953_v58 }
 0x58b   :  { %2116 = vmatmul.f32.gmra.mxu0 %v1952_v6 }
 0x600   :  { %v2114_v14 = vpop.f32.mrf.mxu0 }
 0x601   :  { %v2115_v48 = vadd.f32 %v2114_v14, %v2084_v30 }
 0x604   :  { %v2137_v45 = vpop.f32.mrf.mxu2 }
 0x605   :  { %v2138_v47 = vadd.f32 %v2137_v45, %v2115_v48 }
 0x607   :  { %v2143_v22 = vmax.f32 %v2138_v47, 0.0 }
 0x608   :  { %v2117_v32 = vpop.f32.mrf.mxu0 }
 0x609   :  { %2146 = vst.msk [vmem:[%s5339_s7] sm:$0xff] %vm2145_vm7, %v2143_v22  ;;  %v2118_v17 = vadd.f32 %v2117_v32, %v2089_v55 }
 0x60c   :  { %v2140_v34 = vpop.f32.mrf.mxu2 }
 0x60d   :  { %v2141_v39 = vadd.f32 %v2140_v34, %v2118_v17 }
 0x60f   :  { %v2144_v60 = vmax.f32 %v2141_v39, 0.0 }
 0x611   :  { %2147 = vst.msk [vmem:[%s5339_s7 + $0x8] sm:$0xff] %vm2145_vm7, %v2144_v60 }

</bundles_post_ra>
